<compile_context>
chip_gen: v6e
topology: v6e:2x2x1
jax: 0.10.0
libtpu: 0.0.40
codegen_flags: <defaults>
</compile_context>

<pallas_src>
import jax
import jax.numpy as jnp
import numpy as np
from jax.experimental import pallas as pl
from jax.experimental.pallas import tpu as pltpu

MAX_CH = 2  # max children per tree node (static unroll bound of the child loop)


# ----------------------------------------------------------------------------
# Kernel: ChildSum TreeLSTM over BOTH trees, interleaved, single grid step
# ----------------------------------------------------------------------------
def _tree_lstm_kernel(child_idx_ref, nchild_ref,       # scalar prefetch (SMEM, flattened 1D)
                      x_ref, wx_ref, wh_ref, b_ref,    # VMEM inputs
                      root_ref,                        # VMEM output: (2, 2M) root [c|h] rows
                      state_ref):                      # VMEM scratch: (2N, 2M) packed [c|h]
    two_n, two_m = state_ref.shape
    N = two_n // 2
    M = two_m // 2

    # Zero-init packed state once: masked child gathers can never observe stale VMEM.
    state_ref[...] = jnp.zeros_like(state_ref)

    # Prologue: one batched MXU matmul for the input projection of every node of BOTH
    # trees; kept as a value (2N=16 rows x 4M=128 lanes f32 = 2 vregs), no scratch.
    gx_all = (jnp.dot(x_ref[...], wx_ref[...],
                      preferred_element_type=jnp.float32) + b_ref[...])
    wh = wh_ref[...]                                   # (M, 4M), resident for the whole kernel

    # Fully unrolled node loop: every index below is a compile-time constant except the
    # child indices / child counts coming from SMEM.
    for n in range(N):
        # ---- scalar reads first (SMEM sld early, off the vector critical path) ----
        nch = [nchild_ref[t * N + n] for t in range(2)]
        cidx = [[child_idx_ref[(t * N + n) * MAX_CH + j] for j in range(MAX_CH)]
                for t in range(2)]

        # ---- gather the 2*MAX_CH child [c|h] rows (both trees), masked in vregs ----
        rows = []
        for t in range(2):
            for j in range(MAX_CH):
                row = state_ref[pl.ds(t * N + cidx[t][j], 1), :]      # (1, 2M)
                rows.append(jnp.where(j < nch[t], row, 0.0))
        ch = jnp.concatenate(rows, axis=0)                            # (2*MAX_CH, 2M)
        ch_c = ch[:, :M]                                              # (2*MAX_CH, M)
        ch_h = ch[:, M:]                                              # (2*MAX_CH, M)

        # ---- ONE batched child matmul for all children of both trees ----
        gh = jnp.dot(ch_h, wh, preferred_element_type=jnp.float32)    # (2*MAX_CH, 4M)

        # ---- per-tree gate math (independent chains interleave on VPU/EUP) ----
        for t in range(2):
            gx = gx_all[t * N + n: t * N + n + 1, :]                  # (1, 4M)
            gh_t = gh[t * MAX_CH:(t + 1) * MAX_CH, :]                 # (MAX_CH, 4M)
            c_t = ch_c[t * MAX_CH:(t + 1) * MAX_CH, :]                # (MAX_CH, M)

            fx = gx[:, 3 * M:]                                        # (1, M)
            f = jax.nn.sigmoid(gh_t[:, 3 * M:] + fx)                  # (MAX_CH, M)
            fc = jnp.sum(f * c_t, axis=0, keepdims=True)              # (1, M)  (zero c rows => 0)

            pre = gx + jnp.sum(gh_t, axis=0, keepdims=True)           # (1, 4M)
            sg = jax.nn.sigmoid(pre)                                  # full-vreg EUP
            th = jnp.tanh(pre)
            i_g = sg[:, 0:M]
            o_g = sg[:, M:2 * M]
            u_g = th[:, 2 * M:3 * M]

            c = i_g * u_g + fc
            h = o_g * jnp.tanh(c)                                     # output_gate = True
            row_out = jnp.concatenate([c, h], axis=1)                 # (1, 2M) packed [c|h]
            state_ref[pl.ds(t * N + n, 1), :] = row_out
            if n == N - 1:                                            # root is the last node
                root_ref[pl.ds(t, 1), :] = row_out


def tree_lstm_root_pair(child_idx_flat, num_children_flat, x_nodes, wx, wh, b):
    """Run the ChildSum TreeLSTM on two stacked trees; return the two root [c|h] rows."""
    two_n, in_dim = x_nodes.shape
    M = wh.shape[0]

    grid_spec = pltpu.PrefetchScalarGridSpec(
        num_scalar_prefetch=2,
        grid=(1,),  # both trees handled (interleaved) in one grid step
        in_specs=[
            pl.BlockSpec((two_n, in_dim), lambda i, ci, nc: (0, 0)),   # x rows, both trees
            pl.BlockSpec((in_dim, 4 * M), lambda i, ci, nc: (0, 0)),   # Wx (full)
            pl.BlockSpec((M, 4 * M), lambda i, ci, nc: (0, 0)),        # Wh (full)
            pl.BlockSpec((1, 4 * M), lambda i, ci, nc: (0, 0)),        # combined bias
        ],
        out_specs=pl.BlockSpec((2, 2 * M), lambda i, ci, nc: (0, 0)),  # root [c|h] per tree
        scratch_shapes=[
            pltpu.VMEM((two_n, 2 * M), jnp.float32),  # packed [c|h] state for all nodes
        ],
    )
    roots = pl.pallas_call(
        _tree_lstm_kernel,
        grid_spec=grid_spec,
        out_shape=jax.ShapeDtypeStruct((2, 2 * M), jnp.float32),
        compiler_params=pltpu.CompilerParams(dimension_semantics=("arbitrary",)),
    )(child_idx_flat, num_children_flat, x_nodes, wx, wh, b)
    return roots  # rows: [left, right]; lanes: [c (M) | h (M)]


# ----------------------------------------------------------------------------
# Similarity head — tiny (1,2M)x(2M,H)x(H,C) MLP; left to XLA per perf feedback
# ----------------------------------------------------------------------------
def similarity_head(lvec, rvec, wh, bh, wp, bp):
    M = lvec.shape[1]
    mult_dist = lvec * rvec
    abs_dist = jnp.abs(lvec - rvec)
    # two half-matmuls instead of a concatenate (avoids a lane relayout)
    hid = jax.nn.sigmoid(mult_dist @ wh[:M] + abs_dist @ wh[M:] + bh)
    logits = hid @ wp + bp
    return jax.nn.log_softmax(logits, axis=-1)


# ----------------------------------------------------------------------------
# Full SimilarityTreeLSTM forward
# ----------------------------------------------------------------------------
def similarity_tree_lstm_forward(params, ltree, ltokens, rtree, rtokens, cell_m=False):
    emb = params["emb"]
    M = params["wh"].shape[0]
    # frozen embedding lookup (plain JAX gather glue)
    x = jnp.concatenate([emb[ltokens], emb[rtokens]], axis=0)            # (2N, in_dim)
    child_idx = jnp.concatenate(
        [ltree["child_idx"].reshape(-1), rtree["child_idx"].reshape(-1)]
    ).astype(jnp.int32)                                                  # (2N*MAX_CH,)
    num_children = jnp.concatenate(
        [ltree["num_children"], rtree["num_children"]]
    ).astype(jnp.int32)                                                  # (2N,)

    roots = tree_lstm_root_pair(child_idx, num_children, x,
                                params["wx"], params["wh"], params["b"])  # (2, 2M)
    if cell_m:
        lvec, rvec = roots[0:1, :M], roots[1:2, :M]       # cell state c
    else:
        lvec, rvec = roots[0:1, M:], roots[1:2, M:]       # hidden state h
    return similarity_head(lvec, rvec,
                           params["sim_wh"], params["sim_bh"],
                           params["sim_wp"], params["sim_bp"])


# ----------------------------------------------------------------------------
# Pure-numpy reference (same math) for a numerical sanity check
# ----------------------------------------------------------------------------
def _tree_lstm_ref(child_idx, num_children, x_nodes, wx, wh, b):
    N = x_nodes.shape[0]
    M = wh.shape[0]
    c_all = np.zeros((N, M), np.float32)
    h_all = np.zeros((N, M), np.float32)
    wx, wh, b = np.asarray(wx), np.asarray(wh), np.asarray(b)
    x_nodes = np.asarray(x_nodes)

    def sig(v):
        return 1.0 / (1.0 + np.exp(-v))

    for n in range(N):
        x = x_nodes[n:n + 1]
        gx = x @ wx + b
        fx = gx[:, 3 * M:4 * M]
        hsum = np.zeros((1, M), np.float32)
        fcs = np.zeros((1, M), np.float32)
        for j in range(int(num_children[n])):
            idx = int(child_idx[n, j])
            hj = h_all[idx:idx + 1]
            cj = c_all[idx:idx + 1]
            fj = sig(hj @ wh[:, 3 * M:4 * M] + fx)
            hsum = hsum + hj
            fcs = fcs + fj * cj
        pre = gx + hsum @ wh
        i = sig(pre[:, 0:M])
        o = sig(pre[:, M:2 * M])
        u = np.tanh(pre[:, 2 * M:3 * M])
        c = i * u + fcs
        h = o * np.tanh(c)
        c_all[n] = c
        h_all[n] = h
    return c_all, h_all


def _forward_ref(params, ltree, ltokens, rtree, rtokens):
    emb = np.asarray(params["emb"])
    _, lh = _tree_lstm_ref(ltree["child_idx"], ltree["num_children"],
                           emb[np.asarray(ltokens)],
                           params["wx"], params["wh"], params["b"])
    _, rh = _tree_lstm_ref(rtree["child_idx"], rtree["num_children"],
                           emb[np.asarray(rtokens)],
                           params["wx"], params["wh"], params["b"])
    l, r = lh[-1:, :], rh[-1:, :]
    vec = np.concatenate([l * r, np.abs(l - r)], axis=1)
    hid = 1.0 / (1.0 + np.exp(-(vec @ np.asarray(params["sim_wh"]) + np.asarray(params["sim_bh"]))))
    logits = hid @ np.asarray(params["sim_wp"]) + np.asarray(params["sim_bp"])
    m = logits.max(axis=-1, keepdims=True)
    lse = np.log(np.exp(logits - m).sum(axis=-1, keepdims=True)) + m
    return logits - lse


# ----------------------------------------------------------------------------
if __name__ == "__main__":
    vocab_size = 50
    in_dim = 64
    mem_dim = 32
    hidden_dim = 32
    num_classes = 5
    N = 8  # nodes per tree (topologically ordered: children before parents)

    key = jax.random.PRNGKey(0)
    ks = jax.random.split(key, 12)

    def init(k, shape, scale=0.1):
        return scale * jax.random.normal(k, shape, dtype=jnp.float32)

    # embedding (frozen), padding_idx=0 zeroed
    emb = init(ks[0], (vocab_size, in_dim))
    emb = emb.at[0].set(0.0)

    # gate weights packed [i | o | u | f]; biases combined (bx + bh) per gate
    wx = init(ks[1], (in_dim, 4 * mem_dim))
    wh = init(ks[2], (mem_dim, 4 * mem_dim))
    b = init(ks[3], (1, 4 * mem_dim))

    sim_wh = init(ks[4], (2 * mem_dim, hidden_dim))
    sim_bh = init(ks[5], (1, hidden_dim))
    sim_wp = init(ks[6], (hidden_dim, num_classes))
    sim_bp = init(ks[7], (1, num_classes))

    params = dict(emb=emb, wx=wx, wh=wh, b=b,
                  sim_wh=sim_wh, sim_bh=sim_bh, sim_wp=sim_wp, sim_bp=sim_bp)

    # left tree: leaves 0..3; 4<-(0,1); 5<-(2,3); 6<-(4,5); root 7<-(6)
    l_child_idx = jnp.array(
        [[0, 0], [0, 0], [0, 0], [0, 0], [0, 1], [2, 3], [4, 5], [6, 0]], dtype=jnp.int32)
    l_num_children = jnp.array([0, 0, 0, 0, 2, 2, 2, 1], dtype=jnp.int32)
    # right tree: leaves 0..2; 3<-(0,1); 4<-(2,3); 5<-(4); 6<-(5); root 7<-(6)
    r_child_idx = jnp.array(
        [[0, 0], [0, 0], [0, 0], [0, 1], [2, 3], [4, 0], [5, 0], [6, 0]], dtype=jnp.int32)
    r_num_children = jnp.array([0, 0, 0, 2, 2, 1, 1, 1], dtype=jnp.int32)

    # host-side sanity: the kernel silently drops children beyond MAX_CH
    assert int(np.max(np.asarray(l_num_children))) <= MAX_CH
    assert int(np.max(np.asarray(r_num_children))) <= MAX_CH

    ltree = dict(child_idx=l_child_idx, num_children=l_num_children)
    rtree = dict(child_idx=r_child_idx, num_children=r_num_children)

    ltokens = jax.random.randint(ks[8], (N,), 1, vocab_size, dtype=jnp.int32)
    rtokens = jax.random.randint(ks[9], (N,), 1, vocab_size, dtype=jnp.int32)

    fwd = jax.jit(similarity_tree_lstm_forward, static_argnames=("cell_m",))
    out = fwd(params, ltree, ltokens, rtree, rtokens, cell_m=False)
    out = jax.block_until_ready(out)

    ref = _forward_ref(params, ltree, ltokens, rtree, rtokens)
    np.testing.assert_allclose(np.asarray(out), ref, rtol=2e-3, atol=2e-3)

    print("KERNEL_OK")
</pallas_src>

<mosaic_0001>
module attributes {stable_mosaic.version = 11 : i64} {
  func.func @_tree_lstm_kernel(%arg0: i32, %arg1: memref<32xi32, #tpu.memory_space<smem>>, %arg2: memref<16xi32, #tpu.memory_space<smem>>, %arg3: memref<16x64xf32, #tpu.memory_space<vmem>>, %arg4: memref<64x128xf32, #tpu.memory_space<vmem>>, %arg5: memref<32x128xf32, #tpu.memory_space<vmem>>, %arg6: memref<1x128xf32, #tpu.memory_space<vmem>>, %arg7: memref<2x64xf32, #tpu.memory_space<vmem>>, %arg8: memref<16x64xf32, #tpu.memory_space<vmem>>) attributes {dimension_semantics = [#tpu.dimension_semantics<arbitrary>], iteration_bounds = array<i64: 1>, scalar_prefetch = 2 : i64, scratch_operands = 1 : i64, tpu.core_type = #tpu.core_type<tc>, window_params = [{pipeline_mode = #tpu.pipeline_mode<synchronous>, transform_indices = @transform_0, window_bounds = array<i64: 16, 64>}, {pipeline_mode = #tpu.pipeline_mode<synchronous>, transform_indices = @transform_1, window_bounds = array<i64: 64, 128>}, {pipeline_mode = #tpu.pipeline_mode<synchronous>, transform_indices = @transform_2, window_bounds = array<i64: 32, 128>}, {pipeline_mode = #tpu.pipeline_mode<synchronous>, transform_indices = @transform_3, window_bounds = array<i64: 1, 128>}, {pipeline_mode = #tpu.pipeline_mode<synchronous>, transform_indices = @transform_4, window_bounds = array<i64: 2, 64>}]} {
    %cst = arith.constant 0.000000e+00 : f32
    %0 = vector.broadcast %cst : f32 to vector<16x64xf32>
    %c0 = arith.constant 0 : index
    %c0_0 = arith.constant 0 : index
    %1 = vector.load %arg8[%c0, %c0_0] : memref<16x64xf32, #tpu.memory_space<vmem>>, vector<16x64xf32>
    tpu.vector_store %arg8[%c0, %c0_0], %0 {strides = array<i32>} : memref<16x64xf32, #tpu.memory_space<vmem>>, vector<16x64xf32>,
    %c0_1 = arith.constant 0 : index
    %c0_2 = arith.constant 0 : index
    %2 = vector.load %arg3[%c0_1, %c0_2] : memref<16x64xf32, #tpu.memory_space<vmem>>, vector<16x64xf32>
    %c0_3 = arith.constant 0 : index
    %c0_4 = arith.constant 0 : index
    %3 = vector.load %arg4[%c0_3, %c0_4] : memref<64x128xf32, #tpu.memory_space<vmem>>, vector<64x128xf32>
    %cst_5 = arith.constant dense<0.000000e+00> : vector<16x128xf32>
    %4 = tpu.matmul %2, %3, %cst_5 {dimension_numbers = #tpu.dot_dimension_numbers<[1], [0], [0], [1], [0, 0, 1, 1], [], []>} : vector<16x64xf32>, vector<64x128xf32>, vector<16x128xf32> -> vector<16x128xf32>
    %c0_6 = arith.constant 0 : index
    %c0_7 = arith.constant 0 : index
    %5 = vector.load %arg6[%c0_6, %c0_7] : memref<1x128xf32, #tpu.memory_space<vmem>>, vector<1x128xf32>
    %6 = vector.broadcast %5 : vector<1x128xf32> to vector<16x128xf32>
    %7 = arith.addf %4, %6 : vector<16x128xf32>
    %c0_8 = arith.constant 0 : index
    %c0_9 = arith.constant 0 : index
    %8 = vector.load %arg5[%c0_8, %c0_9] : memref<32x128xf32, #tpu.memory_space<vmem>>, vector<32x128xf32>
    %c0_10 = arith.constant 0 : index
    %9 = memref.load %arg2[%c0_10] : memref<16xi32, #tpu.memory_space<smem>>
    %c8 = arith.constant 8 : index
    %10 = memref.load %arg2[%c8] : memref<16xi32, #tpu.memory_space<smem>>
    %c0_11 = arith.constant 0 : index
    %11 = memref.load %arg1[%c0_11] : memref<32xi32, #tpu.memory_space<smem>>
    %c1 = arith.constant 1 : index
    %12 = memref.load %arg1[%c1] : memref<32xi32, #tpu.memory_space<smem>>
    %c16 = arith.constant 16 : index
    %13 = memref.load %arg1[%c16] : memref<32xi32, #tpu.memory_space<smem>>
    %c17 = arith.constant 17 : index
    %14 = memref.load %arg1[%c17] : memref<32xi32, #tpu.memory_space<smem>>
    %c0_i32 = arith.constant 0 : i32
    %15 = arith.addi %c0_i32, %11 : i32
    %16 = arith.index_cast %15 : i32 to index
    %c0_12 = arith.constant 0 : index
    %17 = vector.load %arg8[%16, %c0_12] : memref<16x64xf32, #tpu.memory_space<vmem>>, vector<1x64xf32>
    %c0_i32_13 = arith.constant 0 : i32
    %18 = arith.cmpi sgt, %9, %c0_i32_13 : i32
    %cst_14 = arith.constant 0.000000e+00 : f32
    %19 = vector.broadcast %cst_14 : f32 to vector<1x64xf32>
    %20 = arith.select %18, %17, %19 : vector<1x64xf32>
    %c0_i32_15 = arith.constant 0 : i32
    %21 = arith.addi %c0_i32_15, %12 : i32
    %22 = arith.index_cast %21 : i32 to index
    %c0_16 = arith.constant 0 : index
    %23 = vector.load %arg8[%22, %c0_16] : memref<16x64xf32, #tpu.memory_space<vmem>>, vector<1x64xf32>
    %c1_i32 = arith.constant 1 : i32
    %24 = arith.cmpi sgt, %9, %c1_i32 : i32
    %cst_17 = arith.constant 0.000000e+00 : f32
    %25 = vector.broadcast %cst_17 : f32 to vector<1x64xf32>
    %26 = arith.select %24, %23, %25 : vector<1x64xf32>
    %c8_i32 = arith.constant 8 : i32
    %27 = arith.addi %c8_i32, %13 : i32
    %28 = arith.index_cast %27 : i32 to index
    %c0_18 = arith.constant 0 : index
    %29 = vector.load %arg8[%28, %c0_18] : memref<16x64xf32, #tpu.memory_space<vmem>>, vector<1x64xf32>
    %c0_i32_19 = arith.constant 0 : i32
    %30 = arith.cmpi sgt, %10, %c0_i32_19 : i32
    %cst_20 = arith.constant 0.000000e+00 : f32
    %31 = vector.broadcast %cst_20 : f32 to vector<1x64xf32>
    %32 = arith.select %30, %29, %31 : vector<1x64xf32>
    %c8_i32_21 = arith.constant 8 : i32
    %33 = arith.addi %c8_i32_21, %14 : i32
    %34 = arith.index_cast %33 : i32 to index
    %c0_22 = arith.constant 0 : index
    %35 = vector.load %arg8[%34, %c0_22] : memref<16x64xf32, #tpu.memory_space<vmem>>, vector<1x64xf32>
    %c1_i32_23 = arith.constant 1 : i32
    %36 = arith.cmpi sgt, %10, %c1_i32_23 : i32
    %cst_24 = arith.constant 0.000000e+00 : f32
    %37 = vector.broadcast %cst_24 : f32 to vector<1x64xf32>
    %38 = arith.select %36, %35, %37 : vector<1x64xf32>
    %39 = tpu.concatenate %20, %26, %32, %38 in 0 : vector<1x64xf32>, vector<1x64xf32>, vector<1x64xf32>, vector<1x64xf32> -> vector<4x64xf32>
    %40 = vector.extract_strided_slice %39 {offsets = [0, 0], sizes = [4, 32], strides = [1, 1]} : vector<4x64xf32> to vector<4x32xf32>
    %41 = vector.extract_strided_slice %39 {offsets = [0, 32], sizes = [4, 32], strides = [1, 1]} : vector<4x64xf32> to vector<4x32xf32>
    %cst_25 = arith.constant dense<0.000000e+00> : vector<4x128xf32>
    %42 = tpu.matmul %41, %8, %cst_25 {dimension_numbers = #tpu.dot_dimension_numbers<[1], [0], [0], [1], [0, 0, 1, 1], [], []>} : vector<4x32xf32>, vector<32x128xf32>, vector<4x128xf32> -> vector<4x128xf32>
    %43 = vector.extract_strided_slice %7 {offsets = [0, 0], sizes = [1, 128], strides = [1, 1]} : vector<16x128xf32> to vector<1x128xf32>
    %44 = vector.extract_strided_slice %42 {offsets = [0, 0], sizes = [2, 128], strides = [1, 1]} : vector<4x128xf32> to vector<2x128xf32>
    %45 = vector.extract_strided_slice %40 {offsets = [0, 0], sizes = [2, 32], strides = [1, 1]} : vector<4x32xf32> to vector<2x32xf32>
    %46 = vector.extract_strided_slice %43 {offsets = [0, 96], sizes = [1, 32], strides = [1, 1]} : vector<1x128xf32> to vector<1x32xf32>
    %47 = vector.extract_strided_slice %44 {offsets = [0, 96], sizes = [2, 32], strides = [1, 1]} : vector<2x128xf32> to vector<2x32xf32>
    %48 = vector.broadcast %46 : vector<1x32xf32> to vector<2x32xf32>
    %49 = arith.addf %47, %48 : vector<2x32xf32>
    %50 = arith.negf %49 : vector<2x32xf32>
    %51 = math.exp %50 : vector<2x32xf32>
    %cst_26 = arith.constant 1.000000e+00 : f32
    %52 = vector.broadcast %cst_26 : f32 to vector<2x32xf32>
    %53 = arith.addf %52, %51 : vector<2x32xf32>
    %54 = arith.divf %52, %53 : vector<2x32xf32>
    %55 = arith.mulf %54, %45 : vector<2x32xf32>
    %cst_27 = arith.constant dense<0.000000e+00> : vector<32xf32>
    %56 = vector.multi_reduction <add>, %55, %cst_27 [0] : vector<2x32xf32> to vector<32xf32>
    %57 = vector.shape_cast %56 : vector<32xf32> to vector<1x32xf32>
    %cst_28 = arith.constant dense<0.000000e+00> : vector<128xf32>
    %58 = vector.multi_reduction <add>, %44, %cst_28 [0] : vector<2x128xf32> to vector<128xf32>
    %59 = vector.shape_cast %58 : vector<128xf32> to vector<1x128xf32>
    %60 = arith.addf %43, %59 : vector<1x128xf32>
    %61 = arith.negf %60 : vector<1x128xf32>
    %62 = math.exp %61 : vector<1x128xf32>
    %cst_29 = arith.constant 1.000000e+00 : f32
    %63 = vector.broadcast %cst_29 : f32 to vector<1x128xf32>
    %64 = arith.addf %63, %62 : vector<1x128xf32>
    %65 = arith.divf %63, %64 : vector<1x128xf32>
    %66 = math.tanh %60 : vector<1x128xf32>
    %67 = vector.extract_strided_slice %65 {offsets = [0, 0], sizes = [1, 32], strides = [1, 1]} : vector<1x128xf32> to vector<1x32xf32>
    %68 = vector.extract_strided_slice %65 {offsets = [0, 32], sizes = [1, 32], strides = [1, 1]} : vector<1x128xf32> to vector<1x32xf32>
    %69 = vector.extract_strided_slice %66 {offsets = [0, 64], sizes = [1, 32], strides = [1, 1]} : vector<1x128xf32> to vector<1x32xf32>
    %70 = arith.mulf %67, %69 : vector<1x32xf32>
    %71 = arith.addf %70, %57 : vector<1x32xf32>
    %72 = math.tanh %71 : vector<1x32xf32>
    %73 = arith.mulf %68, %72 : vector<1x32xf32>
    %74 = tpu.concatenate %71, %73 in 1 : vector<1x32xf32>, vector<1x32xf32> -> vector<1x64xf32>
    %c0_30 = arith.constant 0 : index
    %c0_31 = arith.constant 0 : index
    %75 = vector.load %arg8[%c0_30, %c0_31] : memref<16x64xf32, #tpu.memory_space<vmem>>, vector<1x64xf32>
    tpu.vector_store %arg8[%c0_30, %c0_31], %74 {strides = array<i32>} : memref<16x64xf32, #tpu.memory_space<vmem>>, vector<1x64xf32>,
    %76 = vector.extract_strided_slice %7 {offsets = [8, 0], sizes = [1, 128], strides = [1, 1]} : vector<16x128xf32> to vector<1x128xf32>
    %77 = vector.extract_strided_slice %42 {offsets = [2, 0], sizes = [2, 128], strides = [1, 1]} : vector<4x128xf32> to vector<2x128xf32>
    %78 = vector.extract_strided_slice %40 {offsets = [2, 0], sizes = [2, 32], strides = [1, 1]} : vector<4x32xf32> to vector<2x32xf32>
    %79 = vector.extract_strided_slice %76 {offsets = [0, 96], sizes = [1, 32], strides = [1, 1]} : vector<1x128xf32> to vector<1x32xf32>
    %80 = vector.extract_strided_slice %77 {offsets = [0, 96], sizes = [2, 32], strides = [1, 1]} : vector<2x128xf32> to vector<2x32xf32>
    %81 = vector.broadcast %79 : vector<1x32xf32> to vector<2x32xf32>
    %82 = arith.addf %80, %81 : vector<2x32xf32>
    %83 = arith.negf %82 : vector<2x32xf32>
    %84 = math.exp %83 : vector<2x32xf32>
    %cst_32 = arith.constant 1.000000e+00 : f32
    %85 = vector.broadcast %cst_32 : f32 to vector<2x32xf32>
    %86 = arith.addf %85, %84 : vector<2x32xf32>
    %87 = arith.divf %85, %86 : vector<2x32xf32>
    %88 = arith.mulf %87, %78 : vector<2x32xf32>
    %cst_33 = arith.constant dense<0.000000e+00> : vector<32xf32>
    %89 = vector.multi_reduction <add>, %88, %cst_33 [0] : vector<2x32xf32> to vector<32xf32>
    %90 = vector.shape_cast %89 : vector<32xf32> to vector<1x32xf32>
    %cst_34 = arith.constant dense<0.000000e+00> : vector<128xf32>
    %91 = vector.multi_reduction <add>, %77, %cst_34 [0] : vector<2x128xf32> to vector<128xf32>
    %92 = vector.shape_cast %91 : vector<128xf32> to vector<1x128xf32>
    %93 = arith.addf %76, %92 : vector<1x128xf32>
    %94 = arith.negf %93 : vector<1x128xf32>
    %95 = math.exp %94 : vector<1x128xf32>
    %cst_35 = arith.constant 1.000000e+00 : f32
    %96 = vector.broadcast %cst_35 : f32 to vector<1x128xf32>
    %97 = arith.addf %96, %95 : vector<1x128xf32>
    %98 = arith.divf %96, %97 : vector<1x128xf32>
    %99 = math.tanh %93 : vector<1x128xf32>
    %100 = vector.extract_strided_slice %98 {offsets = [0, 0], sizes = [1, 32], strides = [1, 1]} : vector<1x128xf32> to vector<1x32xf32>
    %101 = vector.extract_strided_slice %98 {offsets = [0, 32], sizes = [1, 32], strides = [1, 1]} : vector<1x128xf32> to vector<1x32xf32>
    %102 = vector.extract_strided_slice %99 {offsets = [0, 64], sizes = [1, 32], strides = [1, 1]} : vector<1x128xf32> to vector<1x32xf32>
    %103 = arith.mulf %100, %102 : vector<1x32xf32>
    %104 = arith.addf %103, %90 : vector<1x32xf32>
    %105 = math.tanh %104 : vector<1x32xf32>
    %106 = arith.mulf %101, %105 : vector<1x32xf32>
    %107 = tpu.concatenate %104, %106 in 1 : vector<1x32xf32>, vector<1x32xf32> -> vector<1x64xf32>
    %c8_36 = arith.constant 8 : index
    %c0_37 = arith.constant 0 : index
    %108 = vector.load %arg8[%c8_36, %c0_37] : memref<16x64xf32, #tpu.memory_space<vmem>>, vector<1x64xf32>
    tpu.vector_store %arg8[%c8_36, %c0_37], %107 {strides = array<i32>} : memref<16x64xf32, #tpu.memory_space<vmem>>, vector<1x64xf32>,
    %c1_38 = arith.constant 1 : index
    %109 = memref.load %arg2[%c1_38] : memref<16xi32, #tpu.memory_space<smem>>
    %c9 = arith.constant 9 : index
    %110 = memref.load %arg2[%c9] : memref<16xi32, #tpu.memory_space<smem>>
    %c2 = arith.constant 2 : index
    %111 = memref.load %arg1[%c2] : memref<32xi32, #tpu.memory_space<smem>>
    %c3 = arith.constant 3 : index
    %112 = memref.load %arg1[%c3] : memref<32xi32, #tpu.memory_space<smem>>
    %c18 = arith.constant 18 : index
    %113 = memref.load %arg1[%c18] : memref<32xi32, #tpu.memory_space<smem>>
    %c19 = arith.constant 19 : index
    %114 = memref.load %arg1[%c19] : memref<32xi32, #tpu.memory_space<smem>>
    %c0_i32_39 = arith.constant 0 : i32
    %115 = arith.addi %c0_i32_39, %111 : i32
    %116 = arith.index_cast %115 : i32 to index
    %c0_40 = arith.constant 0 : index
    %117 = vector.load %arg8[%116, %c0_40] : memref<16x64xf32, #tpu.memory_space<vmem>>, vector<1x64xf32>
    %c0_i32_41 = arith.constant 0 : i32
    %118 = arith.cmpi sgt, %109, %c0_i32_41 : i32
    %cst_42 = arith.constant 0.000000e+00 : f32
    %119 = vector.broadcast %cst_42 : f32 to vector<1x64xf32>
    %120 = arith.select %118, %117, %119 : vector<1x64xf32>
    %c0_i32_43 = arith.constant 0 : i32
    %121 = arith.addi %c0_i32_43, %112 : i32
    %122 = arith.index_cast %121 : i32 to index
    %c0_44 = arith.constant 0 : index
    %123 = vector.load %arg8[%122, %c0_44] : memref<16x64xf32, #tpu.memory_space<vmem>>, vector<1x64xf32>
    %c1_i32_45 = arith.constant 1 : i32
    %124 = arith.cmpi sgt, %109, %c1_i32_45 : i32
    %cst_46 = arith.constant 0.000000e+00 : f32
    %125 = vector.broadcast %cst_46 : f32 to vector<1x64xf32>
    %126 = arith.select %124, %123, %125 : vector<1x64xf32>
    %c8_i32_47 = arith.constant 8 : i32
    %127 = arith.addi %c8_i32_47, %113 : i32
    %128 = arith.index_cast %127 : i32 to index
    %c0_48 = arith.constant 0 : index
    %129 = vector.load %arg8[%128, %c0_48] : memref<16x64xf32, #tpu.memory_space<vmem>>, vector<1x64xf32>
    %c0_i32_49 = arith.constant 0 : i32
    %130 = arith.cmpi sgt, %110, %c0_i32_49 : i32
    %cst_50 = arith.constant 0.000000e+00 : f32
    %131 = vector.broadcast %cst_50 : f32 to vector<1x64xf32>
    %132 = arith.select %130, %129, %131 : vector<1x64xf32>
    %c8_i32_51 = arith.constant 8 : i32
    %133 = arith.addi %c8_i32_51, %114 : i32
    %134 = arith.index_cast %133 : i32 to index
    %c0_52 = arith.constant 0 : index
    %135 = vector.load %arg8[%134, %c0_52] : memref<16x64xf32, #tpu.memory_space<vmem>>, vector<1x64xf32>
    %c1_i32_53 = arith.constant 1 : i32
    %136 = arith.cmpi sgt, %110, %c1_i32_53 : i32
    %cst_54 = arith.constant 0.000000e+00 : f32
    %137 = vector.broadcast %cst_54 : f32 to vector<1x64xf32>
    %138 = arith.select %136, %135, %137 : vector<1x64xf32>
    %139 = tpu.concatenate %120, %126, %132, %138 in 0 : vector<1x64xf32>, vector<1x64xf32>, vector<1x64xf32>, vector<1x64xf32> -> vector<4x64xf32>
    %140 = vector.extract_strided_slice %139 {offsets = [0, 0], sizes = [4, 32], strides = [1, 1]} : vector<4x64xf32> to vector<4x32xf32>
    %141 = vector.extract_strided_slice %139 {offsets = [0, 32], sizes = [4, 32], strides = [1, 1]} : vector<4x64xf32> to vector<4x32xf32>
    %cst_55 = arith.constant dense<0.000000e+00> : vector<4x128xf32>
    %142 = tpu.matmul %141, %8, %cst_55 {dimension_numbers = #tpu.dot_dimension_numbers<[1], [0], [0], [1], [0, 0, 1, 1], [], []>} : vector<4x32xf32>, vector<32x128xf32>, vector<4x128xf32> -> vector<4x128xf32>
    %143 = vector.extract_strided_slice %7 {offsets = [1, 0], sizes = [1, 128], strides = [1, 1]} : vector<16x128xf32> to vector<1x128xf32>
    %144 = vector.extract_strided_slice %142 {offsets = [0, 0], sizes = [2, 128], strides = [1, 1]} : vector<4x128xf32> to vector<2x128xf32>
    %145 = vector.extract_strided_slice %140 {offsets = [0, 0], sizes = [2, 32], strides = [1, 1]} : vector<4x32xf32> to vector<2x32xf32>
    %146 = vector.extract_strided_slice %143 {offsets = [0, 96], sizes = [1, 32], strides = [1, 1]} : vector<1x128xf32> to vector<1x32xf32>
    %147 = vector.extract_strided_slice %144 {offsets = [0, 96], sizes = [2, 32], strides = [1, 1]} : vector<2x128xf32> to vector<2x32xf32>
    %148 = vector.broadcast %146 : vector<1x32xf32> to vector<2x32xf32>
    %149 = arith.addf %147, %148 : vector<2x32xf32>
    %150 = arith.negf %149 : vector<2x32xf32>
    %151 = math.exp %150 : vector<2x32xf32>
    %cst_56 = arith.constant 1.000000e+00 : f32
    %152 = vector.broadcast %cst_56 : f32 to vector<2x32xf32>
    %153 = arith.addf %152, %151 : vector<2x32xf32>
    %154 = arith.divf %152, %153 : vector<2x32xf32>
    %155 = arith.mulf %154, %145 : vector<2x32xf32>
    %cst_57 = arith.constant dense<0.000000e+00> : vector<32xf32>
    %156 = vector.multi_reduction <add>, %155, %cst_57 [0] : vector<2x32xf32> to vector<32xf32>
    %157 = vector.shape_cast %156 : vector<32xf32> to vector<1x32xf32>
    %cst_58 = arith.constant dense<0.000000e+00> : vector<128xf32>
    %158 = vector.multi_reduction <add>, %144, %cst_58 [0] : vector<2x128xf32> to vector<128xf32>
    %159 = vector.shape_cast %158 : vector<128xf32> to vector<1x128xf32>
    %160 = arith.addf %143, %159 : vector<1x128xf32>
    %161 = arith.negf %160 : vector<1x128xf32>
    %162 = math.exp %161 : vector<1x128xf32>
    %cst_59 = arith.constant 1.000000e+00 : f32
    %163 = vector.broadcast %cst_59 : f32 to vector<1x128xf32>
    %164 = arith.addf %163, %162 : vector<1x128xf32>
    %165 = arith.divf %163, %164 : vector<1x128xf32>
    %166 = math.tanh %160 : vector<1x128xf32>
    %167 = vector.extract_strided_slice %165 {offsets = [0, 0], sizes = [1, 32], strides = [1, 1]} : vector<1x128xf32> to vector<1x32xf32>
    %168 = vector.extract_strided_slice %165 {offsets = [0, 32], sizes = [1, 32], strides = [1, 1]} : vector<1x128xf32> to vector<1x32xf32>
    %169 = vector.extract_strided_slice %166 {offsets = [0, 64], sizes = [1, 32], strides = [1, 1]} : vector<1x128xf32> to vector<1x32xf32>
    %170 = arith.mulf %167, %169 : vector<1x32xf32>
    %171 = arith.addf %170, %157 : vector<1x32xf32>
    %172 = math.tanh %171 : vector<1x32xf32>
    %173 = arith.mulf %168, %172 : vector<1x32xf32>
    %174 = tpu.concatenate %171, %173 in 1 : vector<1x32xf32>, vector<1x32xf32> -> vector<1x64xf32>
    %c1_60 = arith.constant 1 : index
    %c0_61 = arith.constant 0 : index
    %175 = vector.load %arg8[%c1_60, %c0_61] : memref<16x64xf32, #tpu.memory_space<vmem>>, vector<1x64xf32>
    tpu.vector_store %arg8[%c1_60, %c0_61], %174 {strides = array<i32>} : memref<16x64xf32, #tpu.memory_space<vmem>>, vector<1x64xf32>,
    %176 = vector.extract_strided_slice %7 {offsets = [9, 0], sizes = [1, 128], strides = [1, 1]} : vector<16x128xf32> to vector<1x128xf32>
    %177 = vector.extract_strided_slice %142 {offsets = [2, 0], sizes = [2, 128], strides = [1, 1]} : vector<4x128xf32> to vector<2x128xf32>
    %178 = vector.extract_strided_slice %140 {offsets = [2, 0], sizes = [2, 32], strides = [1, 1]} : vector<4x32xf32> to vector<2x32xf32>
    %179 = vector.extract_strided_slice %176 {offsets = [0, 96], sizes = [1, 32], strides = [1, 1]} : vector<1x128xf32> to vector<1x32xf32>
    %180 = vector.extract_strided_slice %177 {offsets = [0, 96], sizes = [2, 32], strides = [1, 1]} : vector<2x128xf32> to vector<2x32xf32>
    %181 = vector.broadcast %179 : vector<1x32xf32> to vector<2x32xf32>
    %182 = arith.addf %180, %181 : vector<2x32xf32>
    %183 = arith.negf %182 : vector<2x32xf32>
    %184 = math.exp %183 : vector<2x32xf32>
    %cst_62 = arith.constant 1.000000e+00 : f32
    %185 = vector.broadcast %cst_62 : f32 to vector<2x32xf32>
    %186 = arith.addf %185, %184 : vector<2x32xf32>
    %187 = arith.divf %185, %186 : vector<2x32xf32>
    %188 = arith.mulf %187, %178 : vector<2x32xf32>
    %cst_63 = arith.constant dense<0.000000e+00> : vector<32xf32>
    %189 = vector.multi_reduction <add>, %188, %cst_63 [0] : vector<2x32xf32> to vector<32xf32>
    %190 = vector.shape_cast %189 : vector<32xf32> to vector<1x32xf32>
    %cst_64 = arith.constant dense<0.000000e+00> : vector<128xf32>
    %191 = vector.multi_reduction <add>, %177, %cst_64 [0] : vector<2x128xf32> to vector<128xf32>
    %192 = vector.shape_cast %191 : vector<128xf32> to vector<1x128xf32>
    %193 = arith.addf %176, %192 : vector<1x128xf32>
    %194 = arith.negf %193 : vector<1x128xf32>
    %195 = math.exp %194 : vector<1x128xf32>
    %cst_65 = arith.constant 1.000000e+00 : f32
    %196 = vector.broadcast %cst_65 : f32 to vector<1x128xf32>
    %197 = arith.addf %196, %195 : vector<1x128xf32>
    %198 = arith.divf %196, %197 : vector<1x128xf32>
    %199 = math.tanh %193 : vector<1x128xf32>
    %200 = vector.extract_strided_slice %198 {offsets = [0, 0], sizes = [1, 32], strides = [1, 1]} : vector<1x128xf32> to vector<1x32xf32>
    %201 = vector.extract_strided_slice %198 {offsets = [0, 32], sizes = [1, 32], strides = [1, 1]} : vector<1x128xf32> to vector<1x32xf32>
    %202 = vector.extract_strided_slice %199 {offsets = [0, 64], sizes = [1, 32], strides = [1, 1]} : vector<1x128xf32> to vector<1x32xf32>
    %203 = arith.mulf %200, %202 : vector<1x32xf32>
    %204 = arith.addf %203, %190 : vector<1x32xf32>
    %205 = math.tanh %204 : vector<1x32xf32>
    %206 = arith.mulf %201, %205 : vector<1x32xf32>
    %207 = tpu.concatenate %204, %206 in 1 : vector<1x32xf32>, vector<1x32xf32> -> vector<1x64xf32>
    %c9_66 = arith.constant 9 : index
    %c0_67 = arith.constant 0 : index
    %208 = vector.load %arg8[%c9_66, %c0_67] : memref<16x64xf32, #tpu.memory_space<vmem>>, vector<1x64xf32>
    tpu.vector_store %arg8[%c9_66, %c0_67], %207 {strides = array<i32>} : memref<16x64xf32, #tpu.memory_space<vmem>>, vector<1x64xf32>,
    %c2_68 = arith.constant 2 : index
    %209 = memref.load %arg2[%c2_68] : memref<16xi32, #tpu.memory_space<smem>>
    %c10 = arith.constant 10 : index
    %210 = memref.load %arg2[%c10] : memref<16xi32, #tpu.memory_space<smem>>
    %c4 = arith.constant 4 : index
    %211 = memref.load %arg1[%c4] : memref<32xi32, #tpu.memory_space<smem>>
    %c5 = arith.constant 5 : index
    %212 = memref.load %arg1[%c5] : memref<32xi32, #tpu.memory_space<smem>>
    %c20 = arith.constant 20 : index
    %213 = memref.load %arg1[%c20] : memref<32xi32, #tpu.memory_space<smem>>
    %c21 = arith.constant 21 : index
    %214 = memref.load %arg1[%c21] : memref<32xi32, #tpu.memory_space<smem>>
    %c0_i32_69 = arith.constant 0 : i32
    %215 = arith.addi %c0_i32_69, %211 : i32
    %216 = arith.index_cast %215 : i32 to index
    %c0_70 = arith.constant 0 : index
    %217 = vector.load %arg8[%216, %c0_70] : memref<16x64xf32, #tpu.memory_space<vmem>>, vector<1x64xf32>
    %c0_i32_71 = arith.constant 0 : i32
    %218 = arith.cmpi sgt, %209, %c0_i32_71 : i32
    %cst_72 = arith.constant 0.000000e+00 : f32
    %219 = vector.broadcast %cst_72 : f32 to vector<1x64xf32>
    %220 = arith.select %218, %217, %219 : vector<1x64xf32>
    %c0_i32_73 = arith.constant 0 : i32
    %221 = arith.addi %c0_i32_73, %212 : i32
    %222 = arith.index_cast %221 : i32 to index
    %c0_74 = arith.constant 0 : index
    %223 = vector.load %arg8[%222, %c0_74] : memref<16x64xf32, #tpu.memory_space<vmem>>, vector<1x64xf32>
    %c1_i32_75 = arith.constant 1 : i32
    %224 = arith.cmpi sgt, %209, %c1_i32_75 : i32
    %cst_76 = arith.constant 0.000000e+00 : f32
    %225 = vector.broadcast %cst_76 : f32 to vector<1x64xf32>
    %226 = arith.select %224, %223, %225 : vector<1x64xf32>
    %c8_i32_77 = arith.constant 8 : i32
    %227 = arith.addi %c8_i32_77, %213 : i32
    %228 = arith.index_cast %227 : i32 to index
    %c0_78 = arith.constant 0 : index
    %229 = vector.load %arg8[%228, %c0_78] : memref<16x64xf32, #tpu.memory_space<vmem>>, vector<1x64xf32>
    %c0_i32_79 = arith.constant 0 : i32
    %230 = arith.cmpi sgt, %210, %c0_i32_79 : i32
    %cst_80 = arith.constant 0.000000e+00 : f32
    %231 = vector.broadcast %cst_80 : f32 to vector<1x64xf32>
    %232 = arith.select %230, %229, %231 : vector<1x64xf32>
    %c8_i32_81 = arith.constant 8 : i32
    %233 = arith.addi %c8_i32_81, %214 : i32
    %234 = arith.index_cast %233 : i32 to index
    %c0_82 = arith.constant 0 : index
    %235 = vector.load %arg8[%234, %c0_82] : memref<16x64xf32, #tpu.memory_space<vmem>>, vector<1x64xf32>
    %c1_i32_83 = arith.constant 1 : i32
    %236 = arith.cmpi sgt, %210, %c1_i32_83 : i32
    %cst_84 = arith.constant 0.000000e+00 : f32
    %237 = vector.broadcast %cst_84 : f32 to vector<1x64xf32>
    %238 = arith.select %236, %235, %237 : vector<1x64xf32>
    %239 = tpu.concatenate %220, %226, %232, %238 in 0 : vector<1x64xf32>, vector<1x64xf32>, vector<1x64xf32>, vector<1x64xf32> -> vector<4x64xf32>
    %240 = vector.extract_strided_slice %239 {offsets = [0, 0], sizes = [4, 32], strides = [1, 1]} : vector<4x64xf32> to vector<4x32xf32>
    %241 = vector.extract_strided_slice %239 {offsets = [0, 32], sizes = [4, 32], strides = [1, 1]} : vector<4x64xf32> to vector<4x32xf32>
    %cst_85 = arith.constant dense<0.000000e+00> : vector<4x128xf32>
    %242 = tpu.matmul %241, %8, %cst_85 {dimension_numbers = #tpu.dot_dimension_numbers<[1], [0], [0], [1], [0, 0, 1, 1], [], []>} : vector<4x32xf32>, vector<32x128xf32>, vector<4x128xf32> -> vector<4x128xf32>
    %243 = vector.extract_strided_slice %7 {offsets = [2, 0], sizes = [1, 128], strides = [1, 1]} : vector<16x128xf32> to vector<1x128xf32>
    %244 = vector.extract_strided_slice %242 {offsets = [0, 0], sizes = [2, 128], strides = [1, 1]} : vector<4x128xf32> to vector<2x128xf32>
    %245 = vector.extract_strided_slice %240 {offsets = [0, 0], sizes = [2, 32], strides = [1, 1]} : vector<4x32xf32> to vector<2x32xf32>
    %246 = vector.extract_strided_slice %243 {offsets = [0, 96], sizes = [1, 32], strides = [1, 1]} : vector<1x128xf32> to vector<1x32xf32>
    %247 = vector.extract_strided_slice %244 {offsets = [0, 96], sizes = [2, 32], strides = [1, 1]} : vector<2x128xf32> to vector<2x32xf32>
    %248 = vector.broadcast %246 : vector<1x32xf32> to vector<2x32xf32>
    %249 = arith.addf %247, %248 : vector<2x32xf32>
    %250 = arith.negf %249 : vector<2x32xf32>
    %251 = math.exp %250 : vector<2x32xf32>
    %cst_86 = arith.constant 1.000000e+00 : f32
    %252 = vector.broadcast %cst_86 : f32 to vector<2x32xf32>
    %253 = arith.addf %252, %251 : vector<2x32xf32>
    %254 = arith.divf %252, %253 : vector<2x32xf32>
    %255 = arith.mulf %254, %245 : vector<2x32xf32>
    %cst_87 = arith.constant dense<0.000000e+00> : vector<32xf32>
    %256 = vector.multi_reduction <add>, %255, %cst_87 [0] : vector<2x32xf32> to vector<32xf32>
    %257 = vector.shape_cast %256 : vector<32xf32> to vector<1x32xf32>
    %cst_88 = arith.constant dense<0.000000e+00> : vector<128xf32>
    %258 = vector.multi_reduction <add>, %244, %cst_88 [0] : vector<2x128xf32> to vector<128xf32>
    %259 = vector.shape_cast %258 : vector<128xf32> to vector<1x128xf32>
    %260 = arith.addf %243, %259 : vector<1x128xf32>
    %261 = arith.negf %260 : vector<1x128xf32>
    %262 = math.exp %261 : vector<1x128xf32>
    %cst_89 = arith.constant 1.000000e+00 : f32
    %263 = vector.broadcast %cst_89 : f32 to vector<1x128xf32>
    %264 = arith.addf %263, %262 : vector<1x128xf32>
    %265 = arith.divf %263, %264 : vector<1x128xf32>
    %266 = math.tanh %260 : vector<1x128xf32>
    %267 = vector.extract_strided_slice %265 {offsets = [0, 0], sizes = [1, 32], strides = [1, 1]} : vector<1x128xf32> to vector<1x32xf32>
    %268 = vector.extract_strided_slice %265 {offsets = [0, 32], sizes = [1, 32], strides = [1, 1]} : vector<1x128xf32> to vector<1x32xf32>
    %269 = vector.extract_strided_slice %266 {offsets = [0, 64], sizes = [1, 32], strides = [1, 1]} : vector<1x128xf32> to vector<1x32xf32>
    %270 = arith.mulf %267, %269 : vector<1x32xf32>
    %271 = arith.addf %270, %257 : vector<1x32xf32>
    %272 = math.tanh %271 : vector<1x32xf32>
    %273 = arith.mulf %268, %272 : vector<1x32xf32>
    %274 = tpu.concatenate %271, %273 in 1 : vector<1x32xf32>, vector<1x32xf32> -> vector<1x64xf32>
    %c2_90 = arith.constant 2 : index
    %c0_91 = arith.constant 0 : index
    %275 = vector.load %arg8[%c2_90, %c0_91] : memref<16x64xf32, #tpu.memory_space<vmem>>, vector<1x64xf32>
    tpu.vector_store %arg8[%c2_90, %c0_91], %274 {strides = array<i32>} : memref<16x64xf32, #tpu.memory_space<vmem>>, vector<1x64xf32>,
    %276 = vector.extract_strided_slice %7 {offsets = [10, 0], sizes = [1, 128], strides = [1, 1]} : vector<16x128xf32> to vector<1x128xf32>
    %277 = vector.extract_strided_slice %242 {offsets = [2, 0], sizes = [2, 128], strides = [1, 1]} : vector<4x128xf32> to vector<2x128xf32>
    %278 = vector.extract_strided_slice %240 {offsets = [2, 0], sizes = [2, 32], strides = [1, 1]} : vector<4x32xf32> to vector<2x32xf32>
    %279 = vector.extract_strided_slice %276 {offsets = [0, 96], sizes = [1, 32], strides = [1, 1]} : vector<1x128xf32> to vector<1x32xf32>
    %280 = vector.extract_strided_slice %277 {offsets = [0, 96], sizes = [2, 32], strides = [1, 1]} : vector<2x128xf32> to vector<2x32xf32>
    %281 = vector.broadcast %279 : vector<1x32xf32> to vector<2x32xf32>
    %282 = arith.addf %280, %281 : vector<2x32xf32>
    %283 = arith.negf %282 : vector<2x32xf32>
    %284 = math.exp %283 : vector<2x32xf32>
    %cst_92 = arith.constant 1.000000e+00 : f32
    %285 = vector.broadcast %cst_92 : f32 to vector<2x32xf32>
    %286 = arith.addf %285, %284 : vector<2x32xf32>
    %287 = arith.divf %285, %286 : vector<2x32xf32>
    %288 = arith.mulf %287, %278 : vector<2x32xf32>
    %cst_93 = arith.constant dense<0.000000e+00> : vector<32xf32>
    %289 = vector.multi_reduction <add>, %288, %cst_93 [0] : vector<2x32xf32> to vector<32xf32>
    %290 = vector.shape_cast %289 : vector<32xf32> to vector<1x32xf32>
    %cst_94 = arith.constant dense<0.000000e+00> : vector<128xf32>
    %291 = vector.multi_reduction <add>, %277, %cst_94 [0] : vector<2x128xf32> to vector<128xf32>
    %292 = vector.shape_cast %291 : vector<128xf32> to vector<1x128xf32>
    %293 = arith.addf %276, %292 : vector<1x128xf32>
    %294 = arith.negf %293 : vector<1x128xf32>
    %295 = math.exp %294 : vector<1x128xf32>
    %cst_95 = arith.constant 1.000000e+00 : f32
    %296 = vector.broadcast %cst_95 : f32 to vector<1x128xf32>
    %297 = arith.addf %296, %295 : vector<1x128xf32>
    %298 = arith.divf %296, %297 : vector<1x128xf32>
    %299 = math.tanh %293 : vector<1x128xf32>
    %300 = vector.extract_strided_slice %298 {offsets = [0, 0], sizes = [1, 32], strides = [1, 1]} : vector<1x128xf32> to vector<1x32xf32>
    %301 = vector.extract_strided_slice %298 {offsets = [0, 32], sizes = [1, 32], strides = [1, 1]} : vector<1x128xf32> to vector<1x32xf32>
    %302 = vector.extract_strided_slice %299 {offsets = [0, 64], sizes = [1, 32], strides = [1, 1]} : vector<1x128xf32> to vector<1x32xf32>
    %303 = arith.mulf %300, %302 : vector<1x32xf32>
    %304 = arith.addf %303, %290 : vector<1x32xf32>
    %305 = math.tanh %304 : vector<1x32xf32>
    %306 = arith.mulf %301, %305 : vector<1x32xf32>
    %307 = tpu.concatenate %304, %306 in 1 : vector<1x32xf32>, vector<1x32xf32> -> vector<1x64xf32>
    %c10_96 = arith.constant 10 : index
    %c0_97 = arith.constant 0 : index
    %308 = vector.load %arg8[%c10_96, %c0_97] : memref<16x64xf32, #tpu.memory_space<vmem>>, vector<1x64xf32>
    tpu.vector_store %arg8[%c10_96, %c0_97], %307 {strides = array<i32>} : memref<16x64xf32, #tpu.memory_space<vmem>>, vector<1x64xf32>,
    %c3_98 = arith.constant 3 : index
    %309 = memref.load %arg2[%c3_98] : memref<16xi32, #tpu.memory_space<smem>>
    %c11 = arith.constant 11 : index
    %310 = memref.load %arg2[%c11] : memref<16xi32, #tpu.memory_space<smem>>
    %c6 = arith.constant 6 : index
    %311 = memref.load %arg1[%c6] : memref<32xi32, #tpu.memory_space<smem>>
    %c7 = arith.constant 7 : index
    %312 = memref.load %arg1[%c7] : memref<32xi32, #tpu.memory_space<smem>>
    %c22 = arith.constant 22 : index
    %313 = memref.load %arg1[%c22] : memref<32xi32, #tpu.memory_space<smem>>
    %c23 = arith.constant 23 : index
    %314 = memref.load %arg1[%c23] : memref<32xi32, #tpu.memory_space<smem>>
    %c0_i32_99 = arith.constant 0 : i32
    %315 = arith.addi %c0_i32_99, %311 : i32
    %316 = arith.index_cast %315 : i32 to index
    %c0_100 = arith.constant 0 : index
    %317 = vector.load %arg8[%316, %c0_100] : memref<16x64xf32, #tpu.memory_space<vmem>>, vector<1x64xf32>
    %c0_i32_101 = arith.constant 0 : i32
    %318 = arith.cmpi sgt, %309, %c0_i32_101 : i32
    %cst_102 = arith.constant 0.000000e+00 : f32
    %319 = vector.broadcast %cst_102 : f32 to vector<1x64xf32>
    %320 = arith.select %318, %317, %319 : vector<1x64xf32>
    %c0_i32_103 = arith.constant 0 : i32
    %321 = arith.addi %c0_i32_103, %312 : i32
    %322 = arith.index_cast %321 : i32 to index
    %c0_104 = arith.constant 0 : index
    %323 = vector.load %arg8[%322, %c0_104] : memref<16x64xf32, #tpu.memory_space<vmem>>, vector<1x64xf32>
    %c1_i32_105 = arith.constant 1 : i32
    %324 = arith.cmpi sgt, %309, %c1_i32_105 : i32
    %cst_106 = arith.constant 0.000000e+00 : f32
    %325 = vector.broadcast %cst_106 : f32 to vector<1x64xf32>
    %326 = arith.select %324, %323, %325 : vector<1x64xf32>
    %c8_i32_107 = arith.constant 8 : i32
    %327 = arith.addi %c8_i32_107, %313 : i32
    %328 = arith.index_cast %327 : i32 to index
    %c0_108 = arith.constant 0 : index
    %329 = vector.load %arg8[%328, %c0_108] : memref<16x64xf32, #tpu.memory_space<vmem>>, vector<1x64xf32>
    %c0_i32_109 = arith.constant 0 : i32
    %330 = arith.cmpi sgt, %310, %c0_i32_109 : i32
    %cst_110 = arith.constant 0.000000e+00 : f32
    %331 = vector.broadcast %cst_110 : f32 to vector<1x64xf32>
    %332 = arith.select %330, %329, %331 : vector<1x64xf32>
    %c8_i32_111 = arith.constant 8 : i32
    %333 = arith.addi %c8_i32_111, %314 : i32
    %334 = arith.index_cast %333 : i32 to index
    %c0_112 = arith.constant 0 : index
    %335 = vector.load %arg8[%334, %c0_112] : memref<16x64xf32, #tpu.memory_space<vmem>>, vector<1x64xf32>
    %c1_i32_113 = arith.constant 1 : i32
    %336 = arith.cmpi sgt, %310, %c1_i32_113 : i32
    %cst_114 = arith.constant 0.000000e+00 : f32
    %337 = vector.broadcast %cst_114 : f32 to vector<1x64xf32>
    %338 = arith.select %336, %335, %337 : vector<1x64xf32>
    %339 = tpu.concatenate %320, %326, %332, %338 in 0 : vector<1x64xf32>, vector<1x64xf32>, vector<1x64xf32>, vector<1x64xf32> -> vector<4x64xf32>
    %340 = vector.extract_strided_slice %339 {offsets = [0, 0], sizes = [4, 32], strides = [1, 1]} : vector<4x64xf32> to vector<4x32xf32>
    %341 = vector.extract_strided_slice %339 {offsets = [0, 32], sizes = [4, 32], strides = [1, 1]} : vector<4x64xf32> to vector<4x32xf32>
    %cst_115 = arith.constant dense<0.000000e+00> : vector<4x128xf32>
    %342 = tpu.matmul %341, %8, %cst_115 {dimension_numbers = #tpu.dot_dimension_numbers<[1], [0], [0], [1], [0, 0, 1, 1], [], []>} : vector<4x32xf32>, vector<32x128xf32>, vector<4x128xf32> -> vector<4x128xf32>
    %343 = vector.extract_strided_slice %7 {offsets = [3, 0], sizes = [1, 128], strides = [1, 1]} : vector<16x128xf32> to vector<1x128xf32>
    %344 = vector.extract_strided_slice %342 {offsets = [0, 0], sizes = [2, 128], strides = [1, 1]} : vector<4x128xf32> to vector<2x128xf32>
    %345 = vector.extract_strided_slice %340 {offsets = [0, 0], sizes = [2, 32], strides = [1, 1]} : vector<4x32xf32> to vector<2x32xf32>
    %346 = vector.extract_strided_slice %343 {offsets = [0, 96], sizes = [1, 32], strides = [1, 1]} : vector<1x128xf32> to vector<1x32xf32>
    %347 = vector.extract_strided_slice %344 {offsets = [0, 96], sizes = [2, 32], strides = [1, 1]} : vector<2x128xf32> to vector<2x32xf32>
    %348 = vector.broadcast %346 : vector<1x32xf32> to vector<2x32xf32>
    %349 = arith.addf %347, %348 : vector<2x32xf32>
    %350 = arith.negf %349 : vector<2x32xf32>
    %351 = math.exp %350 : vector<2x32xf32>
    %cst_116 = arith.constant 1.000000e+00 : f32
    %352 = vector.broadcast %cst_116 : f32 to vector<2x32xf32>
    %353 = arith.addf %352, %351 : vector<2x32xf32>
    %354 = arith.divf %352, %353 : vector<2x32xf32>
    %355 = arith.mulf %354, %345 : vector<2x32xf32>
    %cst_117 = arith.constant dense<0.000000e+00> : vector<32xf32>
    %356 = vector.multi_reduction <add>, %355, %cst_117 [0] : vector<2x32xf32> to vector<32xf32>
    %357 = vector.shape_cast %356 : vector<32xf32> to vector<1x32xf32>
    %cst_118 = arith.constant dense<0.000000e+00> : vector<128xf32>
    %358 = vector.multi_reduction <add>, %344, %cst_118 [0] : vector<2x128xf32> to vector<128xf32>
    %359 = vector.shape_cast %358 : vector<128xf32> to vector<1x128xf32>
    %360 = arith.addf %343, %359 : vector<1x128xf32>
    %361 = arith.negf %360 : vector<1x128xf32>
    %362 = math.exp %361 : vector<1x128xf32>
    %cst_119 = arith.constant 1.000000e+00 : f32
    %363 = vector.broadcast %cst_119 : f32 to vector<1x128xf32>
    %364 = arith.addf %363, %362 : vector<1x128xf32>
    %365 = arith.divf %363, %364 : vector<1x128xf32>
    %366 = math.tanh %360 : vector<1x128xf32>
    %367 = vector.extract_strided_slice %365 {offsets = [0, 0], sizes = [1, 32], strides = [1, 1]} : vector<1x128xf32> to vector<1x32xf32>
    %368 = vector.extract_strided_slice %365 {offsets = [0, 32], sizes = [1, 32], strides = [1, 1]} : vector<1x128xf32> to vector<1x32xf32>
    %369 = vector.extract_strided_slice %366 {offsets = [0, 64], sizes = [1, 32], strides = [1, 1]} : vector<1x128xf32> to vector<1x32xf32>
    %370 = arith.mulf %367, %369 : vector<1x32xf32>
    %371 = arith.addf %370, %357 : vector<1x32xf32>
    %372 = math.tanh %371 : vector<1x32xf32>
    %373 = arith.mulf %368, %372 : vector<1x32xf32>
    %374 = tpu.concatenate %371, %373 in 1 : vector<1x32xf32>, vector<1x32xf32> -> vector<1x64xf32>
    %c3_120 = arith.constant 3 : index
    %c0_121 = arith.constant 0 : index
    %375 = vector.load %arg8[%c3_120, %c0_121] : memref<16x64xf32, #tpu.memory_space<vmem>>, vector<1x64xf32>
    tpu.vector_store %arg8[%c3_120, %c0_121], %374 {strides = array<i32>} : memref<16x64xf32, #tpu.memory_space<vmem>>, vector<1x64xf32>,
    %376 = vector.extract_strided_slice %7 {offsets = [11, 0], sizes = [1, 128], strides = [1, 1]} : vector<16x128xf32> to vector<1x128xf32>
    %377 = vector.extract_strided_slice %342 {offsets = [2, 0], sizes = [2, 128], strides = [1, 1]} : vector<4x128xf32> to vector<2x128xf32>
    %378 = vector.extract_strided_slice %340 {offsets = [2, 0], sizes = [2, 32], strides = [1, 1]} : vector<4x32xf32> to vector<2x32xf32>
    %379 = vector.extract_strided_slice %376 {offsets = [0, 96], sizes = [1, 32], strides = [1, 1]} : vector<1x128xf32> to vector<1x32xf32>
    %380 = vector.extract_strided_slice %377 {offsets = [0, 96], sizes = [2, 32], strides = [1, 1]} : vector<2x128xf32> to vector<2x32xf32>
    %381 = vector.broadcast %379 : vector<1x32xf32> to vector<2x32xf32>
    %382 = arith.addf %380, %381 : vector<2x32xf32>
    %383 = arith.negf %382 : vector<2x32xf32>
    %384 = math.exp %383 : vector<2x32xf32>
    %cst_122 = arith.constant 1.000000e+00 : f32
    %385 = vector.broadcast %cst_122 : f32 to vector<2x32xf32>
    %386 = arith.addf %385, %384 : vector<2x32xf32>
    %387 = arith.divf %385, %386 : vector<2x32xf32>
    %388 = arith.mulf %387, %378 : vector<2x32xf32>
    %cst_123 = arith.constant dense<0.000000e+00> : vector<32xf32>
    %389 = vector.multi_reduction <add>, %388, %cst_123 [0] : vector<2x32xf32> to vector<32xf32>
    %390 = vector.shape_cast %389 : vector<32xf32> to vector<1x32xf32>
    %cst_124 = arith.constant dense<0.000000e+00> : vector<128xf32>
    %391 = vector.multi_reduction <add>, %377, %cst_124 [0] : vector<2x128xf32> to vector<128xf32>
    %392 = vector.shape_cast %391 : vector<128xf32> to vector<1x128xf32>
    %393 = arith.addf %376, %392 : vector<1x128xf32>
    %394 = arith.negf %393 : vector<1x128xf32>
    %395 = math.exp %394 : vector<1x128xf32>
    %cst_125 = arith.constant 1.000000e+00 : f32
    %396 = vector.broadcast %cst_125 : f32 to vector<1x128xf32>
    %397 = arith.addf %396, %395 : vector<1x128xf32>
    %398 = arith.divf %396, %397 : vector<1x128xf32>
    %399 = math.tanh %393 : vector<1x128xf32>
    %400 = vector.extract_strided_slice %398 {offsets = [0, 0], sizes = [1, 32], strides = [1, 1]} : vector<1x128xf32> to vector<1x32xf32>
    %401 = vector.extract_strided_slice %398 {offsets = [0, 32], sizes = [1, 32], strides = [1, 1]} : vector<1x128xf32> to vector<1x32xf32>
    %402 = vector.extract_strided_slice %399 {offsets = [0, 64], sizes = [1, 32], strides = [1, 1]} : vector<1x128xf32> to vector<1x32xf32>
    %403 = arith.mulf %400, %402 : vector<1x32xf32>
    %404 = arith.addf %403, %390 : vector<1x32xf32>
    %405 = math.tanh %404 : vector<1x32xf32>
    %406 = arith.mulf %401, %405 : vector<1x32xf32>
    %407 = tpu.concatenate %404, %406 in 1 : vector<1x32xf32>, vector<1x32xf32> -> vector<1x64xf32>
    %c11_126 = arith.constant 11 : index
    %c0_127 = arith.constant 0 : index
    %408 = vector.load %arg8[%c11_126, %c0_127] : memref<16x64xf32, #tpu.memory_space<vmem>>, vector<1x64xf32>
    tpu.vector_store %arg8[%c11_126, %c0_127], %407 {strides = array<i32>} : memref<16x64xf32, #tpu.memory_space<vmem>>, vector<1x64xf32>,
    %c4_128 = arith.constant 4 : index
    %409 = memref.load %arg2[%c4_128] : memref<16xi32, #tpu.memory_space<smem>>
    %c12 = arith.constant 12 : index
    %410 = memref.load %arg2[%c12] : memref<16xi32, #tpu.memory_space<smem>>
    %c8_129 = arith.constant 8 : index
    %411 = memref.load %arg1[%c8_129] : memref<32xi32, #tpu.memory_space<smem>>
    %c9_130 = arith.constant 9 : index
    %412 = memref.load %arg1[%c9_130] : memref<32xi32, #tpu.memory_space<smem>>
    %c24 = arith.constant 24 : index
    %413 = memref.load %arg1[%c24] : memref<32xi32, #tpu.memory_space<smem>>
    %c25 = arith.constant 25 : index
    %414 = memref.load %arg1[%c25] : memref<32xi32, #tpu.memory_space<smem>>
    %c0_i32_131 = arith.constant 0 : i32
    %415 = arith.addi %c0_i32_131, %411 : i32
    %416 = arith.index_cast %415 : i32 to index
    %c0_132 = arith.constant 0 : index
    %417 = vector.load %arg8[%416, %c0_132] : memref<16x64xf32, #tpu.memory_space<vmem>>, vector<1x64xf32>
    %c0_i32_133 = arith.constant 0 : i32
    %418 = arith.cmpi sgt, %409, %c0_i32_133 : i32
    %cst_134 = arith.constant 0.000000e+00 : f32
    %419 = vector.broadcast %cst_134 : f32 to vector<1x64xf32>
    %420 = arith.select %418, %417, %419 : vector<1x64xf32>
    %c0_i32_135 = arith.constant 0 : i32
    %421 = arith.addi %c0_i32_135, %412 : i32
    %422 = arith.index_cast %421 : i32 to index
    %c0_136 = arith.constant 0 : index
    %423 = vector.load %arg8[%422, %c0_136] : memref<16x64xf32, #tpu.memory_space<vmem>>, vector<1x64xf32>
    %c1_i32_137 = arith.constant 1 : i32
    %424 = arith.cmpi sgt, %409, %c1_i32_137 : i32
    %cst_138 = arith.constant 0.000000e+00 : f32
    %425 = vector.broadcast %cst_138 : f32 to vector<1x64xf32>
    %426 = arith.select %424, %423, %425 : vector<1x64xf32>
    %c8_i32_139 = arith.constant 8 : i32
    %427 = arith.addi %c8_i32_139, %413 : i32
    %428 = arith.index_cast %427 : i32 to index
    %c0_140 = arith.constant 0 : index
    %429 = vector.load %arg8[%428, %c0_140] : memref<16x64xf32, #tpu.memory_space<vmem>>, vector<1x64xf32>
    %c0_i32_141 = arith.constant 0 : i32
    %430 = arith.cmpi sgt, %410, %c0_i32_141 : i32
    %cst_142 = arith.constant 0.000000e+00 : f32
    %431 = vector.broadcast %cst_142 : f32 to vector<1x64xf32>
    %432 = arith.select %430, %429, %431 : vector<1x64xf32>
    %c8_i32_143 = arith.constant 8 : i32
    %433 = arith.addi %c8_i32_143, %414 : i32
    %434 = arith.index_cast %433 : i32 to index
    %c0_144 = arith.constant 0 : index
    %435 = vector.load %arg8[%434, %c0_144] : memref<16x64xf32, #tpu.memory_space<vmem>>, vector<1x64xf32>
    %c1_i32_145 = arith.constant 1 : i32
    %436 = arith.cmpi sgt, %410, %c1_i32_145 : i32
    %cst_146 = arith.constant 0.000000e+00 : f32
    %437 = vector.broadcast %cst_146 : f32 to vector<1x64xf32>
    %438 = arith.select %436, %435, %437 : vector<1x64xf32>
    %439 = tpu.concatenate %420, %426, %432, %438 in 0 : vector<1x64xf32>, vector<1x64xf32>, vector<1x64xf32>, vector<1x64xf32> -> vector<4x64xf32>
    %440 = vector.extract_strided_slice %439 {offsets = [0, 0], sizes = [4, 32], strides = [1, 1]} : vector<4x64xf32> to vector<4x32xf32>
    %441 = vector.extract_strided_slice %439 {offsets = [0, 32], sizes = [4, 32], strides = [1, 1]} : vector<4x64xf32> to vector<4x32xf32>
    %cst_147 = arith.constant dense<0.000000e+00> : vector<4x128xf32>
    %442 = tpu.matmul %441, %8, %cst_147 {dimension_numbers = #tpu.dot_dimension_numbers<[1], [0], [0], [1], [0, 0, 1, 1], [], []>} : vector<4x32xf32>, vector<32x128xf32>, vector<4x128xf32> -> vector<4x128xf32>
    %443 = vector.extract_strided_slice %7 {offsets = [4, 0], sizes = [1, 128], strides = [1, 1]} : vector<16x128xf32> to vector<1x128xf32>
    %444 = vector.extract_strided_slice %442 {offsets = [0, 0], sizes = [2, 128], strides = [1, 1]} : vector<4x128xf32> to vector<2x128xf32>
    %445 = vector.extract_strided_slice %440 {offsets = [0, 0], sizes = [2, 32], strides = [1, 1]} : vector<4x32xf32> to vector<2x32xf32>
    %446 = vector.extract_strided_slice %443 {offsets = [0, 96], sizes = [1, 32], strides = [1, 1]} : vector<1x128xf32> to vector<1x32xf32>
    %447 = vector.extract_strided_slice %444 {offsets = [0, 96], sizes = [2, 32], strides = [1, 1]} : vector<2x128xf32> to vector<2x32xf32>
    %448 = vector.broadcast %446 : vector<1x32xf32> to vector<2x32xf32>
    %449 = arith.addf %447, %448 : vector<2x32xf32>
    %450 = arith.negf %449 : vector<2x32xf32>
    %451 = math.exp %450 : vector<2x32xf32>
    %cst_148 = arith.constant 1.000000e+00 : f32
    %452 = vector.broadcast %cst_148 : f32 to vector<2x32xf32>
    %453 = arith.addf %452, %451 : vector<2x32xf32>
    %454 = arith.divf %452, %453 : vector<2x32xf32>
    %455 = arith.mulf %454, %445 : vector<2x32xf32>
    %cst_149 = arith.constant dense<0.000000e+00> : vector<32xf32>
    %456 = vector.multi_reduction <add>, %455, %cst_149 [0] : vector<2x32xf32> to vector<32xf32>
    %457 = vector.shape_cast %456 : vector<32xf32> to vector<1x32xf32>
    %cst_150 = arith.constant dense<0.000000e+00> : vector<128xf32>
    %458 = vector.multi_reduction <add>, %444, %cst_150 [0] : vector<2x128xf32> to vector<128xf32>
    %459 = vector.shape_cast %458 : vector<128xf32> to vector<1x128xf32>
    %460 = arith.addf %443, %459 : vector<1x128xf32>
    %461 = arith.negf %460 : vector<1x128xf32>
    %462 = math.exp %461 : vector<1x128xf32>
    %cst_151 = arith.constant 1.000000e+00 : f32
    %463 = vector.broadcast %cst_151 : f32 to vector<1x128xf32>
    %464 = arith.addf %463, %462 : vector<1x128xf32>
    %465 = arith.divf %463, %464 : vector<1x128xf32>
    %466 = math.tanh %460 : vector<1x128xf32>
    %467 = vector.extract_strided_slice %465 {offsets = [0, 0], sizes = [1, 32], strides = [1, 1]} : vector<1x128xf32> to vector<1x32xf32>
    %468 = vector.extract_strided_slice %465 {offsets = [0, 32], sizes = [1, 32], strides = [1, 1]} : vector<1x128xf32> to vector<1x32xf32>
    %469 = vector.extract_strided_slice %466 {offsets = [0, 64], sizes = [1, 32], strides = [1, 1]} : vector<1x128xf32> to vector<1x32xf32>
    %470 = arith.mulf %467, %469 : vector<1x32xf32>
    %471 = arith.addf %470, %457 : vector<1x32xf32>
    %472 = math.tanh %471 : vector<1x32xf32>
    %473 = arith.mulf %468, %472 : vector<1x32xf32>
    %474 = tpu.concatenate %471, %473 in 1 : vector<1x32xf32>, vector<1x32xf32> -> vector<1x64xf32>
    %c4_152 = arith.constant 4 : index
    %c0_153 = arith.constant 0 : index
    %475 = vector.load %arg8[%c4_152, %c0_153] : memref<16x64xf32, #tpu.memory_space<vmem>>, vector<1x64xf32>
    tpu.vector_store %arg8[%c4_152, %c0_153], %474 {strides = array<i32>} : memref<16x64xf32, #tpu.memory_space<vmem>>, vector<1x64xf32>,
    %476 = vector.extract_strided_slice %7 {offsets = [12, 0], sizes = [1, 128], strides = [1, 1]} : vector<16x128xf32> to vector<1x128xf32>
    %477 = vector.extract_strided_slice %442 {offsets = [2, 0], sizes = [2, 128], strides = [1, 1]} : vector<4x128xf32> to vector<2x128xf32>
    %478 = vector.extract_strided_slice %440 {offsets = [2, 0], sizes = [2, 32], strides = [1, 1]} : vector<4x32xf32> to vector<2x32xf32>
    %479 = vector.extract_strided_slice %476 {offsets = [0, 96], sizes = [1, 32], strides = [1, 1]} : vector<1x128xf32> to vector<1x32xf32>
    %480 = vector.extract_strided_slice %477 {offsets = [0, 96], sizes = [2, 32], strides = [1, 1]} : vector<2x128xf32> to vector<2x32xf32>
    %481 = vector.broadcast %479 : vector<1x32xf32> to vector<2x32xf32>
    %482 = arith.addf %480, %481 : vector<2x32xf32>
    %483 = arith.negf %482 : vector<2x32xf32>
    %484 = math.exp %483 : vector<2x32xf32>
    %cst_154 = arith.constant 1.000000e+00 : f32
    %485 = vector.broadcast %cst_154 : f32 to vector<2x32xf32>
    %486 = arith.addf %485, %484 : vector<2x32xf32>
    %487 = arith.divf %485, %486 : vector<2x32xf32>
    %488 = arith.mulf %487, %478 : vector<2x32xf32>
    %cst_155 = arith.constant dense<0.000000e+00> : vector<32xf32>
    %489 = vector.multi_reduction <add>, %488, %cst_155 [0] : vector<2x32xf32> to vector<32xf32>
    %490 = vector.shape_cast %489 : vector<32xf32> to vector<1x32xf32>
    %cst_156 = arith.constant dense<0.000000e+00> : vector<128xf32>
    %491 = vector.multi_reduction <add>, %477, %cst_156 [0] : vector<2x128xf32> to vector<128xf32>
    %492 = vector.shape_cast %491 : vector<128xf32> to vector<1x128xf32>
    %493 = arith.addf %476, %492 : vector<1x128xf32>
    %494 = arith.negf %493 : vector<1x128xf32>
    %495 = math.exp %494 : vector<1x128xf32>
    %cst_157 = arith.constant 1.000000e+00 : f32
    %496 = vector.broadcast %cst_157 : f32 to vector<1x128xf32>
    %497 = arith.addf %496, %495 : vector<1x128xf32>
    %498 = arith.divf %496, %497 : vector<1x128xf32>
    %499 = math.tanh %493 : vector<1x128xf32>
    %500 = vector.extract_strided_slice %498 {offsets = [0, 0], sizes = [1, 32], strides = [1, 1]} : vector<1x128xf32> to vector<1x32xf32>
    %501 = vector.extract_strided_slice %498 {offsets = [0, 32], sizes = [1, 32], strides = [1, 1]} : vector<1x128xf32> to vector<1x32xf32>
    %502 = vector.extract_strided_slice %499 {offsets = [0, 64], sizes = [1, 32], strides = [1, 1]} : vector<1x128xf32> to vector<1x32xf32>
    %503 = arith.mulf %500, %502 : vector<1x32xf32>
    %504 = arith.addf %503, %490 : vector<1x32xf32>
    %505 = math.tanh %504 : vector<1x32xf32>
    %506 = arith.mulf %501, %505 : vector<1x32xf32>
    %507 = tpu.concatenate %504, %506 in 1 : vector<1x32xf32>, vector<1x32xf32> -> vector<1x64xf32>
    %c12_158 = arith.constant 12 : index
    %c0_159 = arith.constant 0 : index
    %508 = vector.load %arg8[%c12_158, %c0_159] : memref<16x64xf32, #tpu.memory_space<vmem>>, vector<1x64xf32>
    tpu.vector_store %arg8[%c12_158, %c0_159], %507 {strides = array<i32>} : memref<16x64xf32, #tpu.memory_space<vmem>>, vector<1x64xf32>,
    %c5_160 = arith.constant 5 : index
    %509 = memref.load %arg2[%c5_160] : memref<16xi32, #tpu.memory_space<smem>>
    %c13 = arith.constant 13 : index
    %510 = memref.load %arg2[%c13] : memref<16xi32, #tpu.memory_space<smem>>
    %c10_161 = arith.constant 10 : index
    %511 = memref.load %arg1[%c10_161] : memref<32xi32, #tpu.memory_space<smem>>
    %c11_162 = arith.constant 11 : index
    %512 = memref.load %arg1[%c11_162] : memref<32xi32, #tpu.memory_space<smem>>
    %c26 = arith.constant 26 : index
    %513 = memref.load %arg1[%c26] : memref<32xi32, #tpu.memory_space<smem>>
    %c27 = arith.constant 27 : index
    %514 = memref.load %arg1[%c27] : memref<32xi32, #tpu.memory_space<smem>>
    %c0_i32_163 = arith.constant 0 : i32
    %515 = arith.addi %c0_i32_163, %511 : i32
    %516 = arith.index_cast %515 : i32 to index
    %c0_164 = arith.constant 0 : index
    %517 = vector.load %arg8[%516, %c0_164] : memref<16x64xf32, #tpu.memory_space<vmem>>, vector<1x64xf32>
    %c0_i32_165 = arith.constant 0 : i32
    %518 = arith.cmpi sgt, %509, %c0_i32_165 : i32
    %cst_166 = arith.constant 0.000000e+00 : f32
    %519 = vector.broadcast %cst_166 : f32 to vector<1x64xf32>
    %520 = arith.select %518, %517, %519 : vector<1x64xf32>
    %c0_i32_167 = arith.constant 0 : i32
    %521 = arith.addi %c0_i32_167, %512 : i32
    %522 = arith.index_cast %521 : i32 to index
    %c0_168 = arith.constant 0 : index
    %523 = vector.load %arg8[%522, %c0_168] : memref<16x64xf32, #tpu.memory_space<vmem>>, vector<1x64xf32>
    %c1_i32_169 = arith.constant 1 : i32
    %524 = arith.cmpi sgt, %509, %c1_i32_169 : i32
    %cst_170 = arith.constant 0.000000e+00 : f32
    %525 = vector.broadcast %cst_170 : f32 to vector<1x64xf32>
    %526 = arith.select %524, %523, %525 : vector<1x64xf32>
    %c8_i32_171 = arith.constant 8 : i32
    %527 = arith.addi %c8_i32_171, %513 : i32
    %528 = arith.index_cast %527 : i32 to index
    %c0_172 = arith.constant 0 : index
    %529 = vector.load %arg8[%528, %c0_172] : memref<16x64xf32, #tpu.memory_space<vmem>>, vector<1x64xf32>
    %c0_i32_173 = arith.constant 0 : i32
    %530 = arith.cmpi sgt, %510, %c0_i32_173 : i32
    %cst_174 = arith.constant 0.000000e+00 : f32
    %531 = vector.broadcast %cst_174 : f32 to vector<1x64xf32>
    %532 = arith.select %530, %529, %531 : vector<1x64xf32>
    %c8_i32_175 = arith.constant 8 : i32
    %533 = arith.addi %c8_i32_175, %514 : i32
    %534 = arith.index_cast %533 : i32 to index
    %c0_176 = arith.constant 0 : index
    %535 = vector.load %arg8[%534, %c0_176] : memref<16x64xf32, #tpu.memory_space<vmem>>, vector<1x64xf32>
    %c1_i32_177 = arith.constant 1 : i32
    %536 = arith.cmpi sgt, %510, %c1_i32_177 : i32
    %cst_178 = arith.constant 0.000000e+00 : f32
    %537 = vector.broadcast %cst_178 : f32 to vector<1x64xf32>
    %538 = arith.select %536, %535, %537 : vector<1x64xf32>
    %539 = tpu.concatenate %520, %526, %532, %538 in 0 : vector<1x64xf32>, vector<1x64xf32>, vector<1x64xf32>, vector<1x64xf32> -> vector<4x64xf32>
    %540 = vector.extract_strided_slice %539 {offsets = [0, 0], sizes = [4, 32], strides = [1, 1]} : vector<4x64xf32> to vector<4x32xf32>
    %541 = vector.extract_strided_slice %539 {offsets = [0, 32], sizes = [4, 32], strides = [1, 1]} : vector<4x64xf32> to vector<4x32xf32>
    %cst_179 = arith.constant dense<0.000000e+00> : vector<4x128xf32>
    %542 = tpu.matmul %541, %8, %cst_179 {dimension_numbers = #tpu.dot_dimension_numbers<[1], [0], [0], [1], [0, 0, 1, 1], [], []>} : vector<4x32xf32>, vector<32x128xf32>, vector<4x128xf32> -> vector<4x128xf32>
    %543 = vector.extract_strided_slice %7 {offsets = [5, 0], sizes = [1, 128], strides = [1, 1]} : vector<16x128xf32> to vector<1x128xf32>
    %544 = vector.extract_strided_slice %542 {offsets = [0, 0], sizes = [2, 128], strides = [1, 1]} : vector<4x128xf32> to vector<2x128xf32>
    %545 = vector.extract_strided_slice %540 {offsets = [0, 0], sizes = [2, 32], strides = [1, 1]} : vector<4x32xf32> to vector<2x32xf32>
    %546 = vector.extract_strided_slice %543 {offsets = [0, 96], sizes = [1, 32], strides = [1, 1]} : vector<1x128xf32> to vector<1x32xf32>
    %547 = vector.extract_strided_slice %544 {offsets = [0, 96], sizes = [2, 32], strides = [1, 1]} : vector<2x128xf32> to vector<2x32xf32>
    %548 = vector.broadcast %546 : vector<1x32xf32> to vector<2x32xf32>
    %549 = arith.addf %547, %548 : vector<2x32xf32>
    %550 = arith.negf %549 : vector<2x32xf32>
    %551 = math.exp %550 : vector<2x32xf32>
    %cst_180 = arith.constant 1.000000e+00 : f32
    %552 = vector.broadcast %cst_180 : f32 to vector<2x32xf32>
    %553 = arith.addf %552, %551 : vector<2x32xf32>
    %554 = arith.divf %552, %553 : vector<2x32xf32>
    %555 = arith.mulf %554, %545 : vector<2x32xf32>
    %cst_181 = arith.constant dense<0.000000e+00> : vector<32xf32>
    %556 = vector.multi_reduction <add>, %555, %cst_181 [0] : vector<2x32xf32> to vector<32xf32>
    %557 = vector.shape_cast %556 : vector<32xf32> to vector<1x32xf32>
    %cst_182 = arith.constant dense<0.000000e+00> : vector<128xf32>
    %558 = vector.multi_reduction <add>, %544, %cst_182 [0] : vector<2x128xf32> to vector<128xf32>
    %559 = vector.shape_cast %558 : vector<128xf32> to vector<1x128xf32>
    %560 = arith.addf %543, %559 : vector<1x128xf32>
    %561 = arith.negf %560 : vector<1x128xf32>
    %562 = math.exp %561 : vector<1x128xf32>
    %cst_183 = arith.constant 1.000000e+00 : f32
    %563 = vector.broadcast %cst_183 : f32 to vector<1x128xf32>
    %564 = arith.addf %563, %562 : vector<1x128xf32>
    %565 = arith.divf %563, %564 : vector<1x128xf32>
    %566 = math.tanh %560 : vector<1x128xf32>
    %567 = vector.extract_strided_slice %565 {offsets = [0, 0], sizes = [1, 32], strides = [1, 1]} : vector<1x128xf32> to vector<1x32xf32>
    %568 = vector.extract_strided_slice %565 {offsets = [0, 32], sizes = [1, 32], strides = [1, 1]} : vector<1x128xf32> to vector<1x32xf32>
    %569 = vector.extract_strided_slice %566 {offsets = [0, 64], sizes = [1, 32], strides = [1, 1]} : vector<1x128xf32> to vector<1x32xf32>
    %570 = arith.mulf %567, %569 : vector<1x32xf32>
    %571 = arith.addf %570, %557 : vector<1x32xf32>
    %572 = math.tanh %571 : vector<1x32xf32>
    %573 = arith.mulf %568, %572 : vector<1x32xf32>
    %574 = tpu.concatenate %571, %573 in 1 : vector<1x32xf32>, vector<1x32xf32> -> vector<1x64xf32>
    %c5_184 = arith.constant 5 : index
    %c0_185 = arith.constant 0 : index
    %575 = vector.load %arg8[%c5_184, %c0_185] : memref<16x64xf32, #tpu.memory_space<vmem>>, vector<1x64xf32>
    tpu.vector_store %arg8[%c5_184, %c0_185], %574 {strides = array<i32>} : memref<16x64xf32, #tpu.memory_space<vmem>>, vector<1x64xf32>,
    %576 = vector.extract_strided_slice %7 {offsets = [13, 0], sizes = [1, 128], strides = [1, 1]} : vector<16x128xf32> to vector<1x128xf32>
    %577 = vector.extract_strided_slice %542 {offsets = [2, 0], sizes = [2, 128], strides = [1, 1]} : vector<4x128xf32> to vector<2x128xf32>
    %578 = vector.extract_strided_slice %540 {offsets = [2, 0], sizes = [2, 32], strides = [1, 1]} : vector<4x32xf32> to vector<2x32xf32>
    %579 = vector.extract_strided_slice %576 {offsets = [0, 96], sizes = [1, 32], strides = [1, 1]} : vector<1x128xf32> to vector<1x32xf32>
    %580 = vector.extract_strided_slice %577 {offsets = [0, 96], sizes = [2, 32], strides = [1, 1]} : vector<2x128xf32> to vector<2x32xf32>
    %581 = vector.broadcast %579 : vector<1x32xf32> to vector<2x32xf32>
    %582 = arith.addf %580, %581 : vector<2x32xf32>
    %583 = arith.negf %582 : vector<2x32xf32>
    %584 = math.exp %583 : vector<2x32xf32>
    %cst_186 = arith.constant 1.000000e+00 : f32
    %585 = vector.broadcast %cst_186 : f32 to vector<2x32xf32>
    %586 = arith.addf %585, %584 : vector<2x32xf32>
    %587 = arith.divf %585, %586 : vector<2x32xf32>
    %588 = arith.mulf %587, %578 : vector<2x32xf32>
    %cst_187 = arith.constant dense<0.000000e+00> : vector<32xf32>
    %589 = vector.multi_reduction <add>, %588, %cst_187 [0] : vector<2x32xf32> to vector<32xf32>
    %590 = vector.shape_cast %589 : vector<32xf32> to vector<1x32xf32>
    %cst_188 = arith.constant dense<0.000000e+00> : vector<128xf32>
    %591 = vector.multi_reduction <add>, %577, %cst_188 [0] : vector<2x128xf32> to vector<128xf32>
    %592 = vector.shape_cast %591 : vector<128xf32> to vector<1x128xf32>
    %593 = arith.addf %576, %592 : vector<1x128xf32>
    %594 = arith.negf %593 : vector<1x128xf32>
    %595 = math.exp %594 : vector<1x128xf32>
    %cst_189 = arith.constant 1.000000e+00 : f32
    %596 = vector.broadcast %cst_189 : f32 to vector<1x128xf32>
    %597 = arith.addf %596, %595 : vector<1x128xf32>
    %598 = arith.divf %596, %597 : vector<1x128xf32>
    %599 = math.tanh %593 : vector<1x128xf32>
    %600 = vector.extract_strided_slice %598 {offsets = [0, 0], sizes = [1, 32], strides = [1, 1]} : vector<1x128xf32> to vector<1x32xf32>
    %601 = vector.extract_strided_slice %598 {offsets = [0, 32], sizes = [1, 32], strides = [1, 1]} : vector<1x128xf32> to vector<1x32xf32>
    %602 = vector.extract_strided_slice %599 {offsets = [0, 64], sizes = [1, 32], strides = [1, 1]} : vector<1x128xf32> to vector<1x32xf32>
    %603 = arith.mulf %600, %602 : vector<1x32xf32>
    %604 = arith.addf %603, %590 : vector<1x32xf32>
    %605 = math.tanh %604 : vector<1x32xf32>
    %606 = arith.mulf %601, %605 : vector<1x32xf32>
    %607 = tpu.concatenate %604, %606 in 1 : vector<1x32xf32>, vector<1x32xf32> -> vector<1x64xf32>
    %c13_190 = arith.constant 13 : index
    %c0_191 = arith.constant 0 : index
    %608 = vector.load %arg8[%c13_190, %c0_191] : memref<16x64xf32, #tpu.memory_space<vmem>>, vector<1x64xf32>
    tpu.vector_store %arg8[%c13_190, %c0_191], %607 {strides = array<i32>} : memref<16x64xf32, #tpu.memory_space<vmem>>, vector<1x64xf32>,
    %c6_192 = arith.constant 6 : index
    %609 = memref.load %arg2[%c6_192] : memref<16xi32, #tpu.memory_space<smem>>
    %c14 = arith.constant 14 : index
    %610 = memref.load %arg2[%c14] : memref<16xi32, #tpu.memory_space<smem>>
    %c12_193 = arith.constant 12 : index
    %611 = memref.load %arg1[%c12_193] : memref<32xi32, #tpu.memory_space<smem>>
    %c13_194 = arith.constant 13 : index
    %612 = memref.load %arg1[%c13_194] : memref<32xi32, #tpu.memory_space<smem>>
    %c28 = arith.constant 28 : index
    %613 = memref.load %arg1[%c28] : memref<32xi32, #tpu.memory_space<smem>>
    %c29 = arith.constant 29 : index
    %614 = memref.load %arg1[%c29] : memref<32xi32, #tpu.memory_space<smem>>
    %c0_i32_195 = arith.constant 0 : i32
    %615 = arith.addi %c0_i32_195, %611 : i32
    %616 = arith.index_cast %615 : i32 to index
    %c0_196 = arith.constant 0 : index
    %617 = vector.load %arg8[%616, %c0_196] : memref<16x64xf32, #tpu.memory_space<vmem>>, vector<1x64xf32>
    %c0_i32_197 = arith.constant 0 : i32
    %618 = arith.cmpi sgt, %609, %c0_i32_197 : i32
    %cst_198 = arith.constant 0.000000e+00 : f32
    %619 = vector.broadcast %cst_198 : f32 to vector<1x64xf32>
    %620 = arith.select %618, %617, %619 : vector<1x64xf32>
    %c0_i32_199 = arith.constant 0 : i32
    %621 = arith.addi %c0_i32_199, %612 : i32
    %622 = arith.index_cast %621 : i32 to index
    %c0_200 = arith.constant 0 : index
    %623 = vector.load %arg8[%622, %c0_200] : memref<16x64xf32, #tpu.memory_space<vmem>>, vector<1x64xf32>
    %c1_i32_201 = arith.constant 1 : i32
    %624 = arith.cmpi sgt, %609, %c1_i32_201 : i32
    %cst_202 = arith.constant 0.000000e+00 : f32
    %625 = vector.broadcast %cst_202 : f32 to vector<1x64xf32>
    %626 = arith.select %624, %623, %625 : vector<1x64xf32>
    %c8_i32_203 = arith.constant 8 : i32
    %627 = arith.addi %c8_i32_203, %613 : i32
    %628 = arith.index_cast %627 : i32 to index
    %c0_204 = arith.constant 0 : index
    %629 = vector.load %arg8[%628, %c0_204] : memref<16x64xf32, #tpu.memory_space<vmem>>, vector<1x64xf32>
    %c0_i32_205 = arith.constant 0 : i32
    %630 = arith.cmpi sgt, %610, %c0_i32_205 : i32
    %cst_206 = arith.constant 0.000000e+00 : f32
    %631 = vector.broadcast %cst_206 : f32 to vector<1x64xf32>
    %632 = arith.select %630, %629, %631 : vector<1x64xf32>
    %c8_i32_207 = arith.constant 8 : i32
    %633 = arith.addi %c8_i32_207, %614 : i32
    %634 = arith.index_cast %633 : i32 to index
    %c0_208 = arith.constant 0 : index
    %635 = vector.load %arg8[%634, %c0_208] : memref<16x64xf32, #tpu.memory_space<vmem>>, vector<1x64xf32>
    %c1_i32_209 = arith.constant 1 : i32
    %636 = arith.cmpi sgt, %610, %c1_i32_209 : i32
    %cst_210 = arith.constant 0.000000e+00 : f32
    %637 = vector.broadcast %cst_210 : f32 to vector<1x64xf32>
    %638 = arith.select %636, %635, %637 : vector<1x64xf32>
    %639 = tpu.concatenate %620, %626, %632, %638 in 0 : vector<1x64xf32>, vector<1x64xf32>, vector<1x64xf32>, vector<1x64xf32> -> vector<4x64xf32>
    %640 = vector.extract_strided_slice %639 {offsets = [0, 0], sizes = [4, 32], strides = [1, 1]} : vector<4x64xf32> to vector<4x32xf32>
    %641 = vector.extract_strided_slice %639 {offsets = [0, 32], sizes = [4, 32], strides = [1, 1]} : vector<4x64xf32> to vector<4x32xf32>
    %cst_211 = arith.constant dense<0.000000e+00> : vector<4x128xf32>
    %642 = tpu.matmul %641, %8, %cst_211 {dimension_numbers = #tpu.dot_dimension_numbers<[1], [0], [0], [1], [0, 0, 1, 1], [], []>} : vector<4x32xf32>, vector<32x128xf32>, vector<4x128xf32> -> vector<4x128xf32>
    %643 = vector.extract_strided_slice %7 {offsets = [6, 0], sizes = [1, 128], strides = [1, 1]} : vector<16x128xf32> to vector<1x128xf32>
    %644 = vector.extract_strided_slice %642 {offsets = [0, 0], sizes = [2, 128], strides = [1, 1]} : vector<4x128xf32> to vector<2x128xf32>
    %645 = vector.extract_strided_slice %640 {offsets = [0, 0], sizes = [2, 32], strides = [1, 1]} : vector<4x32xf32> to vector<2x32xf32>
    %646 = vector.extract_strided_slice %643 {offsets = [0, 96], sizes = [1, 32], strides = [1, 1]} : vector<1x128xf32> to vector<1x32xf32>
    %647 = vector.extract_strided_slice %644 {offsets = [0, 96], sizes = [2, 32], strides = [1, 1]} : vector<2x128xf32> to vector<2x32xf32>
    %648 = vector.broadcast %646 : vector<1x32xf32> to vector<2x32xf32>
    %649 = arith.addf %647, %648 : vector<2x32xf32>
    %650 = arith.negf %649 : vector<2x32xf32>
    %651 = math.exp %650 : vector<2x32xf32>
    %cst_212 = arith.constant 1.000000e+00 : f32
    %652 = vector.broadcast %cst_212 : f32 to vector<2x32xf32>
    %653 = arith.addf %652, %651 : vector<2x32xf32>
    %654 = arith.divf %652, %653 : vector<2x32xf32>
    %655 = arith.mulf %654, %645 : vector<2x32xf32>
    %cst_213 = arith.constant dense<0.000000e+00> : vector<32xf32>
    %656 = vector.multi_reduction <add>, %655, %cst_213 [0] : vector<2x32xf32> to vector<32xf32>
    %657 = vector.shape_cast %656 : vector<32xf32> to vector<1x32xf32>
    %cst_214 = arith.constant dense<0.000000e+00> : vector<128xf32>
    %658 = vector.multi_reduction <add>, %644, %cst_214 [0] : vector<2x128xf32> to vector<128xf32>
    %659 = vector.shape_cast %658 : vector<128xf32> to vector<1x128xf32>
    %660 = arith.addf %643, %659 : vector<1x128xf32>
    %661 = arith.negf %660 : vector<1x128xf32>
    %662 = math.exp %661 : vector<1x128xf32>
    %cst_215 = arith.constant 1.000000e+00 : f32
    %663 = vector.broadcast %cst_215 : f32 to vector<1x128xf32>
    %664 = arith.addf %663, %662 : vector<1x128xf32>
    %665 = arith.divf %663, %664 : vector<1x128xf32>
    %666 = math.tanh %660 : vector<1x128xf32>
    %667 = vector.extract_strided_slice %665 {offsets = [0, 0], sizes = [1, 32], strides = [1, 1]} : vector<1x128xf32> to vector<1x32xf32>
    %668 = vector.extract_strided_slice %665 {offsets = [0, 32], sizes = [1, 32], strides = [1, 1]} : vector<1x128xf32> to vector<1x32xf32>
    %669 = vector.extract_strided_slice %666 {offsets = [0, 64], sizes = [1, 32], strides = [1, 1]} : vector<1x128xf32> to vector<1x32xf32>
    %670 = arith.mulf %667, %669 : vector<1x32xf32>
    %671 = arith.addf %670, %657 : vector<1x32xf32>
    %672 = math.tanh %671 : vector<1x32xf32>
    %673 = arith.mulf %668, %672 : vector<1x32xf32>
    %674 = tpu.concatenate %671, %673 in 1 : vector<1x32xf32>, vector<1x32xf32> -> vector<1x64xf32>
    %c6_216 = arith.constant 6 : index
    %c0_217 = arith.constant 0 : index
    %675 = vector.load %arg8[%c6_216, %c0_217] : memref<16x64xf32, #tpu.memory_space<vmem>>, vector<1x64xf32>
    tpu.vector_store %arg8[%c6_216, %c0_217], %674 {strides = array<i32>} : memref<16x64xf32, #tpu.memory_space<vmem>>, vector<1x64xf32>,
    %676 = vector.extract_strided_slice %7 {offsets = [14, 0], sizes = [1, 128], strides = [1, 1]} : vector<16x128xf32> to vector<1x128xf32>
    %677 = vector.extract_strided_slice %642 {offsets = [2, 0], sizes = [2, 128], strides = [1, 1]} : vector<4x128xf32> to vector<2x128xf32>
    %678 = vector.extract_strided_slice %640 {offsets = [2, 0], sizes = [2, 32], strides = [1, 1]} : vector<4x32xf32> to vector<2x32xf32>
    %679 = vector.extract_strided_slice %676 {offsets = [0, 96], sizes = [1, 32], strides = [1, 1]} : vector<1x128xf32> to vector<1x32xf32>
    %680 = vector.extract_strided_slice %677 {offsets = [0, 96], sizes = [2, 32], strides = [1, 1]} : vector<2x128xf32> to vector<2x32xf32>
    %681 = vector.broadcast %679 : vector<1x32xf32> to vector<2x32xf32>
    %682 = arith.addf %680, %681 : vector<2x32xf32>
    %683 = arith.negf %682 : vector<2x32xf32>
    %684 = math.exp %683 : vector<2x32xf32>
    %cst_218 = arith.constant 1.000000e+00 : f32
    %685 = vector.broadcast %cst_218 : f32 to vector<2x32xf32>
    %686 = arith.addf %685, %684 : vector<2x32xf32>
    %687 = arith.divf %685, %686 : vector<2x32xf32>
    %688 = arith.mulf %687, %678 : vector<2x32xf32>
    %cst_219 = arith.constant dense<0.000000e+00> : vector<32xf32>
    %689 = vector.multi_reduction <add>, %688, %cst_219 [0] : vector<2x32xf32> to vector<32xf32>
    %690 = vector.shape_cast %689 : vector<32xf32> to vector<1x32xf32>
    %cst_220 = arith.constant dense<0.000000e+00> : vector<128xf32>
    %691 = vector.multi_reduction <add>, %677, %cst_220 [0] : vector<2x128xf32> to vector<128xf32>
    %692 = vector.shape_cast %691 : vector<128xf32> to vector<1x128xf32>
    %693 = arith.addf %676, %692 : vector<1x128xf32>
    %694 = arith.negf %693 : vector<1x128xf32>
    %695 = math.exp %694 : vector<1x128xf32>
    %cst_221 = arith.constant 1.000000e+00 : f32
    %696 = vector.broadcast %cst_221 : f32 to vector<1x128xf32>
    %697 = arith.addf %696, %695 : vector<1x128xf32>
    %698 = arith.divf %696, %697 : vector<1x128xf32>
    %699 = math.tanh %693 : vector<1x128xf32>
    %700 = vector.extract_strided_slice %698 {offsets = [0, 0], sizes = [1, 32], strides = [1, 1]} : vector<1x128xf32> to vector<1x32xf32>
    %701 = vector.extract_strided_slice %698 {offsets = [0, 32], sizes = [1, 32], strides = [1, 1]} : vector<1x128xf32> to vector<1x32xf32>
    %702 = vector.extract_strided_slice %699 {offsets = [0, 64], sizes = [1, 32], strides = [1, 1]} : vector<1x128xf32> to vector<1x32xf32>
    %703 = arith.mulf %700, %702 : vector<1x32xf32>
    %704 = arith.addf %703, %690 : vector<1x32xf32>
    %705 = math.tanh %704 : vector<1x32xf32>
    %706 = arith.mulf %701, %705 : vector<1x32xf32>
    %707 = tpu.concatenate %704, %706 in 1 : vector<1x32xf32>, vector<1x32xf32> -> vector<1x64xf32>
    %c14_222 = arith.constant 14 : index
    %c0_223 = arith.constant 0 : index
    %708 = vector.load %arg8[%c14_222, %c0_223] : memref<16x64xf32, #tpu.memory_space<vmem>>, vector<1x64xf32>
    tpu.vector_store %arg8[%c14_222, %c0_223], %707 {strides = array<i32>} : memref<16x64xf32, #tpu.memory_space<vmem>>, vector<1x64xf32>,
    %c7_224 = arith.constant 7 : index
    %709 = memref.load %arg2[%c7_224] : memref<16xi32, #tpu.memory_space<smem>>
    %c15 = arith.constant 15 : index
    %710 = memref.load %arg2[%c15] : memref<16xi32, #tpu.memory_space<smem>>
    %c14_225 = arith.constant 14 : index
    %711 = memref.load %arg1[%c14_225] : memref<32xi32, #tpu.memory_space<smem>>
    %c15_226 = arith.constant 15 : index
    %712 = memref.load %arg1[%c15_226] : memref<32xi32, #tpu.memory_space<smem>>
    %c30 = arith.constant 30 : index
    %713 = memref.load %arg1[%c30] : memref<32xi32, #tpu.memory_space<smem>>
    %c31 = arith.constant 31 : index
    %714 = memref.load %arg1[%c31] : memref<32xi32, #tpu.memory_space<smem>>
    %c0_i32_227 = arith.constant 0 : i32
    %715 = arith.addi %c0_i32_227, %711 : i32
    %716 = arith.index_cast %715 : i32 to index
    %c0_228 = arith.constant 0 : index
    %717 = vector.load %arg8[%716, %c0_228] : memref<16x64xf32, #tpu.memory_space<vmem>>, vector<1x64xf32>
    %c0_i32_229 = arith.constant 0 : i32
    %718 = arith.cmpi sgt, %709, %c0_i32_229 : i32
    %cst_230 = arith.constant 0.000000e+00 : f32
    %719 = vector.broadcast %cst_230 : f32 to vector<1x64xf32>
    %720 = arith.select %718, %717, %719 : vector<1x64xf32>
    %c0_i32_231 = arith.constant 0 : i32
    %721 = arith.addi %c0_i32_231, %712 : i32
    %722 = arith.index_cast %721 : i32 to index
    %c0_232 = arith.constant 0 : index
    %723 = vector.load %arg8[%722, %c0_232] : memref<16x64xf32, #tpu.memory_space<vmem>>, vector<1x64xf32>
    %c1_i32_233 = arith.constant 1 : i32
    %724 = arith.cmpi sgt, %709, %c1_i32_233 : i32
    %cst_234 = arith.constant 0.000000e+00 : f32
    %725 = vector.broadcast %cst_234 : f32 to vector<1x64xf32>
    %726 = arith.select %724, %723, %725 : vector<1x64xf32>
    %c8_i32_235 = arith.constant 8 : i32
    %727 = arith.addi %c8_i32_235, %713 : i32
    %728 = arith.index_cast %727 : i32 to index
    %c0_236 = arith.constant 0 : index
    %729 = vector.load %arg8[%728, %c0_236] : memref<16x64xf32, #tpu.memory_space<vmem>>, vector<1x64xf32>
    %c0_i32_237 = arith.constant 0 : i32
    %730 = arith.cmpi sgt, %710, %c0_i32_237 : i32
    %cst_238 = arith.constant 0.000000e+00 : f32
    %731 = vector.broadcast %cst_238 : f32 to vector<1x64xf32>
    %732 = arith.select %730, %729, %731 : vector<1x64xf32>
    %c8_i32_239 = arith.constant 8 : i32
    %733 = arith.addi %c8_i32_239, %714 : i32
    %734 = arith.index_cast %733 : i32 to index
    %c0_240 = arith.constant 0 : index
    %735 = vector.load %arg8[%734, %c0_240] : memref<16x64xf32, #tpu.memory_space<vmem>>, vector<1x64xf32>
    %c1_i32_241 = arith.constant 1 : i32
    %736 = arith.cmpi sgt, %710, %c1_i32_241 : i32
    %cst_242 = arith.constant 0.000000e+00 : f32
    %737 = vector.broadcast %cst_242 : f32 to vector<1x64xf32>
    %738 = arith.select %736, %735, %737 : vector<1x64xf32>
    %739 = tpu.concatenate %720, %726, %732, %738 in 0 : vector<1x64xf32>, vector<1x64xf32>, vector<1x64xf32>, vector<1x64xf32> -> vector<4x64xf32>
    %740 = vector.extract_strided_slice %739 {offsets = [0, 0], sizes = [4, 32], strides = [1, 1]} : vector<4x64xf32> to vector<4x32xf32>
    %741 = vector.extract_strided_slice %739 {offsets = [0, 32], sizes = [4, 32], strides = [1, 1]} : vector<4x64xf32> to vector<4x32xf32>
    %cst_243 = arith.constant dense<0.000000e+00> : vector<4x128xf32>
    %742 = tpu.matmul %741, %8, %cst_243 {dimension_numbers = #tpu.dot_dimension_numbers<[1], [0], [0], [1], [0, 0, 1, 1], [], []>} : vector<4x32xf32>, vector<32x128xf32>, vector<4x128xf32> -> vector<4x128xf32>
    %743 = vector.extract_strided_slice %7 {offsets = [7, 0], sizes = [1, 128], strides = [1, 1]} : vector<16x128xf32> to vector<1x128xf32>
    %744 = vector.extract_strided_slice %742 {offsets = [0, 0], sizes = [2, 128], strides = [1, 1]} : vector<4x128xf32> to vector<2x128xf32>
    %745 = vector.extract_strided_slice %740 {offsets = [0, 0], sizes = [2, 32], strides = [1, 1]} : vector<4x32xf32> to vector<2x32xf32>
    %746 = vector.extract_strided_slice %743 {offsets = [0, 96], sizes = [1, 32], strides = [1, 1]} : vector<1x128xf32> to vector<1x32xf32>
    %747 = vector.extract_strided_slice %744 {offsets = [0, 96], sizes = [2, 32], strides = [1, 1]} : vector<2x128xf32> to vector<2x32xf32>
    %748 = vector.broadcast %746 : vector<1x32xf32> to vector<2x32xf32>
    %749 = arith.addf %747, %748 : vector<2x32xf32>
    %750 = arith.negf %749 : vector<2x32xf32>
    %751 = math.exp %750 : vector<2x32xf32>
    %cst_244 = arith.constant 1.000000e+00 : f32
    %752 = vector.broadcast %cst_244 : f32 to vector<2x32xf32>
    %753 = arith.addf %752, %751 : vector<2x32xf32>
    %754 = arith.divf %752, %753 : vector<2x32xf32>
    %755 = arith.mulf %754, %745 : vector<2x32xf32>
    %cst_245 = arith.constant dense<0.000000e+00> : vector<32xf32>
    %756 = vector.multi_reduction <add>, %755, %cst_245 [0] : vector<2x32xf32> to vector<32xf32>
    %757 = vector.shape_cast %756 : vector<32xf32> to vector<1x32xf32>
    %cst_246 = arith.constant dense<0.000000e+00> : vector<128xf32>
    %758 = vector.multi_reduction <add>, %744, %cst_246 [0] : vector<2x128xf32> to vector<128xf32>
    %759 = vector.shape_cast %758 : vector<128xf32> to vector<1x128xf32>
    %760 = arith.addf %743, %759 : vector<1x128xf32>
    %761 = arith.negf %760 : vector<1x128xf32>
    %762 = math.exp %761 : vector<1x128xf32>
    %cst_247 = arith.constant 1.000000e+00 : f32
    %763 = vector.broadcast %cst_247 : f32 to vector<1x128xf32>
    %764 = arith.addf %763, %762 : vector<1x128xf32>
    %765 = arith.divf %763, %764 : vector<1x128xf32>
    %766 = math.tanh %760 : vector<1x128xf32>
    %767 = vector.extract_strided_slice %765 {offsets = [0, 0], sizes = [1, 32], strides = [1, 1]} : vector<1x128xf32> to vector<1x32xf32>
    %768 = vector.extract_strided_slice %765 {offsets = [0, 32], sizes = [1, 32], strides = [1, 1]} : vector<1x128xf32> to vector<1x32xf32>
    %769 = vector.extract_strided_slice %766 {offsets = [0, 64], sizes = [1, 32], strides = [1, 1]} : vector<1x128xf32> to vector<1x32xf32>
    %770 = arith.mulf %767, %769 : vector<1x32xf32>
    %771 = arith.addf %770, %757 : vector<1x32xf32>
    %772 = math.tanh %771 : vector<1x32xf32>
    %773 = arith.mulf %768, %772 : vector<1x32xf32>
    %774 = tpu.concatenate %771, %773 in 1 : vector<1x32xf32>, vector<1x32xf32> -> vector<1x64xf32>
    %c7_248 = arith.constant 7 : index
    %c0_249 = arith.constant 0 : index
    %775 = vector.load %arg8[%c7_248, %c0_249] : memref<16x64xf32, #tpu.memory_space<vmem>>, vector<1x64xf32>
    tpu.vector_store %arg8[%c7_248, %c0_249], %774 {strides = array<i32>} : memref<16x64xf32, #tpu.memory_space<vmem>>, vector<1x64xf32>,
    %c0_250 = arith.constant 0 : index
    %c0_251 = arith.constant 0 : index
    %776 = vector.load %arg7[%c0_250, %c0_251] : memref<2x64xf32, #tpu.memory_space<vmem>>, vector<1x64xf32>
    tpu.vector_store %arg7[%c0_250, %c0_251], %774 {strides = array<i32>} : memref<2x64xf32, #tpu.memory_space<vmem>>, vector<1x64xf32>,
    %777 = vector.extract_strided_slice %7 {offsets = [15, 0], sizes = [1, 128], strides = [1, 1]} : vector<16x128xf32> to vector<1x128xf32>
    %778 = vector.extract_strided_slice %742 {offsets = [2, 0], sizes = [2, 128], strides = [1, 1]} : vector<4x128xf32> to vector<2x128xf32>
    %779 = vector.extract_strided_slice %740 {offsets = [2, 0], sizes = [2, 32], strides = [1, 1]} : vector<4x32xf32> to vector<2x32xf32>
    %780 = vector.extract_strided_slice %777 {offsets = [0, 96], sizes = [1, 32], strides = [1, 1]} : vector<1x128xf32> to vector<1x32xf32>
    %781 = vector.extract_strided_slice %778 {offsets = [0, 96], sizes = [2, 32], strides = [1, 1]} : vector<2x128xf32> to vector<2x32xf32>
    %782 = vector.broadcast %780 : vector<1x32xf32> to vector<2x32xf32>
    %783 = arith.addf %781, %782 : vector<2x32xf32>
    %784 = arith.negf %783 : vector<2x32xf32>
    %785 = math.exp %784 : vector<2x32xf32>
    %cst_252 = arith.constant 1.000000e+00 : f32
    %786 = vector.broadcast %cst_252 : f32 to vector<2x32xf32>
    %787 = arith.addf %786, %785 : vector<2x32xf32>
    %788 = arith.divf %786, %787 : vector<2x32xf32>
    %789 = arith.mulf %788, %779 : vector<2x32xf32>
    %cst_253 = arith.constant dense<0.000000e+00> : vector<32xf32>
    %790 = vector.multi_reduction <add>, %789, %cst_253 [0] : vector<2x32xf32> to vector<32xf32>
    %791 = vector.shape_cast %790 : vector<32xf32> to vector<1x32xf32>
    %cst_254 = arith.constant dense<0.000000e+00> : vector<128xf32>
    %792 = vector.multi_reduction <add>, %778, %cst_254 [0] : vector<2x128xf32> to vector<128xf32>
    %793 = vector.shape_cast %792 : vector<128xf32> to vector<1x128xf32>
    %794 = arith.addf %777, %793 : vector<1x128xf32>
    %795 = arith.negf %794 : vector<1x128xf32>
    %796 = math.exp %795 : vector<1x128xf32>
    %cst_255 = arith.constant 1.000000e+00 : f32
    %797 = vector.broadcast %cst_255 : f32 to vector<1x128xf32>
    %798 = arith.addf %797, %796 : vector<1x128xf32>
    %799 = arith.divf %797, %798 : vector<1x128xf32>
    %800 = math.tanh %794 : vector<1x128xf32>
    %801 = vector.extract_strided_slice %799 {offsets = [0, 0], sizes = [1, 32], strides = [1, 1]} : vector<1x128xf32> to vector<1x32xf32>
    %802 = vector.extract_strided_slice %799 {offsets = [0, 32], sizes = [1, 32], strides = [1, 1]} : vector<1x128xf32> to vector<1x32xf32>
    %803 = vector.extract_strided_slice %800 {offsets = [0, 64], sizes = [1, 32], strides = [1, 1]} : vector<1x128xf32> to vector<1x32xf32>
    %804 = arith.mulf %801, %803 : vector<1x32xf32>
    %805 = arith.addf %804, %791 : vector<1x32xf32>
    %806 = math.tanh %805 : vector<1x32xf32>
    %807 = arith.mulf %802, %806 : vector<1x32xf32>
    %808 = tpu.concatenate %805, %807 in 1 : vector<1x32xf32>, vector<1x32xf32> -> vector<1x64xf32>
    %c15_256 = arith.constant 15 : index
    %c0_257 = arith.constant 0 : index
    %809 = vector.load %arg8[%c15_256, %c0_257] : memref<16x64xf32, #tpu.memory_space<vmem>>, vector<1x64xf32>
    tpu.vector_store %arg8[%c15_256, %c0_257], %808 {strides = array<i32>} : memref<16x64xf32, #tpu.memory_space<vmem>>, vector<1x64xf32>,
    %c1_258 = arith.constant 1 : index
    %c0_259 = arith.constant 0 : index
    %810 = vector.load %arg7[%c1_258, %c0_259] : memref<2x64xf32, #tpu.memory_space<vmem>>, vector<1x64xf32>
    tpu.vector_store %arg7[%c1_258, %c0_259], %808 {strides = array<i32>} : memref<2x64xf32, #tpu.memory_space<vmem>>, vector<1x64xf32>,
    return
  }
  func.func @transform_0(%arg0: i32, %arg1: memref<32xi32, #tpu.memory_space<smem>>, %arg2: memref<16xi32, #tpu.memory_space<smem>>) -> (i32, i32) {
    %c0_i32 = arith.constant 0 : i32
    %c0_i32_0 = arith.constant 0 : i32
    %c0_i32_1 = arith.constant 0 : i32
    return %c0_i32, %c0_i32_0 : i32, i32
  }
  func.func @transform_1(%arg0: i32, %arg1: memref<32xi32, #tpu.memory_space<smem>>, %arg2: memref<16xi32, #tpu.memory_space<smem>>) -> (i32, i32) {
    %c0_i32 = arith.constant 0 : i32
    %c0_i32_0 = arith.constant 0 : i32
    %c0_i32_1 = arith.constant 0 : i32
    return %c0_i32, %c0_i32_0 : i32, i32
  }
  func.func @transform_2(%arg0: i32, %arg1: memref<32xi32, #tpu.memory_space<smem>>, %arg2: memref<16xi32, #tpu.memory_space<smem>>) -> (i32, i32) {
    %c0_i32 = arith.constant 0 : i32
    %c0_i32_0 = arith.constant 0 : i32
    %c0_i32_1 = arith.constant 0 : i32
    return %c0_i32, %c0_i32_0 : i32, i32
  }
  func.func @transform_3(%arg0: i32, %arg1: memref<32xi32, #tpu.memory_space<smem>>, %arg2: memref<16xi32, #tpu.memory_space<smem>>) -> (i32, i32) {
    %c0_i32 = arith.constant 0 : i32
    %c0_i32_0 = arith.constant 0 : i32
    %c0_i32_1 = arith.constant 0 : i32
    return %c0_i32, %c0_i32_0 : i32, i32
  }
  func.func @transform_4(%arg0: i32, %arg1: memref<32xi32, #tpu.memory_space<smem>>, %arg2: memref<16xi32, #tpu.memory_space<smem>>) -> (i32, i32) {
    %c0_i32 = arith.constant 0 : i32
    %c0_i32_0 = arith.constant 0 : i32
    %c0_i32_1 = arith.constant 0 : i32
    return %c0_i32, %c0_i32_0 : i32, i32
  }
}

</mosaic_0001>

<bundles_post_ra>
// kernel: similarity_tree_lstm_forward.1
= control target key start
LH: loop header
LB: loop body
LE: loop exit
PB: predicated region body
PF: predicated region fallthrough
CT: control target
= control target key end

     0   :  { %s3098_s0 = inlined_call_operand.vmem [shape: s32[32], index: 0, kind: input, shape index: {}]   ;;  %s3099_s2 = inlined_call_operand.vmem [shape: f32[16,64], index: 2, kind: input, shape index: {}]   ;;  %s3100_s3 = inlined_call_operand.vmem [shape: f32[64,128], index: 3, kind: input, shape index: {}]   ;;  %s3101_s4 = inlined_call_operand.vmem [shape: f32[32,128], index: 4, kind: input, shape index: {}]   ;;  %s3102_s5 = inlined_call_operand.vmem [shape: f32[1,128], index: 5, kind: input, shape index: {}]   ;;  %s3103_s6 = inlined_call_operand.vmem [shape: f32[2,64], index: 6, kind: output, shape index: {}]   ;;  %s3104_s1 = inlined_call_operand.vmem [shape: s32[16], index: 1, kind: input, shape index: {}]  }
   0x1   :  { %s11_s23 = sshll.u32 %s3098_s0, 4  ;;  %s15_s26 = sshll.u32 %s3104_s1, 4  ;;  %s12_s23 = int_to_ptr.vmem [resolvable:$true] %s11_s23  ;;  %s16_s26 = int_to_ptr.vmem [resolvable:$true] %s15_s26 }
   0x2   :  { %s2538_s27 = scalar_lea.vmem %s12_s23, 16  ;;  %p2543_p1 = scmp.lt.s32.totalorder %s12_s23, %s12_s23 }
   0x3   :  { %p2539_p0 = scmp.ne.s32.totalorder %s12_s23, %s2538_s27  ;;  %p2544_p2 = scmp.lt.s32.totalorder %s2538_s27, %s2538_s27 }
   0x5   :  { %p2545_p3 = por %p2544_p2, %p2543_p1 }
   0x7   :  { %p2546_p4 = pnand %p2545_p3, %p2539_p0 }
   0x9   :  { %2549 = shalt.err (!%p2546_p4)  }
   0xa   :  { %s2564_s28 = smov [#allocation4]   ;;  %s2550_s29 = scalar_lea.vmem %s16_s26, 16 }
   0xb   :  { %14 = dma.vmem_to_smem %s12_s23, 16, %s2564_s28, [#allocation3] }
   0xc   :  { %p2551_p5 = scmp.ne.s32.totalorder %s16_s26, %s2550_s29  ;;  %p2555_p6 = scmp.lt.s32.totalorder %s16_s26, %s16_s26 }
   0xd   :  { %p2556_p7 = scmp.lt.s32.totalorder %s2550_s29, %s2550_s29 }
   0xf   :  { %p2557_p8 = por %p2556_p7, %p2555_p6 }
  0x11   :  { %p2558_p9 = pnand %p2557_p8, %p2551_p5 }
  0x13   :  { %2561 = shalt.err (!%p2558_p9)  }
  0x14   :  { %s2565_s0 = smov [#allocation5]  }
  0x15   :  { %18 = dma.vmem_to_smem %s16_s26, 16, %s2565_s0, [#allocation3] }
  0x16   :  { %2562 = dma.done.wait [#allocation3], 32 }
  0x17   :  { %2563 = vsyncadd [#allocation3], 4294967264 }
  0x18   :  { %20 = sfence }
  0x19   :  { %vm29_vm0 = vcmask 523264   ;;  %s2612_s1 = sld [smem:[#allocation5]]  ;;  %v2566_v0 = vmov 0.0   ;;  %v41_v1 = vld [vmem:[%s3100_s3 + $0x38] sm:$0xff]  ;;  %v40_v2 = vld [vmem:[%s3100_s3 + $0x30] sm:$0xff]  ;;  %v39_v3 = vld [vmem:[%s3100_s3 + $0x28] sm:$0xff]  ;;  %v261_v35 = vlaneseq }
  0x1a   :  { %30 = vst.msk [vmem:[#allocation2] sm:$0xff] %vm29_vm0, %v2566_v0  ;;  %31 = vst.msk [vmem:[#allocation2 + $0x8] sm:$0xff] %vm29_vm0, %v2566_v0  ;;  %s2618_s30 = sld [smem:[#allocation5 + $0x8]]  ;;  %2247 = vmatprep.subr.mxu1 %v2566_v0  ;;  %2228 = vmatprep.subr.mxu0 %v41_v1  ;;  %vm2567_vm1 = vmmov 0   ;;  %v32_v4 = vld [vmem:[%s3099_s2] sm:$0xff]  ;;  %v2644_v5 = vld [vmem:[%s3101_s4 + $0x18] sm:$0xff] }
  0x1b   :  { %s2627_s11 = sld [smem:[#allocation4]]  ;;  %2229 = vmatpush3.msra.mxu0 %v41_v1  ;;  %2255 = vmatprep.mubr.msk.f32.mxu1 %vm2567_vm1, %v2566_v0  ;;  %v38_v6 = vld [vmem:[%s3100_s3 + $0x20] sm:$0xff]  ;;  %v2655_v7 = vld [vmem:[%s3101_s4 + $0x10] sm:$0xff]  ;;  %v37_v8 = vld [vmem:[%s3100_s3 + $0x18] sm:$0xff]  ;;  %vm179_vm4 = vcmask 1040384   ;;  %vm181_vm6 = vcmask 1041408  }
  0x1c   :  { %s2629_s12 = sld [smem:[#allocation4 + $0x1]]  ;;  %2230 = vmatprep.subr.mxu0 %v40_v2  ;;  %2244 = vmatprep.mubr.msk.f32.mxu0 %vm29_vm0, %v32_v4  ;;  %v2668_v9 = vld [vmem:[%s3101_s4 + $0x8] sm:$0xff]  ;;  %v36_v10 = vld [vmem:[%s3100_s3 + $0x10] sm:$0xff]  ;;  %v2679_v11 = vld [vmem:[%s3101_s4] sm:$0xff]  ;;  %vm183_vm8 = vcmask 1042432   ;;  %vm188_vm9 = vcmask 261120  }
  0x1d   :  { %s2636_s15 = sld [smem:[#allocation4 + $0x10]]  ;;  %2231 = vmatpush3.msra.mxu0 %v40_v2  ;;  %2248 = vmatpush3.msra.mxu1 %v2644_v5  ;;  %v35_v14 = vld [vmem:[%s3100_s3 + $0x8] sm:$0xff]  ;;  %v34_v19 = vld [vmem:[%s3100_s3] sm:$0xff]  ;;  %v2740_v37 = vshrl.u32 %v261_v35, 7  ;;  %vm274_vm10 = vcmask 1042176   ;;  %vm314_vm11 = vcmask 516096  }
  0x1e   :  { %s2646_s20 = sld [smem:[#allocation4 + $0x11]]  ;;  %2232 = vmatprep.subr.mxu0 %v39_v3  ;;  %2249 = vmatprep.subr.mxu1 %v2566_v0  ;;  %v33_v24 = vld [vmem:[%s3099_s2 + $0x8] sm:$0xff]  ;;  %s2568_s2 = smov 96   ;;  %v2073_v38 = vld [vmem:[%s3102_s5] ss:$0 sm:$0xff] }
  0x1f   :  { %p142_p10 = scmp.gt.s32.totalorder %s2612_s1, 0  ;;  %p149_p11 = scmp.gt.s32.totalorder %s2612_s1, 1  ;;  %2233 = vmatpush3.msra.mxu0 %v39_v3  ;;  %2250 = vmatpush3.msra.mxu1 %v2655_v7  ;;  %v263_v42 = vsub.s32 0, %v2740_v37 }
  0x20   :  { %p157_p12 = scmp.gt.s32.totalorder %s2618_s30, 0  ;;  %p165_p13 = scmp.gt.s32.totalorder %s2618_s30, 1  ;;  %2234 = vmatprep.subr.mxu0 %v38_v6  ;;  %2251 = vmatprep.subr.mxu1 %v2566_v0 }
  0x21   :  { %s143_s29 = scalar_select %p142_p10, 1, 0  ;;  %2235 = vmatpush3.msra.mxu0 %v38_v6  ;;  %2252 = vmatpush3.msra.mxu1 %v2668_v9 }
  0x22   :  { %2236 = vmatprep.subr.mxu0 %v37_v8  ;;  %s140_s10 = scalar_lea.vmem [#allocation2], %s2627_s11  ;;  %2253 = vmatprep.subr.mxu1 %v2566_v0  ;;  %s147_s17 = scalar_lea.vmem [#allocation2], %s2629_s12 }
  0x23   :  { %v141_v12 = vld [vmem:[%s140_s10] sm:$0x1]  ;;  %v144_v13 = vstv %s143_s29  ;;  %s150_s13 = scalar_select %p149_p11, 1, 0  ;;  %2237 = vmatpush3.msra.mxu0 %v37_v8  ;;  %2254 = vmatpush3.msra.mxu1 %v2679_v11 }
  0x24   :  { %vm2689_vm2 = vcmp.eq.s32.totalorder %v144_v13, 1  ;;  %v148_v16 = vld [vmem:[%s147_s17] sm:$0x1]  ;;  %s158_s11 = scalar_select %p157_p12, 1, 0  ;;  %2238 = vmatprep.subr.mxu0 %v36_v10  ;;  %2258 = vmatprep.subr.mxu1 %v2566_v0 }
  0x25   :  { %v151_v17 = vstv %s150_s13  ;;  %s2027_s1 = scalar_lea.vmem [#allocation2], %s2636_s15  ;;  %2239 = vmatpush3.msra.mxu0 %v36_v10  ;;  %v146_v21 = vsel %vm2689_vm2, %v141_v12, 0.0  ;;  %s2029_s15 = scalar_lea.vmem [#allocation2], %s2646_s20 }
  0x26   :  { %v2080_v18 = vld [vmem:[%s2027_s1 + $0x8] sm:$0x1]  ;;  %vm152_vm3 = vcmp.eq.s32.totalorder %v151_v17, 1  ;;  %v159_v20 = vstv %s158_s11  ;;  %s166_s12 = scalar_select %p165_p13, 1, 0  ;;  %2240 = vmatprep.subr.mxu0 %v35_v14 }
  0x27   :  { %v153_v22 = vsel %vm152_vm3, %v148_v16, 0.0  ;;  %vm160_vm5 = vcmp.eq.s32.totalorder %v159_v20, 1  ;;  %v2081_v23 = vld [vmem:[%s2029_s15 + $0x8] sm:$0x1]  ;;  %2241 = vmatpush3.msra.mxu0 %v35_v14  ;;  %s2569_s5 = smov 64   ;;  %s2570_s20 = smov 32  }
  0x28   :  { %v161_v25 = vsel %vm160_vm5, %v2080_v18, 0.0  ;;  %v167_v26 = vstv %s166_s12  ;;  %v171_v27 = vrot.slane %v153_v22, 7  ;;  %2242 = vmatprep.subr.mxu0 %v34_v19  ;;  %s2087_s23 = sld [smem:[#allocation5 + $0x1]] }
  0x29   :  { %vm168_vm7 = vcmp.eq.s32.totalorder %v167_v26, 1  ;;  %v174_v28 = vrot.slane %v161_v25, 6  ;;  %2243 = vmatpush3.msra.mxu0 %v34_v19  ;;  %s2088_s24 = sld [smem:[#allocation5 + $0x9]] }
  0x2a   :  { %v169_v29 = vsel %vm168_vm7, %v2081_v23, 0.0  ;;  %v180_v30 = vsel %vm179_vm4, %v146_v21, %v171_v27  ;;  %2245 = vmatmul.mubr.msk.f32.vlgmr.msra.gmra.mxu0 %vm29_vm0, %v33_v24  ;;  %2269 = vmatprep.subr.mxu0 %v2566_v0  ;;  %s2766_s25 = sld [smem:[#allocation4 + $0x2]]  ;;  %vm549_vm0 = vcmask 517121  }
  0x2b   :  { %v177_v31 = vrot.slane %v169_v29, 5  ;;  %v182_v32 = vsel %vm181_vm6, %v180_v30, %v174_v28  ;;  %2270 = vmatpush3.msra.mxu0 %v2644_v5  ;;  %2277 = vmatprep.mubr.msk.f32.mxu0 %vm2567_vm1, %v2566_v0  ;;  %s2768_s26 = sld [smem:[#allocation4 + $0x3]] }
  0x2c   :  { %2271 = vmatprep.subr.mxu0 %v2566_v0  ;;  %s2091_s27 = sld [smem:[#allocation4 + $0x12]] }
  0x2d   :  { %v184_v33 = vsel %vm183_vm8, %v182_v32, %v177_v31  ;;  %2272 = vmatpush3.msra.mxu0 %v2655_v7  ;;  %s2092_s28 = sld [smem:[#allocation4 + $0x13]] }
  0x2e   :  { %186 = vrot.lane.b32.xlu0 %v184_v33, %s2568_s2  ;;  %2273 = vmatprep.subr.mxu0 %v2566_v0  ;;  %p382_p0 = scmp.gt.s32.totalorder %s2087_s23, 0  ;;  %p389_p1 = scmp.gt.s32.totalorder %s2087_s23, 1 }
  0x2f   :  { %2274 = vmatpush3.msra.mxu0 %v2668_v9  ;;  %p397_p2 = scmp.gt.s32.totalorder %s2088_s24, 0  ;;  %p405_p3 = scmp.gt.s32.totalorder %s2088_s24, 1 }
  0x30   :  { %2275 = vmatprep.subr.mxu0 %v2566_v0  ;;  %s383_s29 = scalar_select %p382_p0, 1, 0 }
  0x31   :  { %2276 = vmatpush3.msra.mxu0 %v2679_v11  ;;  %s390_s0 = scalar_select %p389_p1, 1, 0 }
  0x32   :  { %2291 = vmatprep.subr.mxu0 %v2566_v0  ;;  %s398_s7 = scalar_select %p397_p2, 1, 0 }
  0x33   :  { %s406_s8 = scalar_select %p405_p3, 1, 0 }
  0x34   :  { %s380_s9 = scalar_lea.vmem [#allocation2], %s2766_s25  ;;  %s387_s10 = scalar_lea.vmem [#allocation2], %s2768_s26 }
  0x35   :  { %s2033_s13 = scalar_lea.vmem [#allocation2], %s2091_s27  ;;  %s2035_s14 = scalar_lea.vmem [#allocation2], %s2092_s28 }
  0x36   :  { %s2100_s16 = sld [smem:[#allocation5 + $0x2]] }
  0x37   :  { %s2101_s17 = sld [smem:[#allocation5 + $0xa]] }
  0x38   :  { %s2810_s11 = sld [smem:[#allocation4 + $0x4]] }
  0x39   :  { %s2812_s1 = sld [smem:[#allocation4 + $0x5]] }
  0x3a   :  { %s2104_s18 = sld [smem:[#allocation4 + $0x14]] }
  0x3b   :  { %s2814_s19 = sld [smem:[#allocation4 + $0x15]] }
  0x3c   :  { %p617_p4 = scmp.gt.s32.totalorder %s2100_s16, 0  ;;  %p624_p5 = scmp.gt.s32.totalorder %s2100_s16, 1 }
  0x3d   :  { %p632_p6 = scmp.gt.s32.totalorder %s2101_s17, 0  ;;  %p640_p7 = scmp.gt.s32.totalorder %s2101_s17, 1 }
  0x3e   :  { %s618_s12 = scalar_select %p617_p4, 1, 0 }
  0x3f   :  { %s625_s15 = scalar_select %p624_p5, 1, 0 }
  0x40   :  { %s633_s21 = scalar_select %p632_p6, 1, 0 }
  0x41   :  { %s641_s22 = scalar_select %p640_p7, 1, 0 }
  0x42   :  { %s615_s3 = scalar_lea.vmem [#allocation2], %s2810_s11  ;;  %s622_s30 = scalar_lea.vmem [#allocation2], %s2812_s1 }
  0x43   :  { %s2039_s23 = scalar_lea.vmem [#allocation2], %s2104_s18  ;;  %s2041_s24 = scalar_lea.vmem [#allocation2], %s2814_s19 }
  0x44   :  { %s2113_s25 = sld [smem:[#allocation5 + $0x3]] }
  0x45   :  { %s2114_s26 = sld [smem:[#allocation5 + $0xb]] }
  0x46   :  { %s2857_s27 = sld [smem:[#allocation4 + $0x6]] }
  0x47   :  { %s2859_s28 = sld [smem:[#allocation4 + $0x7]] }
  0x48   :  { %s2974_s11 = sld [smem:[#allocation4 + $0x1b]] }
  0x4a   :  { %p852_p8 = scmp.gt.s32.totalorder %s2113_s25, 0  ;;  %p859_p9 = scmp.gt.s32.totalorder %s2113_s25, 1 }
  0x4b   :  { %p867_p10 = scmp.gt.s32.totalorder %s2114_s26, 0  ;;  %p875_p11 = scmp.gt.s32.totalorder %s2114_s26, 1 }
  0x4c   :  { %s2928_s25 = sld [smem:[#allocation4 + $0x19]] }
  0xa0   :  { %v2726_v34 = vpop.permute.xlu0 %186 }
  0xa1   :  { %2256 = vmatmul.mubr.msk.f32.vlgmr.msra.gmra.mxu1 %vm188_vm9, %v2726_v34 }
  0xa2   :  { %2259 = vmatpush3.msra.mxu1 %v2644_v5  ;;  %2266 = vmatprep.mubr.msk.f32.mxu1 %vm2567_vm1, %v2566_v0 }
  0xa3   :  { %2260 = vmatprep.subr.mxu1 %v2566_v0 }
  0xa4   :  { %2261 = vmatpush3.msra.mxu1 %v2655_v7 }
  0xa5   :  { %2262 = vmatprep.subr.mxu1 %v2566_v0 }
  0xa6   :  { %2263 = vmatpush3.msra.mxu1 %v2668_v9 }
  0xa7   :  { %2264 = vmatprep.subr.mxu1 %v2566_v0 }
  0xa8   :  { %2265 = vmatpush3.msra.mxu1 %v2679_v11 }
  0xa9   :  { %2280 = vmatprep.subr.mxu1 %v2566_v0 }
  0xea   :  { %v2246_v36 = vpop.f32.mrf.mxu0 }
  0xeb   :  { %v2745_v40 = vadd.f32 %v2246_v36, %v2073_v38 }
  0xec   :  { %v121_v39 = vpop.f32.mrf.mxu0 }
  0xed   :  { %v2747_v41 = vadd.f32 %v2073_v38, %v121_v39  ;;  %v319_v44 = vrot.slane %v2745_v40, %v263_v42 }
  0xef   :  { %v264_v43 = vrot.slane %v2747_v41, %v263_v42 }
 0x161   :  { %v257_v45 = vpop.f32.mrf.mxu1 }
 0x162   :  { %v265_v46 = vadd.f32 %v264_v43, %v257_v45  ;;  %v282_v47 = vsel %vm181_vm6, %v257_v45, 0.0  ;;  %v320_v48 = vadd.f32 %v319_v44, %v257_v45  ;;  %v339_v49 = vrot.slane %v257_v45, 2 }
 0x163   :  { %v283_v50 = vrot.slane %v282_v47, 4  ;;  %v2257_v51 = vpop.f32.mrf.mxu1 }
 0x164   :  { %v2083_v52 = vmul.f32 -1.442695, %v265_v46  ;;  %v2085_v53 = vmul.f32 -1.442695, %v320_v48  ;;  %v341_v54 = vsel %vm181_vm6, %v339_v49, 0.0 }
 0x165   :  { %v284_v55 = vadd.f32 %v283_v50, %v282_v47  ;;  %v342_v56 = vrot.slane %v341_v54, 4 }
 0x166   :  { %2342 = vpow2.f32 %v2083_v52 }
 0x167   :  { %v285_v57 = vrot.slane %v284_v55, 2  ;;  %2344 = vpow2.f32 %v2085_v53  ;;  %v343_v58 = vadd.f32 %v342_v56, %v341_v54 }
 0x169   :  { %v286_v59 = vadd.f32 %v285_v57, %v284_v55  ;;  %v344_v60 = vrot.slane %v343_v58, 2 }
 0x16b   :  { %v287_v61 = vrot.slane %v286_v59, 1  ;;  %v345_v62 = vadd.f32 %v344_v60, %v343_v58 }
 0x16d   :  { %v288_v63 = vadd.f32 %v287_v61, %v286_v59  ;;  %v346_v1 = vrot.slane %v345_v62, 1  ;;  %v391_v61 = vstv %s390_s0  ;;  %s2861_s0 = sld [smem:[#allocation4 + $0x17]] }
 0x16e   :  { %vm392_vm12 = vcmp.eq.s32.totalorder %v391_v61, 1 }
 0x16f   :  { %v289_v2 = vadd.f32 %v288_v63, %v2747_v41  ;;  %v347_v3 = vadd.f32 %v346_v1, %v345_v62  ;;  %v399_v62 = vstv %s398_s7  ;;  %v384_v63 = vstv %s383_s29  ;;  %s2117_s29 = sld [smem:[#allocation4 + $0x16]] }
 0x170   :  { %v407_v1 = vstv %s406_s8  ;;  %vm400_vm13 = vcmp.eq.s32.totalorder %v399_v62, 1  ;;  %vm2772_vm14 = vcmp.eq.s32.totalorder %v384_v63, 1  ;;  %s853_s7 = scalar_select %p852_p8, 1, 0 }
 0x171   :  { %2346 = vtanh.f32 %v289_v2  ;;  %v348_v4 = vadd.f32 %v347_v3, %v2745_v40  ;;  %vm408_vm15 = vcmp.eq.s32.totalorder %v407_v1, 1  ;;  %s860_s8 = scalar_select %p859_p9, 1, 0 }
 0x173   :  { %v2343_v6 = vpop.eup %2342  ;;  %2348 = vtanh.f32 %v348_v4  ;;  %v2086_v35 = vmul.f32 -1.442695, %v348_v4  ;;  %s2047_s17 = scalar_lea.vmem [#allocation2], %s2861_s0 }
 0x174   :  { %v2345_v8 = vpop.eup %2344  ;;  %v269_v10 = vadd.f32 1.0, %v2343_v6 }
 0x175   :  { %v324_v12 = vadd.f32 1.0, %v2345_v8  ;;  %s2045_s16 = scalar_lea.vmem [#allocation2], %s2117_s29 }
 0x176   :  { %2350 = vrcp.f32 %v269_v10 }
 0x177   :  { %2352 = vrcp.f32 %v324_v12 }
 0x17e   :  { %v2347_v13 = vpop.eup %2346 }
 0x17f   :  { %298 = vrot.lane.b32.xlu0 %v2347_v13, %s2569_s5 }
 0x180   :  { %v2349_v14 = vpop.eup %2348 }
 0x181   :  { %357 = vrot.lane.b32.xlu1 %v2349_v14, %s2569_s5 }
 0x183   :  { %v2351_v15 = vpop.eup %2350 }
 0x184   :  { %v2353_v16 = vpop.eup %2352  ;;  %v273_v17 = vmul.f32 %v2351_v15, %v2726_v34 }
 0x185   :  { %v327_v18 = vmul.f32 %v2353_v16, %v2726_v34  ;;  %v2084_v34 = vmul.f32 -1.442695, %v289_v2 }
 0x186   :  { %v275_v19 = vsel %vm274_vm10, %v273_v17, 0.0 }
 0x187   :  { %v276_v20 = vrot.slane %v275_v19, 4  ;;  %v329_v21 = vrot.slane %v327_v18, 2  ;;  %2354 = vpow2.f32 %v2084_v34 }
 0x188   :  { %2356 = vpow2.f32 %v2086_v35 }
 0x189   :  { %v277_v22 = vadd.f32 %v276_v20, %v275_v19  ;;  %v331_v23 = vsel %vm274_vm10, %v329_v21, 0.0 }
 0x18a   :  { %v332_v24 = vrot.slane %v331_v23, 4 }
 0x18b   :  { %v278_v25 = vrot.slane %v277_v22, 2 }
 0x18c   :  { %v333_v26 = vadd.f32 %v332_v24, %v331_v23 }
 0x18d   :  { %v279_v27 = vadd.f32 %v278_v25, %v277_v22  ;;  %v499_v22 = vsub.s32 1, %v2740_v37 }
 0x18e   :  { %v334_v28 = vrot.slane %v333_v26, 2 }
 0x18f   :  { %v280_v29 = vrot.slane %v279_v27, 1  ;;  %v500_v23 = vrot.slane %v2747_v41, %v499_v22  ;;  %v554_v24 = vrot.slane %v2745_v40, %v499_v22 }
 0x190   :  { %v335_v30 = vadd.f32 %v334_v28, %v333_v26 }
 0x191   :  { %v281_v31 = vadd.f32 %v280_v29, %v279_v27 }
 0x192   :  { %v336_v32 = vrot.slane %v335_v30, 1 }
 0x193   :  { %303 = vrot.lane.b32.xlu1 %v281_v31, %s2570_s20 }
 0x194   :  { %v337_v33 = vadd.f32 %v336_v32, %v335_v30  ;;  %v2355_v36 = vpop.eup %2354 }
 0x195   :  { %v2357_v38 = vpop.eup %2356  ;;  %v293_v39 = vadd.f32 1.0, %v2355_v36 }
 0x196   :  { %362 = vrot.lane.b32.xlu0 %v337_v33, %s2570_s20  ;;  %v352_v42 = vadd.f32 1.0, %v2357_v38 }
 0x197   :  { %2358 = vrcp.f32 %v293_v39 }
 0x198   :  { %2360 = vrcp.f32 %v352_v42 }
 0x1a4   :  { %v2359_v45 = vpop.eup %2358 }
 0x1a5   :  { %v2361_v48 = vpop.eup %2360 }
 0x1f1   :  { %v299_v43 = vpop.permute.xlu0 %298 }
 0x1f2   :  { %v301_v46 = vmul.f32 %v2359_v45, %v299_v43 }
 0x1f3   :  { %v358_v44 = vpop.permute.xlu1 %357 }
 0x1f4   :  { %v360_v50 = vmul.f32 %v2361_v48, %v358_v44 }
 0x205   :  { %v304_v47 = vpop.permute.xlu1 %303 }
 0x206   :  { %v306_v49 = vadd.f32 %v304_v47, %v301_v46 }
 0x208   :  { %2362 = vtanh.f32 %v306_v49  ;;  %v363_v51 = vpop.permute.xlu0 %362 }
 0x209   :  { %v365_v52 = vadd.f32 %v363_v51, %v360_v50 }
 0x20b   :  { %2364 = vtanh.f32 %v365_v52 }
 0x215   :  { %v2363_v53 = vpop.eup %2362 }
 0x216   :  { %309 = vrot.lane.b32.xlu1 %v2363_v53, %s2570_s20 }
 0x218   :  { %v2365_v54 = vpop.eup %2364 }
 0x219   :  { %368 = vrot.lane.b32.xlu0 %v2365_v54, %s2570_s20 }
 0x288   :  { %v310_v55 = vpop.permute.xlu1 %309 }
 0x289   :  { %v312_v56 = vmul.f32 %v2359_v45, %v310_v55 }
 0x28b   :  { %v313_v57 = vsel %vm188_vm9, %v306_v49, %v312_v56  ;;  %v369_v58 = vpop.permute.xlu0 %368 }
 0x28c   :  { %315 = vst.msk [vmem:[#allocation2] sm:$0x1] %vm314_vm11, %v313_v57  ;;  %v371_v59 = vmul.f32 %v2361_v48, %v369_v58 }
 0x28e   :  { %v372_v60 = vsel %vm188_vm9, %v365_v52, %v371_v59 }
 0x28f   :  { %373 = vst.msk [vmem:[#allocation2 + $0x8] sm:$0x1] %vm314_vm11, %v372_v60  ;;  %vm784_vm11 = vcmask 518146  }
 0x296   :  { %v381_v3 = vld [vmem:[%s380_s9] sm:$0x1]  ;;  %v2093_v6 = vld [vmem:[%s2033_s13 + $0x8] sm:$0x1]  ;;  %s868_s9 = scalar_select %p867_p10, 1, 0 }
 0x297   :  { %v388_v4 = vld [vmem:[%s387_s10] sm:$0x1]  ;;  %v2094_v8 = vld [vmem:[%s2035_s14 + $0x8] sm:$0x1]  ;;  %v401_v12 = vsel %vm400_vm13, %v2093_v6, 0.0  ;;  %v386_v16 = vsel %vm2772_vm14, %v381_v3, 0.0 }
 0x298   :  { %v393_v10 = vsel %vm392_vm12, %v388_v4, 0.0  ;;  %v409_v13 = vsel %vm408_vm15, %v2094_v8, 0.0  ;;  %v414_v15 = vrot.slane %v401_v12, 6  ;;  %s876_s10 = scalar_select %p875_p11, 1, 0 }
 0x299   :  { %v411_v14 = vrot.slane %v393_v10, 7  ;;  %v417_v17 = vrot.slane %v409_v13, 5  ;;  %s850_s13 = scalar_lea.vmem [#allocation2], %s2857_s27  ;;  %s857_s14 = scalar_lea.vmem [#allocation2], %s2859_s28 }
 0x29b   :  { %v419_v18 = vsel %vm179_vm4, %v386_v16, %v411_v14 }
 0x29c   :  { %v420_v19 = vsel %vm181_vm6, %v419_v18, %v414_v15 }
 0x29d   :  { %v421_v20 = vsel %vm183_vm8, %v420_v19, %v417_v17 }
 0x29e   :  { %423 = vrot.lane.b32.xlu1 %v421_v20, %s2568_s2 }
 0x310   :  { %v424_v21 = vpop.permute.xlu1 %423 }
 0x311   :  { %2267 = vmatmul.mubr.msk.f32.vlgmr.msra.gmra.mxu1 %vm188_vm9, %v424_v21 }
 0x312   :  { %2281 = vmatpush3.msra.mxu1 %v2644_v5  ;;  %2288 = vmatprep.mubr.msk.f32.mxu1 %vm2567_vm1, %v2566_v0 }
 0x313   :  { %2282 = vmatprep.subr.mxu1 %v2566_v0 }
 0x314   :  { %2283 = vmatpush3.msra.mxu1 %v2655_v7 }
 0x315   :  { %2284 = vmatprep.subr.mxu1 %v2566_v0 }
 0x316   :  { %2285 = vmatpush3.msra.mxu1 %v2668_v9 }
 0x317   :  { %2286 = vmatprep.subr.mxu1 %v2566_v0 }
 0x318   :  { %2287 = vmatpush3.msra.mxu1 %v2679_v11 }
 0x319   :  { %2302 = vmatprep.subr.mxu1 %v2566_v0 }
 0x3d1   :  { %v493_v25 = vpop.f32.mrf.mxu1 }
 0x3d2   :  { %v501_v26 = vadd.f32 %v500_v23, %v493_v25  ;;  %v517_v27 = vsel %vm181_vm6, %v493_v25, 0.0  ;;  %v555_v28 = vadd.f32 %v554_v24, %v493_v25  ;;  %v574_v29 = vrot.slane %v493_v25, 2 }
 0x3d3   :  { %v518_v30 = vrot.slane %v517_v27, 4  ;;  %v2268_v31 = vpop.f32.mrf.mxu1 }
 0x3d4   :  { %v2096_v32 = vmul.f32 -1.442695, %v501_v26  ;;  %v2098_v33 = vmul.f32 -1.442695, %v555_v28  ;;  %v576_v34 = vsel %vm181_vm6, %v574_v29, 0.0 }
 0x3d5   :  { %v519_v35 = vadd.f32 %v518_v30, %v517_v27  ;;  %v577_v36 = vrot.slane %v576_v34, 4 }
 0x3d6   :  { %2366 = vpow2.f32 %v2096_v32 }
 0x3d7   :  { %v520_v38 = vrot.slane %v519_v35, 2  ;;  %2368 = vpow2.f32 %v2098_v33  ;;  %v578_v39 = vadd.f32 %v577_v36, %v576_v34 }
 0x3d9   :  { %v521_v42 = vadd.f32 %v520_v38, %v519_v35  ;;  %v579_v43 = vrot.slane %v578_v39, 2 }
 0x3db   :  { %v522_v44 = vrot.slane %v521_v42, 1  ;;  %v580_v45 = vadd.f32 %v579_v43, %v578_v39 }
 0x3dd   :  { %v523_v46 = vadd.f32 %v522_v44, %v521_v42  ;;  %v581_v47 = vrot.slane %v580_v45, 1  ;;  %v626_v44 = vstv %s625_s15 }
 0x3de   :  { %vm627_vm2 = vcmp.eq.s32.totalorder %v626_v44, 1 }
 0x3df   :  { %v524_v48 = vadd.f32 %v523_v46, %v2747_v41  ;;  %v582_v49 = vadd.f32 %v581_v47, %v580_v45  ;;  %v634_v45 = vstv %s633_s21  ;;  %v619_v46 = vstv %s618_s12 }
 0x3e0   :  { %v642_v47 = vstv %s641_s22  ;;  %vm635_vm3 = vcmp.eq.s32.totalorder %v634_v45, 1  ;;  %vm2818_vm5 = vcmp.eq.s32.totalorder %v619_v46, 1 }
 0x3e1   :  { %2370 = vtanh.f32 %v524_v48  ;;  %v583_v50 = vadd.f32 %v582_v49, %v2745_v40  ;;  %v2097_v17 = vmul.f32 -1.442695, %v524_v48  ;;  %vm643_vm7 = vcmp.eq.s32.totalorder %v642_v47, 1 }
 0x3e3   :  { %v2367_v51 = vpop.eup %2366  ;;  %2372 = vtanh.f32 %v583_v50  ;;  %v2099_v18 = vmul.f32 -1.442695, %v583_v50 }
 0x3e4   :  { %v2369_v52 = vpop.eup %2368  ;;  %v505_v53 = vadd.f32 1.0, %v2367_v51 }
 0x3e5   :  { %v559_v54 = vadd.f32 1.0, %v2369_v52 }
 0x3e6   :  { %2374 = vrcp.f32 %v505_v53 }
 0x3e7   :  { %2376 = vrcp.f32 %v559_v54 }
 0x3e8   :  { %2378 = vpow2.f32 %v2097_v17 }
 0x3e9   :  { %2380 = vpow2.f32 %v2099_v18 }
 0x3ee   :  { %v2371_v55 = vpop.eup %2370 }
 0x3ef   :  { %533 = vrot.lane.b32.xlu0 %v2371_v55, %s2569_s5 }
 0x3f0   :  { %v2373_v56 = vpop.eup %2372 }
 0x3f1   :  { %592 = vrot.lane.b32.xlu1 %v2373_v56, %s2569_s5 }
 0x3f3   :  { %v2375_v57 = vpop.eup %2374 }
 0x3f4   :  { %v2377_v58 = vpop.eup %2376  ;;  %v509_v59 = vmul.f32 %v2375_v57, %v424_v21 }
 0x3f5   :  { %v562_v60 = vmul.f32 %v2377_v58, %v424_v21  ;;  %v2379_v19 = vpop.eup %2378 }
 0x3f6   :  { %v510_v61 = vsel %vm274_vm10, %v509_v59, 0.0  ;;  %v2381_v20 = vpop.eup %2380  ;;  %v528_v21 = vadd.f32 1.0, %v2379_v19 }
 0x3f7   :  { %v511_v62 = vrot.slane %v510_v61, 4  ;;  %v564_v63 = vrot.slane %v562_v60, 2  ;;  %v587_v22 = vadd.f32 1.0, %v2381_v20 }
 0x3f8   :  { %2382 = vrcp.f32 %v528_v21 }
 0x3f9   :  { %v512_v1 = vadd.f32 %v511_v62, %v510_v61  ;;  %v566_v2 = vsel %vm274_vm10, %v564_v63, 0.0  ;;  %2384 = vrcp.f32 %v587_v22 }
 0x3fa   :  { %v567_v3 = vrot.slane %v566_v2, 4 }
 0x3fb   :  { %v513_v4 = vrot.slane %v512_v1, 2 }
 0x3fc   :  { %v568_v6 = vadd.f32 %v567_v3, %v566_v2 }
 0x3fd   :  { %v514_v8 = vadd.f32 %v513_v4, %v512_v1  ;;  %v734_v1 = vsub.s32 2, %v2740_v37 }
 0x3fe   :  { %v569_v10 = vrot.slane %v568_v6, 2 }
 0x3ff   :  { %v515_v12 = vrot.slane %v514_v8, 1  ;;  %v789_v2 = vrot.slane %v2745_v40, %v734_v1 }
 0x400   :  { %v570_v13 = vadd.f32 %v569_v10, %v568_v6 }
 0x401   :  { %v516_v14 = vadd.f32 %v515_v12, %v514_v8 }
 0x402   :  { %v571_v15 = vrot.slane %v570_v13, 1 }
 0x403   :  { %538 = vrot.lane.b32.xlu0 %v516_v14, %s2570_s20 }
 0x404   :  { %v572_v16 = vadd.f32 %v571_v15, %v570_v13 }
 0x405   :  { %v2383_v24 = vpop.eup %2382 }
 0x406   :  { %597 = vrot.lane.b32.xlu1 %v572_v16, %s2570_s20  ;;  %v2385_v28 = vpop.eup %2384 }
 0x461   :  { %v534_v23 = vpop.permute.xlu0 %533 }
 0x462   :  { %v536_v25 = vmul.f32 %v2383_v24, %v534_v23 }
 0x463   :  { %v593_v26 = vpop.permute.xlu1 %592 }
 0x464   :  { %v595_v30 = vmul.f32 %v2385_v28, %v593_v26 }
 0x475   :  { %v539_v27 = vpop.permute.xlu0 %538 }
 0x476   :  { %v541_v29 = vadd.f32 %v539_v27, %v536_v25 }
 0x478   :  { %2386 = vtanh.f32 %v541_v29  ;;  %v598_v31 = vpop.permute.xlu1 %597 }
 0x479   :  { %v600_v32 = vadd.f32 %v598_v31, %v595_v30 }
 0x47b   :  { %2388 = vtanh.f32 %v600_v32 }
 0x485   :  { %v2387_v33 = vpop.eup %2386 }
 0x486   :  { %544 = vrot.lane.b32.xlu0 %v2387_v33, %s2570_s20 }
 0x488   :  { %v2389_v34 = vpop.eup %2388 }
 0x489   :  { %603 = vrot.lane.b32.xlu1 %v2389_v34, %s2570_s20 }
 0x4f8   :  { %v545_v35 = vpop.permute.xlu0 %544 }
 0x4f9   :  { %v547_v36 = vmul.f32 %v2383_v24, %v545_v35 }
 0x4fb   :  { %v548_v38 = vsel %vm188_vm9, %v541_v29, %v547_v36  ;;  %v604_v39 = vpop.permute.xlu1 %603 }
 0x4fc   :  { %550 = vst.msk [vmem:[#allocation2] sm:$0x2] %vm549_vm0, %v548_v38  ;;  %v606_v42 = vmul.f32 %v2385_v28, %v604_v39 }
 0x4fe   :  { %v607_v43 = vsel %vm188_vm9, %v600_v32, %v606_v42 }
 0x4ff   :  { %608 = vst.msk [vmem:[#allocation2 + $0x8] sm:$0x2] %vm549_vm0, %v607_v43  ;;  %vm1019_vm0 = vcmask 519171  }
 0x506   :  { %v616_v49 = vld [vmem:[%s615_s3] sm:$0x1]  ;;  %v2106_v51 = vld [vmem:[%s2039_s23 + $0x8] sm:$0x1]  ;;  %s2127_s3 = sld [smem:[#allocation5 + $0xc]] }
 0x507   :  { %v623_v50 = vld [vmem:[%s622_s30] sm:$0x1]  ;;  %v636_v53 = vsel %vm635_vm3, %v2106_v51, 0.0  ;;  %v2107_v54 = vld [vmem:[%s2041_s24 + $0x8] sm:$0x1]  ;;  %v621_v58 = vsel %vm2818_vm5, %v616_v49, 0.0 }
 0x508   :  { %v628_v52 = vsel %vm627_vm2, %v623_v50, 0.0  ;;  %v644_v55 = vsel %vm643_vm7, %v2107_v54, 0.0  ;;  %v649_v57 = vrot.slane %v636_v53, 6  ;;  %s2924_s30 = sld [smem:[#allocation4 + $0x8]] }
 0x509   :  { %v646_v56 = vrot.slane %v628_v52, 7  ;;  %v652_v59 = vrot.slane %v644_v55, 5  ;;  %s2926_s23 = sld [smem:[#allocation4 + $0x9]] }
 0x50a   :  { %s2130_s24 = sld [smem:[#allocation4 + $0x18]] }
 0x50b   :  { %v654_v60 = vsel %vm179_vm4, %v621_v58, %v646_v56 }
 0x50c   :  { %v655_v61 = vsel %vm181_vm6, %v654_v60, %v649_v57  ;;  %p1102_p0 = scmp.gt.s32.totalorder %s2127_s3, 0  ;;  %p1110_p1 = scmp.gt.s32.totalorder %s2127_s3, 1 }
 0x50d   :  { %v656_v62 = vsel %vm183_vm8, %v655_v61, %v652_v59  ;;  %s2152_s3 = sld [smem:[#allocation5 + $0x6]] }
 0x50e   :  { %658 = vrot.lane.b32.xlu0 %v656_v62, %s2568_s2  ;;  %s1103_s28 = scalar_select %p1102_p0, 1, 0 }
 0x50f   :  { %s1111_s29 = scalar_select %p1110_p1, 1, 0 }
 0x510   :  { %s1085_s0 = scalar_lea.vmem [#allocation2], %s2924_s30  ;;  %s2153_s30 = sld [smem:[#allocation5 + $0xe]] }
 0x513   :  { %p1557_p6 = scmp.gt.s32.totalorder %s2152_s3, 0  ;;  %p1564_p7 = scmp.gt.s32.totalorder %s2152_s3, 1 }
 0x516   :  { %p1572_p8 = scmp.gt.s32.totalorder %s2153_s30, 0  ;;  %p1580_p9 = scmp.gt.s32.totalorder %s2153_s30, 1 }
 0x580   :  { %v659_v63 = vpop.permute.xlu0 %658 }
 0x581   :  { %2278 = vmatmul.mubr.msk.f32.vlgmr.msra.gmra.mxu0 %vm188_vm9, %v659_v63 }
 0x582   :  { %2292 = vmatpush3.msra.mxu0 %v2644_v5  ;;  %2299 = vmatprep.mubr.msk.f32.mxu0 %vm2567_vm1, %v2566_v0  ;;  %v735_v5 = vrot.slane %v2747_v41, %v734_v1 }
 0x583   :  { %2293 = vmatprep.subr.mxu0 %v2566_v0 }
 0x584   :  { %2294 = vmatpush3.msra.mxu0 %v2655_v7 }
 0x585   :  { %2295 = vmatprep.subr.mxu0 %v2566_v0 }
 0x586   :  { %2296 = vmatpush3.msra.mxu0 %v2668_v9 }
 0x587   :  { %2297 = vmatprep.subr.mxu0 %v2566_v0 }
 0x588   :  { %2298 = vmatpush3.msra.mxu0 %v2679_v11 }
 0x589   :  { %2313 = vmatprep.subr.mxu0 %v2566_v0 }
 0x641   :  { %v728_v3 = vpop.f32.mrf.mxu0 }
 0x642   :  { %v736_v4 = vadd.f32 %v735_v5, %v728_v3  ;;  %v752_v7 = vsel %vm181_vm6, %v728_v3, 0.0  ;;  %v790_v6 = vadd.f32 %v789_v2, %v728_v3  ;;  %v809_v8 = vrot.slane %v728_v3, 2 }
 0x643   :  { %v753_v10 = vrot.slane %v752_v7, 4  ;;  %v2279_v9 = vpop.f32.mrf.mxu0 }
 0x644   :  { %v2109_v12 = vmul.f32 -1.442695, %v736_v4  ;;  %v2111_v13 = vmul.f32 -1.442695, %v790_v6  ;;  %v811_v11 = vsel %vm181_vm6, %v809_v8, 0.0 }
 0x645   :  { %v754_v14 = vadd.f32 %v753_v10, %v752_v7  ;;  %v812_v15 = vrot.slane %v811_v11, 4 }
 0x646   :  { %2390 = vpow2.f32 %v2109_v12 }
 0x647   :  { %v755_v16 = vrot.slane %v754_v14, 2  ;;  %2392 = vpow2.f32 %v2111_v13  ;;  %v813_v17 = vadd.f32 %v812_v15, %v811_v11 }
 0x649   :  { %v756_v18 = vadd.f32 %v755_v16, %v754_v14  ;;  %v814_v19 = vrot.slane %v813_v17, 2  ;;  %v861_v16 = vstv %s860_s8  ;;  %s2051_s8 = scalar_lea.vmem [#allocation2], %s2130_s24  ;;  %s3018_s24 = sld [smem:[#allocation4 + $0xd]] }
 0x64a   :  { %vm862_vm12 = vcmp.eq.s32.totalorder %v861_v16, 1 }
 0x64b   :  { %v757_v20 = vrot.slane %v756_v18, 1  ;;  %v815_v21 = vadd.f32 %v814_v19, %v813_v17  ;;  %v869_v17 = vstv %s868_s9  ;;  %v877_v19 = vstv %s876_s10  ;;  %s2053_s9 = scalar_lea.vmem [#allocation2], %s2928_s25  ;;  %s2139_s10 = sld [smem:[#allocation5 + $0x5]] }
 0x64c   :  { %vm870_vm13 = vcmp.eq.s32.totalorder %v869_v17, 1  ;;  %vm878_vm15 = vcmp.eq.s32.totalorder %v877_v19, 1  ;;  %s2156_s25 = sld [smem:[#allocation4 + $0x1c]] }
 0x64d   :  { %v758_v22 = vadd.f32 %v757_v20, %v756_v18  ;;  %v816_v23 = vrot.slane %v815_v21, 1  ;;  %v854_v18 = vstv %s853_s7  ;;  %s1092_s7 = scalar_lea.vmem [#allocation2], %s2926_s23  ;;  %s3016_s23 = sld [smem:[#allocation4 + $0xc]] }
 0x64e   :  { %vm2865_vm14 = vcmp.eq.s32.totalorder %v854_v18, 1 }
 0x64f   :  { %v759_v24 = vadd.f32 %v758_v22, %v2747_v41  ;;  %v817_v25 = vadd.f32 %v816_v23, %v815_v21 }
 0x651   :  { %2394 = vtanh.f32 %v759_v24  ;;  %v818_v26 = vadd.f32 %v817_v25, %v2745_v40  ;;  %v2110_v55 = vmul.f32 -1.442695, %v759_v24  ;;  %p1322_p2 = scmp.gt.s32.totalorder %s2139_s10, 0  ;;  %p1329_p3 = scmp.gt.s32.totalorder %s2139_s10, 1 }
 0x653   :  { %v2391_v27 = vpop.eup %2390  ;;  %2396 = vtanh.f32 %v818_v26  ;;  %v2112_v56 = vmul.f32 -1.442695, %v818_v26  ;;  %s1323_s1 = scalar_select %p1322_p2, 1, 0 }
 0x654   :  { %v2393_v28 = vpop.eup %2392  ;;  %v740_v29 = vadd.f32 1.0, %v2391_v27  ;;  %s1330_s18 = scalar_select %p1329_p3, 1, 0 }
 0x655   :  { %v794_v30 = vadd.f32 1.0, %v2393_v28 }
 0x656   :  { %2398 = vrcp.f32 %v740_v29 }
 0x657   :  { %2400 = vrcp.f32 %v794_v30 }
 0x658   :  { %2402 = vpow2.f32 %v2110_v55 }
 0x659   :  { %2404 = vpow2.f32 %v2112_v56 }
 0x65e   :  { %v2395_v31 = vpop.eup %2394 }
 0x65f   :  { %768 = vrot.lane.b32.xlu1 %v2395_v31, %s2569_s5 }
 0x660   :  { %v2397_v32 = vpop.eup %2396 }
 0x661   :  { %827 = vrot.lane.b32.xlu0 %v2397_v32, %s2569_s5 }
 0x663   :  { %v2399_v33 = vpop.eup %2398 }
 0x664   :  { %v2401_v34 = vpop.eup %2400  ;;  %v744_v35 = vmul.f32 %v2399_v33, %v659_v63 }
 0x665   :  { %v797_v36 = vmul.f32 %v2401_v34, %v659_v63  ;;  %v2403_v57 = vpop.eup %2402 }
 0x666   :  { %v745_v38 = vsel %vm274_vm10, %v744_v35, 0.0  ;;  %v2405_v58 = vpop.eup %2404  ;;  %v763_v59 = vadd.f32 1.0, %v2403_v57 }
 0x667   :  { %v746_v39 = vrot.slane %v745_v38, 4  ;;  %v799_v42 = vrot.slane %v797_v36, 2  ;;  %v822_v60 = vadd.f32 1.0, %v2405_v58  ;;  %v2882_v36 = vld [vmem:[%s3101_s4 + $0x18] sm:$0xff] }
 0x668   :  { %2406 = vrcp.f32 %v763_v59 }
 0x669   :  { %v747_v43 = vadd.f32 %v746_v39, %v745_v38  ;;  %v801_v44 = vsel %vm274_vm10, %v799_v42, 0.0  ;;  %2408 = vrcp.f32 %v822_v60  ;;  %v2891_v38 = vld [vmem:[%s3101_s4 + $0x10] sm:$0xff]  ;;  %v2898_v39 = vld [vmem:[%s3101_s4 + $0x8] sm:$0xff]  ;;  %v2905_v42 = vld [vmem:[%s3101_s4] sm:$0xff]  ;;  %s2126_s4 = sld [smem:[#allocation5 + $0x4]] }
 0x66a   :  { %v802_v45 = vrot.slane %v801_v44, 4 }
 0x66b   :  { %v748_v46 = vrot.slane %v747_v43, 2 }
 0x66c   :  { %v803_v47 = vadd.f32 %v802_v45, %v801_v44 }
 0x66d   :  { %v749_v48 = vadd.f32 %v748_v46, %v747_v43  ;;  %v969_v43 = vsub.s32 3, %v2740_v37 }
 0x66e   :  { %v804_v49 = vrot.slane %v803_v47, 2 }
 0x66f   :  { %v750_v50 = vrot.slane %v749_v48, 1  ;;  %v970_v44 = vrot.slane %v2747_v41, %v969_v43  ;;  %v1024_v45 = vrot.slane %v2745_v40, %v969_v43  ;;  %p1087_p12 = scmp.gt.s32.totalorder %s2126_s4, 0  ;;  %p1094_p13 = scmp.gt.s32.totalorder %s2126_s4, 1 }
 0x670   :  { %v805_v51 = vadd.f32 %v804_v49, %v803_v47  ;;  %s2059_s4 = scalar_lea.vmem [#allocation2], %s2974_s11  ;;  %s2169_s11 = sld [smem:[#allocation4 + $0x1e]] }
 0x671   :  { %v751_v52 = vadd.f32 %v750_v50, %v749_v48  ;;  %s1088_s26 = scalar_select %p1087_p12, 1, 0 }
 0x672   :  { %v806_v53 = vrot.slane %v805_v51, 1  ;;  %s1095_s27 = scalar_select %p1094_p13, 1, 0 }
 0x673   :  { %773 = vrot.lane.b32.xlu1 %v751_v52, %s2570_s20 }
 0x674   :  { %v807_v54 = vadd.f32 %v806_v53, %v805_v51 }
 0x675   :  { %v2407_v62 = vpop.eup %2406 }
 0x676   :  { %832 = vrot.lane.b32.xlu0 %v807_v54, %s2570_s20  ;;  %v2409_v2 = vpop.eup %2408 }
 0x6d1   :  { %v769_v61 = vpop.permute.xlu1 %768 }
 0x6d2   :  { %v771_v63 = vmul.f32 %v2407_v62, %v769_v61 }
 0x6d3   :  { %v828_v1 = vpop.permute.xlu0 %827 }
 0x6d4   :  { %v830_v4 = vmul.f32 %v2409_v2, %v828_v1 }
 0x6e5   :  { %v774_v5 = vpop.permute.xlu1 %773 }
 0x6e6   :  { %v776_v3 = vadd.f32 %v774_v5, %v771_v63 }
 0x6e8   :  { %2410 = vtanh.f32 %v776_v3  ;;  %v833_v7 = vpop.permute.xlu0 %832 }
 0x6e9   :  { %v835_v6 = vadd.f32 %v833_v7, %v830_v4 }
 0x6eb   :  { %2412 = vtanh.f32 %v835_v6 }
 0x6f5   :  { %v2411_v8 = vpop.eup %2410 }
 0x6f6   :  { %779 = vrot.lane.b32.xlu1 %v2411_v8, %s2570_s20 }
 0x6f8   :  { %v2413_v10 = vpop.eup %2412 }
 0x6f9   :  { %838 = vrot.lane.b32.xlu0 %v2413_v10, %s2570_s20 }
 0x768   :  { %v780_v9 = vpop.permute.xlu1 %779 }
 0x769   :  { %v782_v12 = vmul.f32 %v2407_v62, %v780_v9 }
 0x76b   :  { %v783_v13 = vsel %vm188_vm9, %v776_v3, %v782_v12  ;;  %v839_v11 = vpop.permute.xlu0 %838 }
 0x76c   :  { %785 = vst.msk [vmem:[#allocation2] sm:$0x4] %vm784_vm11, %v783_v13  ;;  %v841_v14 = vmul.f32 %v2409_v2, %v839_v11 }
 0x76e   :  { %v842_v15 = vsel %vm188_vm9, %v835_v6, %v841_v14 }
 0x76f   :  { %843 = vst.msk [vmem:[#allocation2 + $0x8] sm:$0x4] %vm784_vm11, %v842_v15  ;;  %vm1254_vm11 = vcmask 520196  }
 0x776   :  { %v851_v21 = vld [vmem:[%s850_s13] sm:$0x1]  ;;  %v2119_v23 = vld [vmem:[%s2045_s16 + $0x8] sm:$0x1]  ;;  %s2140_s13 = sld [smem:[#allocation5 + $0xd]] }
 0x777   :  { %v858_v22 = vld [vmem:[%s857_s14] sm:$0x1]  ;;  %v871_v25 = vsel %vm870_vm13, %v2119_v23, 0.0  ;;  %v2120_v26 = vld [vmem:[%s2047_s17 + $0x8] sm:$0x1]  ;;  %v856_v30 = vsel %vm2865_vm14, %v851_v21, 0.0 }
 0x778   :  { %v863_v24 = vsel %vm862_vm12, %v858_v22, 0.0  ;;  %v879_v27 = vsel %vm878_vm15, %v2120_v26, 0.0  ;;  %v884_v29 = vrot.slane %v871_v25, 6  ;;  %s2970_s14 = sld [smem:[#allocation4 + $0xa]] }
 0x779   :  { %v881_v28 = vrot.slane %v863_v24, 7  ;;  %v887_v31 = vrot.slane %v879_v27, 5  ;;  %s2972_s16 = sld [smem:[#allocation4 + $0xb]] }
 0x77a   :  { %s2143_s17 = sld [smem:[#allocation4 + $0x1a]] }
 0x77b   :  { %v889_v32 = vsel %vm179_vm4, %v856_v30, %v881_v28 }
 0x77c   :  { %v890_v33 = vsel %vm181_vm6, %v889_v32, %v884_v29  ;;  %p1337_p4 = scmp.gt.s32.totalorder %s2140_s13, 0  ;;  %p1345_p5 = scmp.gt.s32.totalorder %s2140_s13, 1 }
 0x77d   :  { %v891_v34 = vsel %vm183_vm8, %v890_v33, %v887_v31  ;;  %s2165_s13 = sld [smem:[#allocation5 + $0x7]] }
 0x77e   :  { %893 = vrot.lane.b32.xlu1 %v891_v34, %s2568_s2  ;;  %s1338_s19 = scalar_select %p1337_p4, 1, 0 }
 0x77f   :  { %s1346_s12 = scalar_select %p1345_p5, 1, 0 }
 0x780   :  { %s1320_s15 = scalar_lea.vmem [#allocation2], %s2970_s14  ;;  %s1327_s21 = scalar_lea.vmem [#allocation2], %s2972_s16 }
 0x781   :  { %s2057_s22 = scalar_lea.vmem [#allocation2], %s2143_s17  ;;  %s2166_s14 = sld [smem:[#allocation5 + $0xf]] }
 0x782   :  { %s3053_s16 = sld [smem:[#allocation4 + $0xe]] }
 0x783   :  { %p1792_p10 = scmp.gt.s32.totalorder %s2165_s13, 0  ;;  %s3055_s17 = sld [smem:[#allocation4 + $0xf]] }
 0x784   :  { %p1799_p11 = scmp.gt.s32.totalorder %s2165_s13, 1 }
 0x787   :  { %p1807_p12 = scmp.gt.s32.totalorder %s2166_s14, 0  ;;  %p1815_p13 = scmp.gt.s32.totalorder %s2166_s14, 1 }
 0x7f0   :  { %v894_v35 = vpop.permute.xlu1 %893 }
 0x7f1   :  { %2289 = vmatmul.mubr.msk.f32.vlgmr.msra.gmra.mxu1 %vm188_vm9, %v894_v35 }
 0x7f2   :  { %2303 = vmatpush3.msra.mxu1 %v2882_v36  ;;  %2310 = vmatprep.mubr.msk.f32.mxu1 %vm2567_vm1, %v2566_v0 }
 0x7f3   :  { %2304 = vmatprep.subr.mxu1 %v2566_v0 }
 0x7f4   :  { %2305 = vmatpush3.msra.mxu1 %v2891_v38 }
 0x7f5   :  { %2306 = vmatprep.subr.mxu1 %v2566_v0 }
 0x7f6   :  { %2307 = vmatpush3.msra.mxu1 %v2898_v39 }
 0x7f7   :  { %2308 = vmatprep.subr.mxu1 %v2566_v0 }
 0x7f8   :  { %2309 = vmatpush3.msra.mxu1 %v2905_v42 }
 0x7f9   :  { %2324 = vmatprep.subr.mxu1 %v2566_v0 }
 0x8b1   :  { %v963_v46 = vpop.f32.mrf.mxu1 }
 0x8b2   :  { %v971_v47 = vadd.f32 %v970_v44, %v963_v46  ;;  %v987_v48 = vsel %vm181_vm6, %v963_v46, 0.0  ;;  %v1025_v49 = vadd.f32 %v1024_v45, %v963_v46  ;;  %v1044_v50 = vrot.slane %v963_v46, 2 }
 0x8b3   :  { %v988_v51 = vrot.slane %v987_v48, 4  ;;  %v2290_v52 = vpop.f32.mrf.mxu1 }
 0x8b4   :  { %v2122_v53 = vmul.f32 -1.442695, %v971_v47  ;;  %v2124_v54 = vmul.f32 -1.442695, %v1025_v49  ;;  %v1046_v55 = vsel %vm181_vm6, %v1044_v50, 0.0 }
 0x8b5   :  { %v989_v56 = vadd.f32 %v988_v51, %v987_v48  ;;  %v1047_v57 = vrot.slane %v1046_v55, 4 }
 0x8b6   :  { %2414 = vpow2.f32 %v2122_v53 }
 0x8b7   :  { %v990_v58 = vrot.slane %v989_v56, 2  ;;  %2416 = vpow2.f32 %v2124_v54  ;;  %v1048_v59 = vadd.f32 %v1047_v57, %v1046_v55 }
 0x8b9   :  { %v991_v60 = vadd.f32 %v990_v58, %v989_v56  ;;  %v1049_v61 = vrot.slane %v1048_v59, 2 }
 0x8bb   :  { %v992_v62 = vrot.slane %v991_v60, 1  ;;  %v1050_v63 = vadd.f32 %v1049_v61, %v1048_v59 }
 0x8bd   :  { %v993_v1 = vadd.f32 %v992_v62, %v991_v60  ;;  %v1051_v5 = vrot.slane %v1050_v63, 1  ;;  %v1096_v62 = vstv %s1095_s27  ;;  %s1558_s27 = scalar_select %p1557_p6, 1, 0 }
 0x8be   :  { %vm1097_vm2 = vcmp.eq.s32.totalorder %v1096_v62, 1 }
 0x8bf   :  { %v994_v2 = vadd.f32 %v993_v1, %v2747_v41  ;;  %v1052_v3 = vadd.f32 %v1051_v5, %v1050_v63  ;;  %v1104_v63 = vstv %s1103_s28  ;;  %v1089_v1 = vstv %s1088_s26  ;;  %s3020_s26 = sld [smem:[#allocation4 + $0x1d]] }
 0x8c0   :  { %v1112_v5 = vstv %s1111_s29  ;;  %vm1105_vm3 = vcmp.eq.s32.totalorder %v1104_v63, 1  ;;  %vm2932_vm5 = vcmp.eq.s32.totalorder %v1089_v1, 1  ;;  %s1565_s28 = scalar_select %p1564_p7, 1, 0 }
 0x8c1   :  { %2418 = vtanh.f32 %v994_v2  ;;  %v1053_v4 = vadd.f32 %v1052_v3, %v2745_v40  ;;  %v2123_v31 = vmul.f32 -1.442695, %v994_v2  ;;  %vm1113_vm7 = vcmp.eq.s32.totalorder %v1112_v5, 1  ;;  %s1573_s29 = scalar_select %p1572_p8, 1, 0 }
 0x8c3   :  { %v2415_v7 = vpop.eup %2414  ;;  %2420 = vtanh.f32 %v1053_v4  ;;  %v2125_v32 = vmul.f32 -1.442695, %v1053_v4 }
 0x8c4   :  { %v2417_v6 = vpop.eup %2416  ;;  %v975_v8 = vadd.f32 1.0, %v2415_v7 }
 0x8c5   :  { %v1029_v10 = vadd.f32 1.0, %v2417_v6  ;;  %s2065_s10 = scalar_lea.vmem [#allocation2], %s3020_s26 }
 0x8c6   :  { %2422 = vrcp.f32 %v975_v8 }
 0x8c7   :  { %2424 = vrcp.f32 %v1029_v10 }
 0x8c8   :  { %2426 = vpow2.f32 %v2123_v31 }
 0x8c9   :  { %2428 = vpow2.f32 %v2125_v32 }
 0x8ce   :  { %v2419_v9 = vpop.eup %2418 }
 0x8cf   :  { %1003 = vrot.lane.b32.xlu0 %v2419_v9, %s2569_s5 }
 0x8d0   :  { %v2421_v12 = vpop.eup %2420 }
 0x8d1   :  { %1062 = vrot.lane.b32.xlu1 %v2421_v12, %s2569_s5 }
 0x8d3   :  { %v2423_v13 = vpop.eup %2422 }
 0x8d4   :  { %v2425_v11 = vpop.eup %2424  ;;  %v979_v14 = vmul.f32 %v2423_v13, %v894_v35 }
 0x8d5   :  { %v1032_v15 = vmul.f32 %v2425_v11, %v894_v35  ;;  %v2427_v33 = vpop.eup %2426 }
 0x8d6   :  { %v980_v16 = vsel %vm274_vm10, %v979_v14, 0.0  ;;  %v2429_v34 = vpop.eup %2428  ;;  %v998_v35 = vadd.f32 1.0, %v2427_v33 }
 0x8d7   :  { %v981_v17 = vrot.slane %v980_v16, 4  ;;  %v1034_v18 = vrot.slane %v1032_v15, 2  ;;  %v1057_v43 = vadd.f32 1.0, %v2429_v34 }
 0x8d8   :  { %2430 = vrcp.f32 %v998_v35 }
 0x8d9   :  { %v982_v19 = vadd.f32 %v981_v17, %v980_v16  ;;  %v1036_v20 = vsel %vm274_vm10, %v1034_v18, 0.0  ;;  %2432 = vrcp.f32 %v1057_v43 }
 0x8da   :  { %v1037_v21 = vrot.slane %v1036_v20, 4 }
 0x8db   :  { %v983_v22 = vrot.slane %v982_v19, 2 }
 0x8dc   :  { %v1038_v23 = vadd.f32 %v1037_v21, %v1036_v20 }
 0x8dd   :  { %v984_v24 = vadd.f32 %v983_v22, %v982_v19  ;;  %v1204_v19 = vsub.s32 4, %v2740_v37 }
 0x8de   :  { %v1039_v25 = vrot.slane %v1038_v23, 2 }
 0x8df   :  { %v985_v26 = vrot.slane %v984_v24, 1  ;;  %v1205_v20 = vrot.slane %v2747_v41, %v1204_v19  ;;  %v1259_v21 = vrot.slane %v2745_v40, %v1204_v19 }
 0x8e0   :  { %v1040_v27 = vadd.f32 %v1039_v25, %v1038_v23 }
 0x8e1   :  { %v986_v28 = vadd.f32 %v985_v26, %v984_v24 }
 0x8e2   :  { %v1041_v29 = vrot.slane %v1040_v27, 1 }
 0x8e3   :  { %1008 = vrot.lane.b32.xlu0 %v986_v28, %s2570_s20 }
 0x8e4   :  { %v1042_v30 = vadd.f32 %v1041_v29, %v1040_v27 }
 0x8e5   :  { %v2431_v45 = vpop.eup %2430 }
 0x8e6   :  { %1067 = vrot.lane.b32.xlu1 %v1042_v30, %s2570_s20  ;;  %v2433_v49 = vpop.eup %2432 }
 0x941   :  { %v1004_v44 = vpop.permute.xlu0 %1003 }
 0x942   :  { %v1006_v46 = vmul.f32 %v2431_v45, %v1004_v44 }
 0x943   :  { %v1063_v47 = vpop.permute.xlu1 %1062 }
 0x944   :  { %v1065_v51 = vmul.f32 %v2433_v49, %v1063_v47 }
 0x955   :  { %v1009_v48 = vpop.permute.xlu0 %1008 }
 0x956   :  { %v1011_v50 = vadd.f32 %v1009_v48, %v1006_v46 }
 0x958   :  { %2434 = vtanh.f32 %v1011_v50  ;;  %v1068_v52 = vpop.permute.xlu1 %1067 }
 0x959   :  { %v1070_v53 = vadd.f32 %v1068_v52, %v1065_v51 }
 0x95b   :  { %2436 = vtanh.f32 %v1070_v53 }
 0x965   :  { %v2435_v54 = vpop.eup %2434 }
 0x966   :  { %1014 = vrot.lane.b32.xlu0 %v2435_v54, %s2570_s20 }
 0x968   :  { %v2437_v55 = vpop.eup %2436 }
 0x969   :  { %1073 = vrot.lane.b32.xlu1 %v2437_v55, %s2570_s20 }
 0x9d8   :  { %v1015_v56 = vpop.permute.xlu0 %1014 }
 0x9d9   :  { %v1017_v57 = vmul.f32 %v2431_v45, %v1015_v56 }
 0x9db   :  { %v1018_v58 = vsel %vm188_vm9, %v1011_v50, %v1017_v57  ;;  %v1074_v59 = vpop.permute.xlu1 %1073 }
 0x9dc   :  { %v1076_v60 = vmul.f32 %v2433_v49, %v1074_v59  ;;  %1020 = vst.msk [vmem:[#allocation2] sm:$0x8] %vm1019_vm0, %v1018_v58 }
 0x9de   :  { %v1077_v61 = vsel %vm188_vm9, %v1070_v53, %v1076_v60 }
 0x9df   :  { %1078 = vst.msk [vmem:[#allocation2 + $0x8] sm:$0x8] %vm1019_vm0, %v1077_v61 }
 0x9e6   :  { %v1086_v3 = vld [vmem:[%s1085_s0] sm:$0x1]  ;;  %v2132_v7 = vld [vmem:[%s2051_s8 + $0x8] sm:$0x1]  ;;  %s1581_s0 = scalar_select %p1580_p9, 1, 0 }
 0x9e7   :  { %v1093_v4 = vld [vmem:[%s1092_s7] sm:$0x1]  ;;  %v1106_v8 = vsel %vm1105_vm3, %v2132_v7, 0.0  ;;  %v2133_v10 = vld [vmem:[%s2053_s9 + $0x8] sm:$0x1]  ;;  %v1091_v11 = vsel %vm2932_vm5, %v1086_v3, 0.0 }
 0x9e8   :  { %v1098_v6 = vsel %vm1097_vm2, %v1093_v4, 0.0  ;;  %v1114_v9 = vsel %vm1113_vm7, %v2133_v10, 0.0  ;;  %v1119_v13 = vrot.slane %v1106_v8, 6  ;;  %s1555_s7 = scalar_lea.vmem [#allocation2], %s3016_s23  ;;  %s1562_s8 = scalar_lea.vmem [#allocation2], %s3018_s24  ;;  %vm1724_vm7 = vcmask 522246  }
 0x9e9   :  { %v1116_v12 = vrot.slane %v1098_v6, 7  ;;  %v1122_v14 = vrot.slane %v1114_v9, 5  ;;  %s2063_s9 = scalar_lea.vmem [#allocation2], %s2156_s25 }
 0x9eb   :  { %v1124_v15 = vsel %vm179_vm4, %v1091_v11, %v1116_v12 }
 0x9ec   :  { %v1125_v16 = vsel %vm181_vm6, %v1124_v15, %v1119_v13 }
 0x9ed   :  { %v1126_v17 = vsel %vm183_vm8, %v1125_v16, %v1122_v14 }
 0x9ee   :  { %1128 = vrot.lane.b32.xlu0 %v1126_v17, %s2568_s2 }
 0xa60   :  { %v1129_v18 = vpop.permute.xlu0 %1128 }
 0xa61   :  { %2300 = vmatmul.mubr.msk.f32.vlgmr.msra.gmra.mxu0 %vm188_vm9, %v1129_v18 }
 0xa62   :  { %2314 = vmatpush3.msra.mxu0 %v2882_v36  ;;  %2321 = vmatprep.mubr.msk.f32.mxu0 %vm2567_vm1, %v2566_v0 }
 0xa63   :  { %2315 = vmatprep.subr.mxu0 %v2566_v0 }
 0xa64   :  { %2316 = vmatpush3.msra.mxu0 %v2891_v38 }
 0xa65   :  { %2317 = vmatprep.subr.mxu0 %v2566_v0 }
 0xa66   :  { %2318 = vmatpush3.msra.mxu0 %v2898_v39 }
 0xa67   :  { %2319 = vmatprep.subr.mxu0 %v2566_v0 }
 0xa68   :  { %2320 = vmatpush3.msra.mxu0 %v2905_v42 }
 0xb21   :  { %v1198_v22 = vpop.f32.mrf.mxu0 }
 0xb22   :  { %v1206_v23 = vadd.f32 %v1205_v20, %v1198_v22  ;;  %v1222_v24 = vsel %vm181_vm6, %v1198_v22, 0.0  ;;  %v1260_v25 = vadd.f32 %v1259_v21, %v1198_v22  ;;  %v1279_v26 = vrot.slane %v1198_v22, 2 }
 0xb23   :  { %v1223_v27 = vrot.slane %v1222_v24, 4  ;;  %v2301_v28 = vpop.f32.mrf.mxu0 }
 0xb24   :  { %v2135_v29 = vmul.f32 -1.442695, %v1206_v23  ;;  %v2137_v30 = vmul.f32 -1.442695, %v1260_v25  ;;  %v1281_v31 = vsel %vm181_vm6, %v1279_v26, 0.0 }
 0xb25   :  { %v1224_v32 = vadd.f32 %v1223_v27, %v1222_v24  ;;  %v1282_v33 = vrot.slane %v1281_v31, 4 }
 0xb26   :  { %2438 = vpow2.f32 %v2135_v29 }
 0xb27   :  { %v1225_v34 = vrot.slane %v1224_v32, 2  ;;  %2440 = vpow2.f32 %v2137_v30  ;;  %v1283_v35 = vadd.f32 %v1282_v33, %v1281_v31 }
 0xb29   :  { %v1226_v43 = vadd.f32 %v1225_v34, %v1224_v32  ;;  %v1284_v44 = vrot.slane %v1283_v35, 2 }
 0xb2b   :  { %v1227_v45 = vrot.slane %v1226_v43, 1  ;;  %v1285_v46 = vadd.f32 %v1284_v44, %v1283_v35 }
 0xb2d   :  { %v1228_v47 = vadd.f32 %v1227_v45, %v1226_v43  ;;  %v1286_v48 = vrot.slane %v1285_v46, 1  ;;  %v1331_v45 = vstv %s1330_s18  ;;  %s1793_s18 = scalar_select %p1792_p10, 1, 0 }
 0xb2e   :  { %vm1332_vm12 = vcmp.eq.s32.totalorder %v1331_v45, 1 }
 0xb2f   :  { %v1229_v49 = vadd.f32 %v1228_v47, %v2747_v41  ;;  %v1287_v50 = vadd.f32 %v1286_v48, %v1285_v46  ;;  %v1339_v46 = vstv %s1338_s19  ;;  %v1324_v47 = vstv %s1323_s1  ;;  %s3057_s1 = sld [smem:[#allocation4 + $0x1f]] }
 0xb30   :  { %v1347_v48 = vstv %s1346_s12  ;;  %vm1340_vm13 = vcmp.eq.s32.totalorder %v1339_v46, 1  ;;  %vm2978_vm14 = vcmp.eq.s32.totalorder %v1324_v47, 1  ;;  %s1800_s19 = scalar_select %p1799_p11, 1, 0 }
 0xb31   :  { %2442 = vtanh.f32 %v1229_v49  ;;  %v1288_v51 = vadd.f32 %v1287_v50, %v2745_v40  ;;  %v2136_v14 = vmul.f32 -1.442695, %v1229_v49  ;;  %vm1348_vm15 = vcmp.eq.s32.totalorder %v1347_v48, 1  ;;  %s1808_s12 = scalar_select %p1807_p12, 1, 0 }
 0xb33   :  { %v2439_v52 = vpop.eup %2438  ;;  %2444 = vtanh.f32 %v1288_v51  ;;  %v2138_v15 = vmul.f32 -1.442695, %v1288_v51 }
 0xb34   :  { %v2441_v53 = vpop.eup %2440  ;;  %v1210_v54 = vadd.f32 1.0, %v2439_v52 }
 0xb35   :  { %v1264_v55 = vadd.f32 1.0, %v2441_v53  ;;  %s2071_s3 = scalar_lea.vmem [#allocation2], %s3057_s1 }
 0xb36   :  { %2446 = vrcp.f32 %v1210_v54 }
 0xb37   :  { %2448 = vrcp.f32 %v1264_v55 }
 0xb38   :  { %2450 = vpow2.f32 %v2136_v14 }
 0xb39   :  { %2452 = vpow2.f32 %v2138_v15 }
 0xb3e   :  { %v2443_v56 = vpop.eup %2442 }
 0xb3f   :  { %1238 = vrot.lane.b32.xlu1 %v2443_v56, %s2569_s5 }
 0xb40   :  { %v2445_v57 = vpop.eup %2444 }
 0xb41   :  { %1297 = vrot.lane.b32.xlu0 %v2445_v57, %s2569_s5 }
 0xb43   :  { %v2447_v58 = vpop.eup %2446 }
 0xb44   :  { %v2449_v59 = vpop.eup %2448  ;;  %v1214_v60 = vmul.f32 %v2447_v58, %v1129_v18 }
 0xb45   :  { %v1267_v61 = vmul.f32 %v2449_v59, %v1129_v18  ;;  %v2451_v16 = vpop.eup %2450 }
 0xb46   :  { %v1215_v62 = vsel %vm274_vm10, %v1214_v60, 0.0  ;;  %v2453_v17 = vpop.eup %2452  ;;  %v1233_v18 = vadd.f32 1.0, %v2451_v16 }
 0xb47   :  { %v1216_v63 = vrot.slane %v1215_v62, 4  ;;  %v1269_v1 = vrot.slane %v1267_v61, 2  ;;  %v1292_v19 = vadd.f32 1.0, %v2453_v17 }
 0xb48   :  { %2454 = vrcp.f32 %v1233_v18 }
 0xb49   :  { %v1217_v5 = vadd.f32 %v1216_v63, %v1215_v62  ;;  %v1271_v2 = vsel %vm274_vm10, %v1269_v1, 0.0  ;;  %2456 = vrcp.f32 %v1292_v19 }
 0xb4a   :  { %v1272_v3 = vrot.slane %v1271_v2, 4 }
 0xb4b   :  { %v1218_v4 = vrot.slane %v1217_v5, 2 }
 0xb4c   :  { %v1273_v7 = vadd.f32 %v1272_v3, %v1271_v2 }
 0xb4d   :  { %v1219_v6 = vadd.f32 %v1218_v4, %v1217_v5  ;;  %v1439_v5 = vsub.s32 5, %v2740_v37 }
 0xb4e   :  { %v1274_v8 = vrot.slane %v1273_v7, 2 }
 0xb4f   :  { %v1220_v10 = vrot.slane %v1219_v6, 1  ;;  %v1440_v2 = vrot.slane %v2747_v41, %v1439_v5 }
 0xb50   :  { %v1275_v9 = vadd.f32 %v1274_v8, %v1273_v7 }
 0xb51   :  { %v1221_v12 = vadd.f32 %v1220_v10, %v1219_v6 }
 0xb52   :  { %v1276_v13 = vrot.slane %v1275_v9, 1 }
 0xb53   :  { %1243 = vrot.lane.b32.xlu1 %v1221_v12, %s2570_s20 }
 0xb54   :  { %v1277_v11 = vadd.f32 %v1276_v13, %v1275_v9 }
 0xb55   :  { %v2455_v21 = vpop.eup %2454 }
 0xb56   :  { %1302 = vrot.lane.b32.xlu0 %v1277_v11, %s2570_s20  ;;  %v2457_v25 = vpop.eup %2456 }
 0xbb1   :  { %v1239_v20 = vpop.permute.xlu1 %1238 }
 0xbb2   :  { %v1241_v22 = vmul.f32 %v2455_v21, %v1239_v20 }
 0xbb3   :  { %v1298_v23 = vpop.permute.xlu0 %1297 }
 0xbb4   :  { %v1300_v27 = vmul.f32 %v2457_v25, %v1298_v23 }
 0xbc5   :  { %v1244_v24 = vpop.permute.xlu1 %1243 }
 0xbc6   :  { %v1246_v26 = vadd.f32 %v1244_v24, %v1241_v22 }
 0xbc8   :  { %2458 = vtanh.f32 %v1246_v26  ;;  %v1303_v28 = vpop.permute.xlu0 %1302 }
 0xbc9   :  { %v1305_v29 = vadd.f32 %v1303_v28, %v1300_v27 }
 0xbcb   :  { %2460 = vtanh.f32 %v1305_v29 }
 0xbd5   :  { %v2459_v30 = vpop.eup %2458 }
 0xbd6   :  { %1249 = vrot.lane.b32.xlu1 %v2459_v30, %s2570_s20 }
 0xbd8   :  { %v2461_v31 = vpop.eup %2460 }
 0xbd9   :  { %1308 = vrot.lane.b32.xlu0 %v2461_v31, %s2570_s20 }
 0xc48   :  { %v1250_v32 = vpop.permute.xlu1 %1249 }
 0xc49   :  { %v1252_v33 = vmul.f32 %v2455_v21, %v1250_v32 }
 0xc4b   :  { %v1253_v34 = vsel %vm188_vm9, %v1246_v26, %v1252_v33  ;;  %v1309_v35 = vpop.permute.xlu0 %1308 }
 0xc4c   :  { %v1311_v43 = vmul.f32 %v2457_v25, %v1309_v35  ;;  %1255 = vst.msk [vmem:[#allocation2] sm:$0x10] %vm1254_vm11, %v1253_v34 }
 0xc4e   :  { %v1312_v44 = vsel %vm188_vm9, %v1305_v29, %v1311_v43 }
 0xc4f   :  { %1313 = vst.msk [vmem:[#allocation2 + $0x8] sm:$0x10] %vm1254_vm11, %v1312_v44 }
 0xc56   :  { %v1321_v50 = vld [vmem:[%s1320_s15] sm:$0x1]  ;;  %v2145_v52 = vld [vmem:[%s2057_s22 + $0x8] sm:$0x1]  ;;  %s1816_s15 = scalar_select %p1815_p13, 1, 0 }
 0xc57   :  { %v1328_v51 = vld [vmem:[%s1327_s21] sm:$0x1]  ;;  %v1341_v54 = vsel %vm1340_vm13, %v2145_v52, 0.0  ;;  %v2146_v55 = vld [vmem:[%s2059_s4 + $0x8] sm:$0x1]  ;;  %v1326_v59 = vsel %vm2978_vm14, %v1321_v50, 0.0 }
 0xc58   :  { %v1333_v53 = vsel %vm1332_vm12, %v1328_v51, 0.0  ;;  %v1349_v56 = vsel %vm1348_vm15, %v2146_v55, 0.0  ;;  %v1354_v58 = vrot.slane %v1341_v54, 6  ;;  %s1790_s21 = scalar_lea.vmem [#allocation2], %s3053_s16  ;;  %s1797_s22 = scalar_lea.vmem [#allocation2], %s3055_s17 }
 0xc59   :  { %v1351_v57 = vrot.slane %v1333_v53, 7  ;;  %v1357_v60 = vrot.slane %v1349_v56, 5  ;;  %s2069_s4 = scalar_lea.vmem [#allocation2], %s2169_s11 }
 0xc5b   :  { %v1359_v61 = vsel %vm179_vm4, %v1326_v59, %v1351_v57 }
 0xc5c   :  { %v1360_v62 = vsel %vm181_vm6, %v1359_v61, %v1354_v58 }
 0xc5d   :  { %v1361_v63 = vsel %vm183_vm8, %v1360_v62, %v1357_v60 }
 0xc5e   :  { %1363 = vrot.lane.b32.xlu1 %v1361_v63, %s2568_s2 }
 0xcd0   :  { %v1364_v1 = vpop.permute.xlu1 %1363 }
 0xcd1   :  { %2311 = vmatmul.mubr.msk.f32.vlgmr.msra.gmra.mxu1 %vm188_vm9, %v1364_v1 }
 0xcd2   :  { %2325 = vmatpush3.msra.mxu1 %v2882_v36  ;;  %2332 = vmatprep.mubr.msk.f32.mxu1 %vm2567_vm1, %v2566_v0  ;;  %v1494_v36 = vrot.slane %v2745_v40, %v1439_v5  ;;  %vm1489_vm1 = vcmask 521221  }
 0xcd3   :  { %2326 = vmatprep.subr.mxu1 %v2566_v0 }
 0xcd4   :  { %2327 = vmatpush3.msra.mxu1 %v2891_v38 }
 0xcd5   :  { %2328 = vmatprep.subr.mxu1 %v2566_v0 }
 0xcd6   :  { %2329 = vmatpush3.msra.mxu1 %v2898_v39 }
 0xcd7   :  { %2330 = vmatprep.subr.mxu1 %v2566_v0 }
 0xcd8   :  { %2331 = vmatpush3.msra.mxu1 %v2905_v42 }
 0xd91   :  { %v1433_v3 = vpop.f32.mrf.mxu1 }
 0xd92   :  { %v1441_v4 = vadd.f32 %v1440_v2, %v1433_v3  ;;  %v1457_v7 = vsel %vm181_vm6, %v1433_v3, 0.0  ;;  %v1495_v6 = vadd.f32 %v1494_v36, %v1433_v3  ;;  %v1514_v38 = vrot.slane %v1433_v3, 2 }
 0xd93   :  { %v1458_v8 = vrot.slane %v1457_v7, 4  ;;  %v2312_v10 = vpop.f32.mrf.mxu1 }
 0xd94   :  { %v2148_v9 = vmul.f32 -1.442695, %v1441_v4  ;;  %v2150_v39 = vmul.f32 -1.442695, %v1495_v6  ;;  %v1516_v0 = vsel %vm181_vm6, %v1514_v38, 0.0 }
 0xd95   :  { %v1459_v12 = vadd.f32 %v1458_v8, %v1457_v7  ;;  %v1517_v42 = vrot.slane %v1516_v0, 4 }
 0xd96   :  { %2462 = vpow2.f32 %v2148_v9 }
 0xd97   :  { %v1460_v13 = vrot.slane %v1459_v12, 2  ;;  %2464 = vpow2.f32 %v2150_v39  ;;  %v1518_v11 = vadd.f32 %v1517_v42, %v1516_v0  ;;  %v1566_v42 = vstv %s1565_s28 }
 0xd98   :  { %vm1567_vm0 = vcmp.eq.s32.totalorder %v1566_v42, 1 }
 0xd99   :  { %v1461_v14 = vadd.f32 %v1460_v13, %v1459_v12  ;;  %v1519_v15 = vrot.slane %v1518_v11, 2  ;;  %v1574_v13 = vstv %s1573_s29 }
 0xd9a   :  { %vm1575_vm2 = vcmp.eq.s32.totalorder %v1574_v13, 1 }
 0xd9b   :  { %v1462_v16 = vrot.slane %v1461_v14, 1  ;;  %v1520_v17 = vadd.f32 %v1519_v15, %v1518_v11  ;;  %v1559_v11 = vstv %s1558_s27 }
 0xd9c   :  { %vm3024_vm3 = vcmp.eq.s32.totalorder %v1559_v11, 1 }
 0xd9d   :  { %v1463_v18 = vadd.f32 %v1462_v16, %v1461_v14  ;;  %v1521_v19 = vrot.slane %v1520_v17, 1  ;;  %v1582_v14 = vstv %s1581_s0 }
 0xd9e   :  { %vm1583_vm5 = vcmp.eq.s32.totalorder %v1582_v14, 1 }
 0xd9f   :  { %v1464_v20 = vadd.f32 %v1463_v18, %v2747_v41  ;;  %v1522_v21 = vadd.f32 %v1521_v19, %v1520_v17 }
 0xda1   :  { %2466 = vtanh.f32 %v1464_v20  ;;  %v1523_v22 = vadd.f32 %v1522_v21, %v2745_v40  ;;  %v2149_v55 = vmul.f32 -1.442695, %v1464_v20 }
 0xda3   :  { %v2463_v23 = vpop.eup %2462  ;;  %2468 = vtanh.f32 %v1523_v22  ;;  %v2151_v56 = vmul.f32 -1.442695, %v1523_v22 }
 0xda4   :  { %v2465_v24 = vpop.eup %2464  ;;  %v1445_v25 = vadd.f32 1.0, %v2463_v23 }
 0xda5   :  { %v1499_v26 = vadd.f32 1.0, %v2465_v24 }
 0xda6   :  { %2470 = vrcp.f32 %v1445_v25 }
 0xda7   :  { %2472 = vrcp.f32 %v1499_v26 }
 0xda8   :  { %2474 = vpow2.f32 %v2149_v55 }
 0xda9   :  { %2476 = vpow2.f32 %v2151_v56 }
 0xdae   :  { %v2467_v27 = vpop.eup %2466 }
 0xdaf   :  { %1473 = vrot.lane.b32.xlu0 %v2467_v27, %s2569_s5 }
 0xdb0   :  { %v2469_v28 = vpop.eup %2468 }
 0xdb1   :  { %1532 = vrot.lane.b32.xlu1 %v2469_v28, %s2569_s5 }
 0xdb3   :  { %v2471_v29 = vpop.eup %2470 }
 0xdb4   :  { %v2473_v30 = vpop.eup %2472  ;;  %v1449_v31 = vmul.f32 %v2471_v29, %v1364_v1 }
 0xdb5   :  { %v1502_v32 = vmul.f32 %v2473_v30, %v1364_v1  ;;  %v2475_v57 = vpop.eup %2474 }
 0xdb6   :  { %v1450_v33 = vsel %vm274_vm10, %v1449_v31, 0.0  ;;  %v2477_v58 = vpop.eup %2476  ;;  %v1468_v59 = vadd.f32 1.0, %v2475_v57  ;;  %v1674_v31 = vsub.s32 6, %v2740_v37 }
 0xdb7   :  { %v1451_v34 = vrot.slane %v1450_v33, 4  ;;  %v1504_v35 = vrot.slane %v1502_v32, 2  ;;  %v1527_v60 = vadd.f32 1.0, %v2477_v58 }
 0xdb8   :  { %2478 = vrcp.f32 %v1468_v59  ;;  %v1675_v32 = vrot.slane %v2747_v41, %v1674_v31 }
 0xdb9   :  { %v1452_v43 = vadd.f32 %v1451_v34, %v1450_v33  ;;  %v1506_v44 = vsel %vm274_vm10, %v1504_v35, 0.0  ;;  %2480 = vrcp.f32 %v1527_v60  ;;  %v1729_v33 = vrot.slane %v2745_v40, %v1674_v31 }
 0xdba   :  { %v1507_v45 = vrot.slane %v1506_v44, 4 }
 0xdbb   :  { %v1453_v46 = vrot.slane %v1452_v43, 2 }
 0xdbc   :  { %v1508_v47 = vadd.f32 %v1507_v45, %v1506_v44 }
 0xdbd   :  { %v1454_v48 = vadd.f32 %v1453_v46, %v1452_v43 }
 0xdbe   :  { %v1509_v49 = vrot.slane %v1508_v47, 2 }
 0xdbf   :  { %v1455_v50 = vrot.slane %v1454_v48, 1 }
 0xdc0   :  { %v1510_v51 = vadd.f32 %v1509_v49, %v1508_v47 }
 0xdc1   :  { %v1456_v52 = vadd.f32 %v1455_v50, %v1454_v48 }
 0xdc2   :  { %v1511_v53 = vrot.slane %v1510_v51, 1 }
 0xdc3   :  { %1478 = vrot.lane.b32.xlu0 %v1456_v52, %s2570_s20 }
 0xdc4   :  { %v1512_v54 = vadd.f32 %v1511_v53, %v1510_v51 }
 0xdc5   :  { %v2479_v62 = vpop.eup %2478 }
 0xdc6   :  { %1537 = vrot.lane.b32.xlu1 %v1512_v54, %s2570_s20  ;;  %v2481_v2 = vpop.eup %2480 }
 0xe21   :  { %v1474_v61 = vpop.permute.xlu0 %1473 }
 0xe22   :  { %v1476_v63 = vmul.f32 %v2479_v62, %v1474_v61 }
 0xe23   :  { %v1533_v1 = vpop.permute.xlu1 %1532 }
 0xe24   :  { %v1535_v3 = vmul.f32 %v2481_v2, %v1533_v1 }
 0xe35   :  { %v1479_v5 = vpop.permute.xlu0 %1478 }
 0xe36   :  { %v1481_v36 = vadd.f32 %v1479_v5, %v1476_v63 }
 0xe38   :  { %2482 = vtanh.f32 %v1481_v36  ;;  %v1538_v4 = vpop.permute.xlu1 %1537 }
 0xe39   :  { %v1540_v7 = vadd.f32 %v1538_v4, %v1535_v3 }
 0xe3b   :  { %2484 = vtanh.f32 %v1540_v7 }
 0xe45   :  { %v2483_v6 = vpop.eup %2482 }
 0xe46   :  { %1484 = vrot.lane.b32.xlu0 %v2483_v6, %s2570_s20 }
 0xe48   :  { %v2485_v38 = vpop.eup %2484 }
 0xe49   :  { %1543 = vrot.lane.b32.xlu1 %v2485_v38, %s2570_s20 }
 0xeb8   :  { %v1485_v8 = vpop.permute.xlu0 %1484 }
 0xeb9   :  { %v1487_v10 = vmul.f32 %v2479_v62, %v1485_v8 }
 0xebb   :  { %v1488_v9 = vsel %vm188_vm9, %v1481_v36, %v1487_v10  ;;  %v1544_v39 = vpop.permute.xlu1 %1543 }
 0xebc   :  { %v1546_v0 = vmul.f32 %v2481_v2, %v1544_v39  ;;  %1490 = vst.msk [vmem:[#allocation2] sm:$0x20] %vm1489_vm1, %v1488_v9 }
 0xebe   :  { %v1547_v12 = vsel %vm188_vm9, %v1540_v7, %v1546_v0 }
 0xebf   :  { %1548 = vst.msk [vmem:[#allocation2 + $0x8] sm:$0x20] %vm1489_vm1, %v1547_v12 }
 0xec6   :  { %v1556_v16 = vld [vmem:[%s1555_s7] sm:$0x1]  ;;  %v2158_v18 = vld [vmem:[%s2063_s9 + $0x8] sm:$0x1] }
 0xec7   :  { %v1563_v17 = vld [vmem:[%s1562_s8] sm:$0x1]  ;;  %v1576_v20 = vsel %vm1575_vm2, %v2158_v18, 0.0  ;;  %v2159_v21 = vld [vmem:[%s2065_s10 + $0x8] sm:$0x1]  ;;  %v1561_v25 = vsel %vm3024_vm3, %v1556_v16, 0.0 }
 0xec8   :  { %v1568_v19 = vsel %vm1567_vm0, %v1563_v17, 0.0  ;;  %v1584_v22 = vsel %vm1583_vm5, %v2159_v21, 0.0  ;;  %v1589_v24 = vrot.slane %v1576_v20, 6 }
 0xec9   :  { %v1586_v23 = vrot.slane %v1568_v19, 7  ;;  %v1592_v26 = vrot.slane %v1584_v22, 5 }
 0xecb   :  { %v1594_v27 = vsel %vm179_vm4, %v1561_v25, %v1586_v23 }
 0xecc   :  { %v1595_v28 = vsel %vm181_vm6, %v1594_v27, %v1589_v24 }
 0xecd   :  { %v1596_v29 = vsel %vm183_vm8, %v1595_v28, %v1592_v26 }
 0xece   :  { %1598 = vrot.lane.b32.xlu0 %v1596_v29, %s2568_s2 }
 0xf40   :  { %v1599_v30 = vpop.permute.xlu0 %1598 }
 0xf41   :  { %2322 = vmatmul.mubr.msk.f32.vlgmr.msra.gmra.mxu0 %vm188_vm9, %v1599_v30 }
0x1001   :  { %v1668_v34 = vpop.f32.mrf.mxu0 }
0x1002   :  { %v1676_v35 = vadd.f32 %v1675_v32, %v1668_v34  ;;  %v1692_v43 = vsel %vm181_vm6, %v1668_v34, 0.0  ;;  %v1730_v44 = vadd.f32 %v1729_v33, %v1668_v34  ;;  %v1749_v45 = vrot.slane %v1668_v34, 2 }
0x1003   :  { %v1693_v46 = vrot.slane %v1692_v43, 4  ;;  %v2323_v47 = vpop.f32.mrf.mxu0 }
0x1004   :  { %v2161_v48 = vmul.f32 -1.442695, %v1676_v35  ;;  %v2163_v49 = vmul.f32 -1.442695, %v1730_v44  ;;  %v1751_v50 = vsel %vm181_vm6, %v1749_v45, 0.0 }
0x1005   :  { %v1694_v51 = vadd.f32 %v1693_v46, %v1692_v43  ;;  %v1752_v52 = vrot.slane %v1751_v50, 4 }
0x1006   :  { %2486 = vpow2.f32 %v2161_v48 }
0x1007   :  { %v1695_v53 = vrot.slane %v1694_v51, 2  ;;  %2488 = vpow2.f32 %v2163_v49  ;;  %v1753_v54 = vadd.f32 %v1752_v52, %v1751_v50  ;;  %v1801_v52 = vstv %s1800_s19 }
0x1008   :  { %vm1802_vm11 = vcmp.eq.s32.totalorder %v1801_v52, 1 }
0x1009   :  { %v1696_v55 = vadd.f32 %v1695_v53, %v1694_v51  ;;  %v1754_v56 = vrot.slane %v1753_v54, 2  ;;  %v1809_v53 = vstv %s1808_s12 }
0x100a   :  { %vm1810_vm12 = vcmp.eq.s32.totalorder %v1809_v53, 1 }
0x100b   :  { %v1697_v57 = vrot.slane %v1696_v55, 1  ;;  %v1755_v58 = vadd.f32 %v1754_v56, %v1753_v54  ;;  %v1794_v54 = vstv %s1793_s18 }
0x100c   :  { %vm3061_vm13 = vcmp.eq.s32.totalorder %v1794_v54, 1 }
0x100d   :  { %v1698_v59 = vadd.f32 %v1697_v57, %v1696_v55  ;;  %v1756_v60 = vrot.slane %v1755_v58, 1  ;;  %v1817_v55 = vstv %s1816_s15 }
0x100e   :  { %vm1818_vm14 = vcmp.eq.s32.totalorder %v1817_v55, 1 }
0x100f   :  { %v1699_v61 = vadd.f32 %v1698_v59, %v2747_v41  ;;  %v1757_v62 = vadd.f32 %v1756_v60, %v1755_v58 }
0x1011   :  { %2490 = vtanh.f32 %v1699_v61  ;;  %v1758_v63 = vadd.f32 %v1757_v62, %v2745_v40  ;;  %v2162_v21 = vmul.f32 -1.442695, %v1699_v61 }
0x1013   :  { %v2487_v1 = vpop.eup %2486  ;;  %2492 = vtanh.f32 %v1758_v63  ;;  %v2164_v22 = vmul.f32 -1.442695, %v1758_v63 }
0x1014   :  { %v2489_v5 = vpop.eup %2488  ;;  %v1680_v2 = vadd.f32 1.0, %v2487_v1 }
0x1015   :  { %v1734_v36 = vadd.f32 1.0, %v2489_v5 }
0x1016   :  { %2494 = vrcp.f32 %v1680_v2 }
0x1017   :  { %2496 = vrcp.f32 %v1734_v36 }
0x1018   :  { %2498 = vpow2.f32 %v2162_v21 }
0x1019   :  { %2500 = vpow2.f32 %v2164_v22 }
0x101e   :  { %v2491_v3 = vpop.eup %2490 }
0x101f   :  { %1708 = vrot.lane.b32.xlu1 %v2491_v3, %s2569_s5 }
0x1020   :  { %v2493_v4 = vpop.eup %2492 }
0x1021   :  { %1767 = vrot.lane.b32.xlu0 %v2493_v4, %s2569_s5 }
0x1023   :  { %v2495_v7 = vpop.eup %2494 }
0x1024   :  { %v2497_v6 = vpop.eup %2496  ;;  %v1684_v38 = vmul.f32 %v2495_v7, %v1599_v30 }
0x1025   :  { %v1737_v8 = vmul.f32 %v2497_v6, %v1599_v30  ;;  %v2499_v23 = vpop.eup %2498 }
0x1026   :  { %v1685_v10 = vsel %vm274_vm10, %v1684_v38, 0.0  ;;  %v2501_v24 = vpop.eup %2500  ;;  %v1703_v25 = vadd.f32 1.0, %v2499_v23  ;;  %v1909_v38 = vsub.s32 7, %v2740_v37 }
0x1027   :  { %v1686_v9 = vrot.slane %v1685_v10, 4  ;;  %v1739_v39 = vrot.slane %v1737_v8, 2  ;;  %v1762_v26 = vadd.f32 1.0, %v2501_v24 }
0x1028   :  { %2502 = vrcp.f32 %v1703_v25  ;;  %v1910_v8 = vrot.slane %v2747_v41, %v1909_v38 }
0x1029   :  { %v1687_v0 = vadd.f32 %v1686_v9, %v1685_v10  ;;  %v1741_v12 = vsel %vm274_vm10, %v1739_v39, 0.0  ;;  %2504 = vrcp.f32 %v1762_v26  ;;  %v1965_v10 = vrot.slane %v2745_v40, %v1909_v38 }
0x102a   :  { %v1742_v42 = vrot.slane %v1741_v12, 4 }
0x102b   :  { %v1688_v13 = vrot.slane %v1687_v0, 2 }
0x102c   :  { %v1743_v11 = vadd.f32 %v1742_v42, %v1741_v12 }
0x102d   :  { %v1689_v14 = vadd.f32 %v1688_v13, %v1687_v0 }
0x102e   :  { %v1744_v15 = vrot.slane %v1743_v11, 2 }
0x102f   :  { %v1690_v16 = vrot.slane %v1689_v14, 1 }
0x1030   :  { %v1745_v17 = vadd.f32 %v1744_v15, %v1743_v11 }
0x1031   :  { %v1691_v18 = vadd.f32 %v1690_v16, %v1689_v14 }
0x1032   :  { %v1746_v19 = vrot.slane %v1745_v17, 1 }
0x1033   :  { %1713 = vrot.lane.b32.xlu1 %v1691_v18, %s2570_s20 }
0x1034   :  { %v1747_v20 = vadd.f32 %v1746_v19, %v1745_v17 }
0x1035   :  { %v2503_v28 = vpop.eup %2502 }
0x1036   :  { %1772 = vrot.lane.b32.xlu0 %v1747_v20, %s2570_s20  ;;  %v2505_v32 = vpop.eup %2504 }
0x1091   :  { %v1709_v27 = vpop.permute.xlu1 %1708 }
0x1092   :  { %v1711_v29 = vmul.f32 %v2503_v28, %v1709_v27 }
0x1093   :  { %v1768_v30 = vpop.permute.xlu0 %1767 }
0x1094   :  { %v1770_v34 = vmul.f32 %v2505_v32, %v1768_v30 }
0x10a5   :  { %v1714_v31 = vpop.permute.xlu1 %1713 }
0x10a6   :  { %v1716_v33 = vadd.f32 %v1714_v31, %v1711_v29 }
0x10a8   :  { %2506 = vtanh.f32 %v1716_v33  ;;  %v1773_v35 = vpop.permute.xlu0 %1772 }
0x10a9   :  { %v1775_v43 = vadd.f32 %v1773_v35, %v1770_v34 }
0x10ab   :  { %2508 = vtanh.f32 %v1775_v43 }
0x10b5   :  { %v2507_v44 = vpop.eup %2506 }
0x10b6   :  { %1719 = vrot.lane.b32.xlu1 %v2507_v44, %s2570_s20 }
0x10b8   :  { %v2509_v45 = vpop.eup %2508 }
0x10b9   :  { %1778 = vrot.lane.b32.xlu0 %v2509_v45, %s2570_s20 }
0x1128   :  { %v1720_v46 = vpop.permute.xlu1 %1719 }
0x1129   :  { %v1722_v47 = vmul.f32 %v2503_v28, %v1720_v46 }
0x112b   :  { %v1723_v48 = vsel %vm188_vm9, %v1716_v33, %v1722_v47  ;;  %v1779_v49 = vpop.permute.xlu0 %1778 }
0x112c   :  { %v1781_v50 = vmul.f32 %v2505_v32, %v1779_v49  ;;  %1725 = vst.msk [vmem:[#allocation2] sm:$0x40] %vm1724_vm7, %v1723_v48 }
0x112e   :  { %v1782_v51 = vsel %vm188_vm9, %v1775_v43, %v1781_v50 }
0x112f   :  { %1783 = vst.msk [vmem:[#allocation2 + $0x8] sm:$0x40] %vm1724_vm7, %v1782_v51 }
0x1136   :  { %v1791_v57 = vld [vmem:[%s1790_s21] sm:$0x1]  ;;  %v2171_v59 = vld [vmem:[%s2069_s4 + $0x8] sm:$0x1] }
0x1137   :  { %v1798_v58 = vld [vmem:[%s1797_s22] sm:$0x1]  ;;  %v1811_v61 = vsel %vm1810_vm12, %v2171_v59, 0.0  ;;  %v2172_v62 = vld [vmem:[%s2071_s3 + $0x8] sm:$0x1]  ;;  %v1796_v2 = vsel %vm3061_vm13, %v1791_v57, 0.0 }
0x1138   :  { %v1803_v60 = vsel %vm1802_vm11, %v1798_v58, 0.0  ;;  %v1819_v63 = vsel %vm1818_vm14, %v2172_v62, 0.0  ;;  %v1824_v5 = vrot.slane %v1811_v61, 6 }
0x1139   :  { %v1821_v1 = vrot.slane %v1803_v60, 7  ;;  %v1827_v36 = vrot.slane %v1819_v63, 5 }
0x113b   :  { %v1829_v3 = vsel %vm179_vm4, %v1796_v2, %v1821_v1  ;;  %vm1959_vm4 = vcmask 523271  }
0x113c   :  { %v1830_v4 = vsel %vm181_vm6, %v1829_v3, %v1824_v5 }
0x113d   :  { %v1831_v7 = vsel %vm183_vm8, %v1830_v4, %v1827_v36 }
0x113e   :  { %1833 = vrot.lane.b32.xlu1 %v1831_v7, %s2568_s2 }
0x11b0   :  { %v1834_v6 = vpop.permute.xlu1 %1833 }
0x11b1   :  { %2333 = vmatmul.mubr.msk.f32.vlgmr.msra.gmra.mxu1 %vm188_vm9, %v1834_v6 }
0x1271   :  { %v1903_v9 = vpop.f32.mrf.mxu1 }
0x1272   :  { %v1911_v39 = vadd.f32 %v1910_v8, %v1903_v9  ;;  %v1927_v0 = vsel %vm181_vm6, %v1903_v9, 0.0  ;;  %v1966_v12 = vadd.f32 %v1965_v10, %v1903_v9  ;;  %v1985_v42 = vrot.slane %v1903_v9, 2 }
0x1273   :  { %v1928_v13 = vrot.slane %v1927_v0, 4  ;;  %v2334_v11 = vpop.f32.mrf.mxu1 }
0x1274   :  { %v2174_v14 = vmul.f32 -1.442695, %v1911_v39  ;;  %v2176_v15 = vmul.f32 -1.442695, %v1966_v12  ;;  %v1987_v16 = vsel %vm181_vm6, %v1985_v42, 0.0 }
0x1275   :  { %v1929_v17 = vadd.f32 %v1928_v13, %v1927_v0  ;;  %v1988_v18 = vrot.slane %v1987_v16, 4 }
0x1276   :  { %2510 = vpow2.f32 %v2174_v14 }
0x1277   :  { %v1930_v37 = vrot.slane %v1929_v17, 2  ;;  %2512 = vpow2.f32 %v2176_v15  ;;  %v1989_v19 = vadd.f32 %v1988_v18, %v1987_v16 }
0x1279   :  { %v1931_v20 = vadd.f32 %v1930_v37, %v1929_v17  ;;  %v1990_v21 = vrot.slane %v1989_v19, 2 }
0x127b   :  { %v1932_v22 = vrot.slane %v1931_v20, 1  ;;  %v1991_v23 = vadd.f32 %v1990_v21, %v1989_v19 }
0x127d   :  { %v1933_v24 = vadd.f32 %v1932_v22, %v1931_v20  ;;  %v1992_v25 = vrot.slane %v1991_v23, 1 }
0x127f   :  { %v1934_v26 = vadd.f32 %v1933_v24, %v2747_v41  ;;  %v1993_v27 = vadd.f32 %v1992_v25, %v1991_v23 }
0x1281   :  { %2514 = vtanh.f32 %v1934_v26  ;;  %v1994_v28 = vadd.f32 %v1993_v27, %v2745_v40  ;;  %v2175_v59 = vmul.f32 -1.442695, %v1934_v26 }
0x1283   :  { %v2511_v29 = vpop.eup %2510  ;;  %2516 = vtanh.f32 %v1994_v28  ;;  %v2177_v60 = vmul.f32 -1.442695, %v1994_v28 }
0x1284   :  { %v2513_v30 = vpop.eup %2512  ;;  %v1915_v31 = vadd.f32 1.0, %v2511_v29 }
0x1285   :  { %v1970_v32 = vadd.f32 1.0, %v2513_v30 }
0x1286   :  { %2518 = vrcp.f32 %v1915_v31 }
0x1287   :  { %2520 = vrcp.f32 %v1970_v32 }
0x1288   :  { %2522 = vpow2.f32 %v2175_v59 }
0x1289   :  { %2524 = vpow2.f32 %v2177_v60 }
0x128e   :  { %v2515_v33 = vpop.eup %2514 }
0x128f   :  { %1943 = vrot.lane.b32.xlu0 %v2515_v33, %s2569_s5 }
0x1290   :  { %v2517_v34 = vpop.eup %2516 }
0x1291   :  { %2003 = vrot.lane.b32.xlu1 %v2517_v34, %s2569_s5 }
0x1293   :  { %v2519_v35 = vpop.eup %2518 }
0x1294   :  { %v2521_v43 = vpop.eup %2520  ;;  %v1919_v41 = vmul.f32 %v2519_v35, %v1834_v6 }
0x1295   :  { %v1973_v44 = vmul.f32 %v2521_v43, %v1834_v6  ;;  %v2523_v61 = vpop.eup %2522 }
0x1296   :  { %v1920_v45 = vsel %vm274_vm10, %v1919_v41, 0.0  ;;  %v2525_v62 = vpop.eup %2524  ;;  %v1938_v63 = vadd.f32 1.0, %v2523_v61 }
0x1297   :  { %v1921_v40 = vrot.slane %v1920_v45, 4  ;;  %v1975_v46 = vrot.slane %v1973_v44, 2  ;;  %v1998_v1 = vadd.f32 1.0, %v2525_v62 }
0x1298   :  { %2526 = vrcp.f32 %v1938_v63 }
0x1299   :  { %v1922_v47 = vadd.f32 %v1921_v40, %v1920_v45  ;;  %v1977_v48 = vsel %vm274_vm10, %v1975_v46, 0.0  ;;  %2528 = vrcp.f32 %v1998_v1 }
0x129a   :  { %v1978_v49 = vrot.slane %v1977_v48, 4 }
0x129b   :  { %v1923_v50 = vrot.slane %v1922_v47, 2 }
0x129c   :  { %v1979_v51 = vadd.f32 %v1978_v49, %v1977_v48 }
0x129d   :  { %v1924_v52 = vadd.f32 %v1923_v50, %v1922_v47 }
0x129e   :  { %v1980_v53 = vrot.slane %v1979_v51, 2 }
0x129f   :  { %v1925_v54 = vrot.slane %v1924_v52, 1 }
0x12a0   :  { %v1981_v55 = vadd.f32 %v1980_v53, %v1979_v51 }
0x12a1   :  { %v1926_v56 = vadd.f32 %v1925_v54, %v1924_v52 }
0x12a2   :  { %v1982_v57 = vrot.slane %v1981_v55, 1 }
0x12a3   :  { %1948 = vrot.lane.b32.xlu0 %v1926_v56, %s2570_s20 }
0x12a4   :  { %v1983_v58 = vadd.f32 %v1982_v57, %v1981_v55 }
0x12a5   :  { %v2527_v2 = vpop.eup %2526 }
0x12a6   :  { %2008 = vrot.lane.b32.xlu1 %v1983_v58, %s2570_s20  ;;  %v2529_v7 = vpop.eup %2528 }
0x1301   :  { %v1944_v5 = vpop.permute.xlu0 %1943 }
0x1302   :  { %v1946_v36 = vmul.f32 %v2527_v2, %v1944_v5 }
0x1303   :  { %v2004_v3 = vpop.permute.xlu1 %2003 }
0x1304   :  { %v2006_v38 = vmul.f32 %v2529_v7, %v2004_v3 }
0x1315   :  { %v1949_v4 = vpop.permute.xlu0 %1948 }
0x1316   :  { %v1951_v6 = vadd.f32 %v1949_v4, %v1946_v36 }
0x1318   :  { %2530 = vtanh.f32 %v1951_v6  ;;  %v2009_v8 = vpop.permute.xlu1 %2008 }
0x1319   :  { %v2011_v10 = vadd.f32 %v2009_v8, %v2006_v38 }
0x131b   :  { %2532 = vtanh.f32 %v2011_v10 }
0x1325   :  { %v2531_v9 = vpop.eup %2530 }
0x1326   :  { %1954 = vrot.lane.b32.xlu0 %v2531_v9, %s2570_s20 }
0x1328   :  { %v2533_v39 = vpop.eup %2532 }
0x1329   :  { %2014 = vrot.lane.b32.xlu1 %v2533_v39, %s2570_s20 }
0x1398   :  { %v1955_v0 = vpop.permute.xlu0 %1954 }
0x1399   :  { %v1957_v12 = vmul.f32 %v2527_v2, %v1955_v0 }
0x139b   :  { %v1958_v42 = vsel %vm188_vm9, %v1951_v6, %v1957_v12  ;;  %v2015_v13 = vpop.permute.xlu1 %2014 }
0x139c   :  { %1960 = vst.msk [vmem:[#allocation2] sm:$0x80] %vm1959_vm4, %v1958_v42  ;;  %1961 = vst.msk [vmem:[%s3103_s6 - $0x7] sm:$0x80] %vm1959_vm4, %v1958_v42  ;;  %v2017_v11 = vmul.f32 %v2529_v7, %v2015_v13 }
0x139e   :  { %v2018_v14 = vsel %vm188_vm9, %v2011_v10, %v2017_v11 }
0x139f   :  { %2019 = vst.msk [vmem:[#allocation2 + $0x8] sm:$0x80] %vm1959_vm4, %v2018_v14  ;;  %2020 = vst.msk [vmem:[%s3103_s6 - $0x6] sm:$0x80] %vm1959_vm4, %v2018_v14 }

</bundles_post_ra>
